<compile_context>
chip_gen: v5e
topology: v5e:2x2
jax: 0.10.0
libtpu: 0.0.40
codegen_flags: <defaults>
</compile_context>

<pallas_src>
import functools
import math

import jax
import jax.numpy as jnp
from jax import lax
from jax.experimental import pallas as pl
from jax.experimental.pallas import tpu as pltpu


def _ceil_div(a, b):
    return -(-a // b)


def _round_up(a, m):
    return _ceil_div(a, m) * m


def _axis_phase_params(size, K, s, P, OP):
    """Static per-axis sub-pixel (phase) decomposition parameters.

    For output index od (0 <= od < out) write m = od + P = u*s + r.  Phase r
    uses kernel taps k = v*s + r (v in [0, nt)) and input index i = u - v.
    """
    out = (size - 1) * s - 2 * P + K + OP
    params = []
    for r in range(s):
        nt = _ceil_div(K - r, s)            # taps k = v*s + r
        u_min = _ceil_div(P - r, s)         # smallest u with u*s + r >= P
        u_max = (P + out - 1 - r) // s      # largest  u with u*s + r <= P+out-1
        n = u_max - u_min + 1               # number of outputs in this phase
        od0 = u_min * s + r - P             # first output coordinate of phase
        params.append(dict(r=r, nt=nt, u_min=u_min, u_max=u_max, n=n, od0=od0))
    return out, params


def _make_phase_matmul_kernel(phase_meta):
    n_phases = len(phase_meta)

    def kernel(w_ref, *refs):
        patch_refs = refs[:n_phases]
        out_ref = refs[n_phases]
        # All offsets/sizes below are static Python ints (8-row aligned).
        for meta, p_ref in zip(phase_meta, patch_refs):
            r0, rn = meta["out_row"], meta["rows"]
            w0, kp = meta["w_row"], meta["k"]
            acc = jnp.dot(p_ref[0, :, :], w_ref[w0:w0 + kp, :],
                          preferred_element_type=jnp.float32)
            out_ref[0, r0:r0 + rn, :] = acc

    return kernel


@functools.partial(jax.jit,
                   static_argnames=("stride", "padding", "output_padding",
                                    "groups"))
def conv_transpose3d_pallas(x, w, *, stride, padding, output_padding, groups):
    N, Cin, D, H, W = x.shape
    Cin_w, Cog, K, K2, K3 = w.shape
    assert Cin_w == Cin
    assert K == K2 == K3, "cubic kernel expected"
    assert isinstance(stride, int) and isinstance(padding, int), \
        "isotropic stride/padding expected"
    G = groups
    Cig = Cin // G
    Cout = Cog * G
    s, P, OP = stride, padding, output_padding

    Do, dpar = _axis_phase_params(D, K, s, P, OP)
    Ho, hpar = _axis_phase_params(H, K, s, P, OP)
    Wo, wpar = _axis_phase_params(W, K, s, P, OP)

    # ---- channels-last input, padded so every phase/tap window is in range ---
    x_cl = jnp.transpose(x, (0, 2, 3, 4, 1))          # (N, D, H, W, Cin)
    pads = []
    for size, par in ((D, dpar), (H, hpar), (W, wpar)):
        used = [p for p in par if p["n"] > 0 and p["nt"] > 0]
        lo = max([0] + [p["nt"] - 1 - p["u_min"] for p in used])
        hi = max([0] + [p["u_max"] - (size - 1) for p in used])
        pads.append((lo, hi))
    (Ld, Rd), (Lh, Rh), (Lw, Rw) = pads
    x_pad = jnp.pad(x_cl, ((0, 0), (Ld, Rd), (Lh, Rh), (Lw, Rw), (0, 0)))

    # ---- block-diagonal (grouped) weight per kernel tap: (Cin, Cout, K,K,K) --
    wg = w.reshape(G, Cig, Cog, K, K, K)
    eye = jnp.eye(G, dtype=w.dtype)
    w_bd = jnp.einsum("gicabe,gh->gihcabe", wg, eye)
    w_bd = w_bd.reshape(Cin, Cout, K, K, K)

    # ---- per-phase im2col patches + row-packed weights (all static layout) ---
    patches = []       # (N, M_pad, K_p) per phase
    w_blocks = []      # (K_p, Cout) per phase
    phase_meta = []    # static metadata for kernel + output reassembly
    out_row = 0
    w_row = 0
    for pd in dpar:
        for ph in hpar:
            for pw in wpar:
                if min(pd["n"], ph["n"], pw["n"]) <= 0:
                    continue                      # no outputs in this phase
                if min(pd["nt"], ph["nt"], pw["nt"]) <= 0:
                    continue                      # no taps -> outputs stay zero
                nd, nh, nw = pd["n"], ph["n"], pw["n"]
                M = nd * nh * nw
                tap_blocks = []
                tap_weights = []
                for vd in range(pd["nt"]):
                    d0 = pd["u_min"] - vd + Ld
                    for vh in range(ph["nt"]):
                        h0 = ph["u_min"] - vh + Lh
                        for vw in range(pw["nt"]):
                            w0 = pw["u_min"] - vw + Lw
                            blk = x_pad[:, d0:d0 + nd, h0:h0 + nh,
                                        w0:w0 + nw, :]
                            tap_blocks.append(blk.reshape(N, M, Cin))
                            kd = vd * s + pd["r"]
                            kh = vh * s + ph["r"]
                            kw = vw * s + pw["r"]
                            tap_weights.append(w_bd[:, :, kd, kh, kw])
                Kp = len(tap_blocks) * Cin
                M_pad = _round_up(M, 8)
                patch = jnp.concatenate(tap_blocks, axis=-1)      # (N, M, Kp)
                patch = jnp.pad(patch, ((0, 0), (0, M_pad - M), (0, 0)))
                patches.append(patch)
                w_blocks.append(jnp.concatenate(tap_weights, axis=0))
                phase_meta.append(dict(
                    out_row=out_row, rows=M_pad, valid_rows=M, k=Kp,
                    w_row=w_row, nd=nd, nh=nh, nw=nw,
                    od0=(pd["od0"], ph["od0"], pw["od0"])))
                out_row += M_pad
                w_row += Kp

    R_total = out_row
    w_packed = jnp.concatenate(w_blocks, axis=0)   # (sum K_p, Cout)

    kernel = _make_phase_matmul_kernel(phase_meta)

    in_specs = [pl.BlockSpec(w_packed.shape, lambda n: (0, 0))]
    in_specs += [pl.BlockSpec((1,) + p.shape[1:], lambda n: (n, 0, 0))
                 for p in patches]

    out_flat = pl.pallas_call(
        kernel,
        out_shape=jax.ShapeDtypeStruct((N, R_total, Cout), jnp.float32),
        grid=(N,),
        in_specs=in_specs,
        out_specs=pl.BlockSpec((1, R_total, Cout), lambda n: (n, 0, 0)),
        compiler_params=pltpu.CompilerParams(
            dimension_semantics=("parallel",),
            vmem_limit_bytes=32 * 1024 * 1024),
    )(w_packed, *patches)

    # ---- interleave the phase outputs back into (N, Cout, Do, Ho, Wo) -------
    y_cl = jnp.zeros((N, Do, Ho, Wo, Cout), jnp.float32)
    for meta in phase_meta:
        r0 = meta["out_row"]
        M = meta["valid_rows"]
        nd, nh, nw = meta["nd"], meta["nh"], meta["nw"]
        od0, oh0, ow0 = meta["od0"]
        blk = out_flat[:, r0:r0 + M, :].reshape(N, nd, nh, nw, Cout)
        y_cl = y_cl.at[:, od0::s, oh0::s, ow0::s, :].set(blk)
    return jnp.transpose(y_cl, (0, 4, 1, 2, 3))


def conv_transpose3d_ref(x, w, *, stride, padding, output_padding, groups):
    """Pure-JAX reference: transposed conv via dilated conv + crop."""
    N, Cin, D, H, W = x.shape
    _, Cog, K, _, _ = w.shape
    G = groups
    Cig = Cin // G
    Cout = Cog * G
    w_conv = w.reshape(G, Cig, Cog, K, K, K)[:, :, :, ::-1, ::-1, ::-1]
    w_conv = w_conv.transpose(0, 2, 1, 3, 4, 5).reshape(Cout, Cig, K, K, K)
    y_full = lax.conv_general_dilated(
        x, w_conv,
        window_strides=(1, 1, 1),
        padding=[(K - 1, K - 1)] * 3,
        lhs_dilation=(stride,) * 3,
        dimension_numbers=('NCDHW', 'OIDHW', 'NCDHW'),
        feature_group_count=G,
        precision=lax.Precision.HIGHEST)
    P = padding
    sl = (slice(None), slice(None)) + tuple(
        slice(P, y_full.shape[2 + i] - P + output_padding) for i in range(3))
    return y_full[sl]


if __name__ == "__main__":
    # Module hyper-parameters from the PyTorch script.
    in_channels, out_channels, groups = 32, 64, 4
    kernel_size, stride, padding, output_padding = 3, 2, 3, 0

    # Small asymmetric spatial input, consistent with the module's forward.
    N, D, H, W = 2, 8, 10, 12

    key = jax.random.PRNGKey(0)
    kx, kw = jax.random.split(key)
    x = jax.random.normal(kx, (N, in_channels, D, H, W), dtype=jnp.float32)

    # Deterministic kaiming_uniform(a=sqrt(5))-style init.
    fan_in = (out_channels // groups) * kernel_size ** 3
    bound = 1.0 / math.sqrt(fan_in)
    weight = jax.random.uniform(
        kw, (in_channels, out_channels // groups,
             kernel_size, kernel_size, kernel_size),
        dtype=jnp.float32, minval=-bound, maxval=bound)

    y = conv_transpose3d_pallas(
        x, weight, stride=stride, padding=padding,
        output_padding=output_padding, groups=groups)
    y = jax.block_until_ready(y)

    Do = (D - 1) * stride - 2 * padding + kernel_size + output_padding
    Ho = (H - 1) * stride - 2 * padding + kernel_size + output_padding
    Wo = (W - 1) * stride - 2 * padding + kernel_size + output_padding
    assert y.shape == (N, out_channels, Do, Ho, Wo), y.shape

    y_ref = conv_transpose3d_ref(
        x, weight, stride=stride, padding=padding,
        output_padding=output_padding, groups=groups)
    err = float(jnp.max(jnp.abs(y - y_ref)))
    assert err < 1e-3, f"max abs err {err}"

    print("KERNEL_OK")
</pallas_src>

<mosaic_0001>
module attributes {stable_mosaic.version = 11 : i64} {
  func.func @kernel(%arg0: i32, %arg1: memref<864x64xf32, #tpu.memory_space<vmem>>, %arg2: memref<1x320x256xf32, #tpu.memory_space<vmem>>, %arg3: memref<1x352x128xf32, #tpu.memory_space<vmem>>, %arg4: memref<1x360x128xf32, #tpu.memory_space<vmem>>, %arg5: memref<1x400x64xf32, #tpu.memory_space<vmem>>, %arg6: memref<1x384x128xf32, #tpu.memory_space<vmem>>, %arg7: memref<1x424x64xf32, #tpu.memory_space<vmem>>, %arg8: memref<1x432x64xf32, #tpu.memory_space<vmem>>, %arg9: memref<1x480x32xf32, #tpu.memory_space<vmem>>, %arg10: memref<1x3152x64xf32, #tpu.memory_space<vmem>>) attributes {dimension_semantics = [#tpu.dimension_semantics<parallel>], iteration_bounds = array<i64: 2>, scalar_prefetch = 0 : i64, scratch_operands = 0 : i64, tpu.core_type = #tpu.core_type<tc>, window_params = [{pipeline_mode = #tpu.pipeline_mode<synchronous>, transform_indices = @transform_0, window_bounds = array<i64: 864, 64>}, {transform_indices = @transform_1, window_bounds = array<i64: 1, 320, 256>}, {transform_indices = @transform_2, window_bounds = array<i64: 1, 352, 128>}, {transform_indices = @transform_3, window_bounds = array<i64: 1, 360, 128>}, {transform_indices = @transform_4, window_bounds = array<i64: 1, 400, 64>}, {transform_indices = @transform_5, window_bounds = array<i64: 1, 384, 128>}, {transform_indices = @transform_6, window_bounds = array<i64: 1, 424, 64>}, {transform_indices = @transform_7, window_bounds = array<i64: 1, 432, 64>}, {transform_indices = @transform_8, window_bounds = array<i64: 1, 480, 32>}, {transform_indices = @transform_9, window_bounds = array<i64: 1, 3152, 64>}]} {
    %c0 = arith.constant 0 : index
    %c0_0 = arith.constant 0 : index
    %c0_1 = arith.constant 0 : index
    %0 = vector.load %arg2[%c0, %c0_0, %c0_1] : memref<1x320x256xf32, #tpu.memory_space<vmem>>, vector<1x320x256xf32>
    %1 = vector.shape_cast %0 : vector<1x320x256xf32> to vector<320x256xf32>
    %c0_2 = arith.constant 0 : index
    %c0_3 = arith.constant 0 : index
    %2 = vector.load %arg1[%c0_2, %c0_3] : memref<864x64xf32, #tpu.memory_space<vmem>>, vector<256x64xf32>
    %cst = arith.constant dense<0.000000e+00> : vector<320x64xf32>
    %3 = tpu.matmul %1, %2, %cst {dimension_numbers = #tpu.dot_dimension_numbers<[1], [0], [0], [1], [0, 0, 1, 1], [], []>} : vector<320x256xf32>, vector<256x64xf32>, vector<320x64xf32> -> vector<320x64xf32>
    %c0_4 = arith.constant 0 : index
    %c0_5 = arith.constant 0 : index
    %c0_6 = arith.constant 0 : index
    %4 = vector.load %arg10[%c0_4, %c0_5, %c0_6] : memref<1x3152x64xf32, #tpu.memory_space<vmem>>, vector<1x320x64xf32>
    %5 = vector.shape_cast %4 : vector<1x320x64xf32> to vector<320x64xf32>
    %6 = vector.shape_cast %3 : vector<320x64xf32> to vector<1x320x64xf32>
    tpu.vector_store %arg10[%c0_4, %c0_5, %c0_6], %6 {strides = array<i32>} : memref<1x3152x64xf32, #tpu.memory_space<vmem>>, vector<1x320x64xf32>,
    %c0_7 = arith.constant 0 : index
    %c0_8 = arith.constant 0 : index
    %c0_9 = arith.constant 0 : index
    %7 = vector.load %arg3[%c0_7, %c0_8, %c0_9] : memref<1x352x128xf32, #tpu.memory_space<vmem>>, vector<1x352x128xf32>
    %8 = vector.shape_cast %7 : vector<1x352x128xf32> to vector<352x128xf32>
    %c256 = arith.constant 256 : index
    %c0_10 = arith.constant 0 : index
    %9 = vector.load %arg1[%c256, %c0_10] : memref<864x64xf32, #tpu.memory_space<vmem>>, vector<128x64xf32>
    %cst_11 = arith.constant dense<0.000000e+00> : vector<352x64xf32>
    %10 = tpu.matmul %8, %9, %cst_11 {dimension_numbers = #tpu.dot_dimension_numbers<[1], [0], [0], [1], [0, 0, 1, 1], [], []>} : vector<352x128xf32>, vector<128x64xf32>, vector<352x64xf32> -> vector<352x64xf32>
    %c0_12 = arith.constant 0 : index
    %c320 = arith.constant 320 : index
    %c0_13 = arith.constant 0 : index
    %11 = vector.load %arg10[%c0_12, %c320, %c0_13] : memref<1x3152x64xf32, #tpu.memory_space<vmem>>, vector<1x352x64xf32>
    %12 = vector.shape_cast %11 : vector<1x352x64xf32> to vector<352x64xf32>
    %13 = vector.shape_cast %10 : vector<352x64xf32> to vector<1x352x64xf32>
    tpu.vector_store %arg10[%c0_12, %c320, %c0_13], %13 {strides = array<i32>} : memref<1x3152x64xf32, #tpu.memory_space<vmem>>, vector<1x352x64xf32>,
    %c0_14 = arith.constant 0 : index
    %c0_15 = arith.constant 0 : index
    %c0_16 = arith.constant 0 : index
    %14 = vector.load %arg4[%c0_14, %c0_15, %c0_16] : memref<1x360x128xf32, #tpu.memory_space<vmem>>, vector<1x360x128xf32>
    %15 = vector.shape_cast %14 : vector<1x360x128xf32> to vector<360x128xf32>
    %c384 = arith.constant 384 : index
    %c0_17 = arith.constant 0 : index
    %16 = vector.load %arg1[%c384, %c0_17] : memref<864x64xf32, #tpu.memory_space<vmem>>, vector<128x64xf32>
    %cst_18 = arith.constant dense<0.000000e+00> : vector<360x64xf32>
    %17 = tpu.matmul %15, %16, %cst_18 {dimension_numbers = #tpu.dot_dimension_numbers<[1], [0], [0], [1], [0, 0, 1, 1], [], []>} : vector<360x128xf32>, vector<128x64xf32>, vector<360x64xf32> -> vector<360x64xf32>
    %c0_19 = arith.constant 0 : index
    %c672 = arith.constant 672 : index
    %c0_20 = arith.constant 0 : index
    %18 = vector.load %arg10[%c0_19, %c672, %c0_20] : memref<1x3152x64xf32, #tpu.memory_space<vmem>>, vector<1x360x64xf32>
    %19 = vector.shape_cast %18 : vector<1x360x64xf32> to vector<360x64xf32>
    %20 = vector.shape_cast %17 : vector<360x64xf32> to vector<1x360x64xf32>
    tpu.vector_store %arg10[%c0_19, %c672, %c0_20], %20 {strides = array<i32>} : memref<1x3152x64xf32, #tpu.memory_space<vmem>>, vector<1x360x64xf32>,
    %c0_21 = arith.constant 0 : index
    %c0_22 = arith.constant 0 : index
    %c0_23 = arith.constant 0 : index
    %21 = vector.load %arg5[%c0_21, %c0_22, %c0_23] : memref<1x400x64xf32, #tpu.memory_space<vmem>>, vector<1x400x64xf32>
    %22 = vector.shape_cast %21 : vector<1x400x64xf32> to vector<400x64xf32>
    %c512 = arith.constant 512 : index
    %c0_24 = arith.constant 0 : index
    %23 = vector.load %arg1[%c512, %c0_24] : memref<864x64xf32, #tpu.memory_space<vmem>>, vector<64x64xf32>
    %cst_25 = arith.constant dense<0.000000e+00> : vector<400x64xf32>
    %24 = tpu.matmul %22, %23, %cst_25 {dimension_numbers = #tpu.dot_dimension_numbers<[1], [0], [0], [1], [0, 0, 1, 1], [], []>} : vector<400x64xf32>, vector<64x64xf32>, vector<400x64xf32> -> vector<400x64xf32>
    %c0_26 = arith.constant 0 : index
    %c1032 = arith.constant 1032 : index
    %c0_27 = arith.constant 0 : index
    %25 = vector.load %arg10[%c0_26, %c1032, %c0_27] : memref<1x3152x64xf32, #tpu.memory_space<vmem>>, vector<1x400x64xf32>
    %26 = vector.shape_cast %25 : vector<1x400x64xf32> to vector<400x64xf32>
    %27 = vector.shape_cast %24 : vector<400x64xf32> to vector<1x400x64xf32>
    tpu.vector_store %arg10[%c0_26, %c1032, %c0_27], %27 {strides = array<i32>} : memref<1x3152x64xf32, #tpu.memory_space<vmem>>, vector<1x400x64xf32>,
    %c0_28 = arith.constant 0 : index
    %c0_29 = arith.constant 0 : index
    %c0_30 = arith.constant 0 : index
    %28 = vector.load %arg6[%c0_28, %c0_29, %c0_30] : memref<1x384x128xf32, #tpu.memory_space<vmem>>, vector<1x384x128xf32>
    %29 = vector.shape_cast %28 : vector<1x384x128xf32> to vector<384x128xf32>
    %c576 = arith.constant 576 : index
    %c0_31 = arith.constant 0 : index
    %30 = vector.load %arg1[%c576, %c0_31] : memref<864x64xf32, #tpu.memory_space<vmem>>, vector<128x64xf32>
    %cst_32 = arith.constant dense<0.000000e+00> : vector<384x64xf32>
    %31 = tpu.matmul %29, %30, %cst_32 {dimension_numbers = #tpu.dot_dimension_numbers<[1], [0], [0], [1], [0, 0, 1, 1], [], []>} : vector<384x128xf32>, vector<128x64xf32>, vector<384x64xf32> -> vector<384x64xf32>
    %c0_33 = arith.constant 0 : index
    %c1432 = arith.constant 1432 : index
    %c0_34 = arith.constant 0 : index
    %32 = vector.load %arg10[%c0_33, %c1432, %c0_34] : memref<1x3152x64xf32, #tpu.memory_space<vmem>>, vector<1x384x64xf32>
    %33 = vector.shape_cast %32 : vector<1x384x64xf32> to vector<384x64xf32>
    %34 = vector.shape_cast %31 : vector<384x64xf32> to vector<1x384x64xf32>
    tpu.vector_store %arg10[%c0_33, %c1432, %c0_34], %34 {strides = array<i32>} : memref<1x3152x64xf32, #tpu.memory_space<vmem>>, vector<1x384x64xf32>,
    %c0_35 = arith.constant 0 : index
    %c0_36 = arith.constant 0 : index
    %c0_37 = arith.constant 0 : index
    %35 = vector.load %arg7[%c0_35, %c0_36, %c0_37] : memref<1x424x64xf32, #tpu.memory_space<vmem>>, vector<1x424x64xf32>
    %36 = vector.shape_cast %35 : vector<1x424x64xf32> to vector<424x64xf32>
    %c704 = arith.constant 704 : index
    %c0_38 = arith.constant 0 : index
    %37 = vector.load %arg1[%c704, %c0_38] : memref<864x64xf32, #tpu.memory_space<vmem>>, vector<64x64xf32>
    %cst_39 = arith.constant dense<0.000000e+00> : vector<424x64xf32>
    %38 = tpu.matmul %36, %37, %cst_39 {dimension_numbers = #tpu.dot_dimension_numbers<[1], [0], [0], [1], [0, 0, 1, 1], [], []>} : vector<424x64xf32>, vector<64x64xf32>, vector<424x64xf32> -> vector<424x64xf32>
    %c0_40 = arith.constant 0 : index
    %c1816 = arith.constant 1816 : index
    %c0_41 = arith.constant 0 : index
    %39 = vector.load %arg10[%c0_40, %c1816, %c0_41] : memref<1x3152x64xf32, #tpu.memory_space<vmem>>, vector<1x424x64xf32>
    %40 = vector.shape_cast %39 : vector<1x424x64xf32> to vector<424x64xf32>
    %41 = vector.shape_cast %38 : vector<424x64xf32> to vector<1x424x64xf32>
    tpu.vector_store %arg10[%c0_40, %c1816, %c0_41], %41 {strides = array<i32>} : memref<1x3152x64xf32, #tpu.memory_space<vmem>>, vector<1x424x64xf32>,
    %c0_42 = arith.constant 0 : index
    %c0_43 = arith.constant 0 : index
    %c0_44 = arith.constant 0 : index
    %42 = vector.load %arg8[%c0_42, %c0_43, %c0_44] : memref<1x432x64xf32, #tpu.memory_space<vmem>>, vector<1x432x64xf32>
    %43 = vector.shape_cast %42 : vector<1x432x64xf32> to vector<432x64xf32>
    %c768 = arith.constant 768 : index
    %c0_45 = arith.constant 0 : index
    %44 = vector.load %arg1[%c768, %c0_45] : memref<864x64xf32, #tpu.memory_space<vmem>>, vector<64x64xf32>
    %cst_46 = arith.constant dense<0.000000e+00> : vector<432x64xf32>
    %45 = tpu.matmul %43, %44, %cst_46 {dimension_numbers = #tpu.dot_dimension_numbers<[1], [0], [0], [1], [0, 0, 1, 1], [], []>} : vector<432x64xf32>, vector<64x64xf32>, vector<432x64xf32> -> vector<432x64xf32>
    %c0_47 = arith.constant 0 : index
    %c2240 = arith.constant 2240 : index
    %c0_48 = arith.constant 0 : index
    %46 = vector.load %arg10[%c0_47, %c2240, %c0_48] : memref<1x3152x64xf32, #tpu.memory_space<vmem>>, vector<1x432x64xf32>
    %47 = vector.shape_cast %46 : vector<1x432x64xf32> to vector<432x64xf32>
    %48 = vector.shape_cast %45 : vector<432x64xf32> to vector<1x432x64xf32>
    tpu.vector_store %arg10[%c0_47, %c2240, %c0_48], %48 {strides = array<i32>} : memref<1x3152x64xf32, #tpu.memory_space<vmem>>, vector<1x432x64xf32>,
    %c0_49 = arith.constant 0 : index
    %c0_50 = arith.constant 0 : index
    %c0_51 = arith.constant 0 : index
    %49 = vector.load %arg9[%c0_49, %c0_50, %c0_51] : memref<1x480x32xf32, #tpu.memory_space<vmem>>, vector<1x480x32xf32>
    %50 = vector.shape_cast %49 : vector<1x480x32xf32> to vector<480x32xf32>
    %c832 = arith.constant 832 : index
    %c0_52 = arith.constant 0 : index
    %51 = vector.load %arg1[%c832, %c0_52] : memref<864x64xf32, #tpu.memory_space<vmem>>, vector<32x64xf32>
    %cst_53 = arith.constant dense<0.000000e+00> : vector<480x64xf32>
    %52 = tpu.matmul %50, %51, %cst_53 {dimension_numbers = #tpu.dot_dimension_numbers<[1], [0], [0], [1], [0, 0, 1, 1], [], []>} : vector<480x32xf32>, vector<32x64xf32>, vector<480x64xf32> -> vector<480x64xf32>
    %c0_54 = arith.constant 0 : index
    %c2672 = arith.constant 2672 : index
    %c0_55 = arith.constant 0 : index
    %53 = vector.load %arg10[%c0_54, %c2672, %c0_55] : memref<1x3152x64xf32, #tpu.memory_space<vmem>>, vector<1x480x64xf32>
    %54 = vector.shape_cast %53 : vector<1x480x64xf32> to vector<480x64xf32>
    %55 = vector.shape_cast %52 : vector<480x64xf32> to vector<1x480x64xf32>
    tpu.vector_store %arg10[%c0_54, %c2672, %c0_55], %55 {strides = array<i32>} : memref<1x3152x64xf32, #tpu.memory_space<vmem>>, vector<1x480x64xf32>,
    return
  }
  func.func @transform_0(%arg0: i32) -> (i32, i32) {
    %c0_i32 = arith.constant 0 : i32
    %c0_i32_0 = arith.constant 0 : i32
    %c0_i32_1 = arith.constant 0 : i32
    return %c0_i32, %c0_i32_0 : i32, i32
  }
  func.func @transform_1(%arg0: i32) -> (i32, i32, i32) {
    %c0_i32 = arith.constant 0 : i32
    %c0_i32_0 = arith.constant 0 : i32
    %c0_i32_1 = arith.constant 0 : i32
    return %arg0, %c0_i32, %c0_i32_0 : i32, i32, i32
  }
  func.func @transform_2(%arg0: i32) -> (i32, i32, i32) {
    %c0_i32 = arith.constant 0 : i32
    %c0_i32_0 = arith.constant 0 : i32
    %c0_i32_1 = arith.constant 0 : i32
    return %arg0, %c0_i32, %c0_i32_0 : i32, i32, i32
  }
  func.func @transform_3(%arg0: i32) -> (i32, i32, i32) {
    %c0_i32 = arith.constant 0 : i32
    %c0_i32_0 = arith.constant 0 : i32
    %c0_i32_1 = arith.constant 0 : i32
    return %arg0, %c0_i32, %c0_i32_0 : i32, i32, i32
  }
  func.func @transform_4(%arg0: i32) -> (i32, i32, i32) {
    %c0_i32 = arith.constant 0 : i32
    %c0_i32_0 = arith.constant 0 : i32
    %c0_i32_1 = arith.constant 0 : i32
    return %arg0, %c0_i32, %c0_i32_0 : i32, i32, i32
  }
  func.func @transform_5(%arg0: i32) -> (i32, i32, i32) {
    %c0_i32 = arith.constant 0 : i32
    %c0_i32_0 = arith.constant 0 : i32
    %c0_i32_1 = arith.constant 0 : i32
    return %arg0, %c0_i32, %c0_i32_0 : i32, i32, i32
  }
  func.func @transform_6(%arg0: i32) -> (i32, i32, i32) {
    %c0_i32 = arith.constant 0 : i32
    %c0_i32_0 = arith.constant 0 : i32
    %c0_i32_1 = arith.constant 0 : i32
    return %arg0, %c0_i32, %c0_i32_0 : i32, i32, i32
  }
  func.func @transform_7(%arg0: i32) -> (i32, i32, i32) {
    %c0_i32 = arith.constant 0 : i32
    %c0_i32_0 = arith.constant 0 : i32
    %c0_i32_1 = arith.constant 0 : i32
    return %arg0, %c0_i32, %c0_i32_0 : i32, i32, i32
  }
  func.func @transform_8(%arg0: i32) -> (i32, i32, i32) {
    %c0_i32 = arith.constant 0 : i32
    %c0_i32_0 = arith.constant 0 : i32
    %c0_i32_1 = arith.constant 0 : i32
    return %arg0, %c0_i32, %c0_i32_0 : i32, i32, i32
  }
  func.func @transform_9(%arg0: i32) -> (i32, i32, i32) {
    %c0_i32 = arith.constant 0 : i32
    %c0_i32_0 = arith.constant 0 : i32
    %c0_i32_1 = arith.constant 0 : i32
    return %arg0, %c0_i32, %c0_i32_0 : i32, i32, i32
  }
}

</mosaic_0001>

<bundles_post_ra>
// kernel: conv_transpose3d_pallas.1
= control target key start
LH: loop header
LB: loop body
LE: loop exit
PB: predicated region body
PF: predicated region fallthrough
CT: control target
= control target key end

     0   :  { %s4012_s30 = smov 0   ;;  %s5960_s0 = inlined_call_operand.vmem [shape: f32[864,64], index: 0, kind: input, shape index: {}]   ;;  %s5961_s1 = inlined_call_operand.vmem [shape: f32[2,320,256], index: 1, kind: input, shape index: {}]   ;;  %s5962_s2 = inlined_call_operand.vmem [shape: f32[2,352,128], index: 2, kind: input, shape index: {}]   ;;  %s5963_s3 = inlined_call_operand.vmem [shape: f32[2,360,128], index: 3, kind: input, shape index: {}]   ;;  %s5964_s4 = inlined_call_operand.vmem [shape: f32[2,400,64], index: 4, kind: input, shape index: {}]   ;;  %s5965_s5 = inlined_call_operand.vmem [shape: f32[2,384,128], index: 5, kind: input, shape index: {}]   ;;  %s5966_s6 = inlined_call_operand.vmem [shape: f32[2,424,64], index: 6, kind: input, shape index: {}]   ;;  %s5967_s7 = inlined_call_operand.vmem [shape: f32[2,432,64], index: 7, kind: input, shape index: {}]   ;;  %s5968_s8 = inlined_call_operand.vmem [shape: f32[2,480,32], index: 8, kind: input, shape index: {}]   ;;  %s5969_s9 = inlined_call_operand.vmem [shape: f32[2,3152,64], index: 9, kind: output, shape index: {}]  }
   0x1 LB: > { %s3656_s10 = sadd.s32 4294967295, %s3960_s30   ;;  %p3660_p0 = scmp.ge.s32.totalorder %s3960_s30, 1  ;;  %s3960_s30 = sphi %s4012_s30, %s19_s30  }
   0x2   : > { %p357_p1 = scmp.lt.s32.totalorder %s3960_s30, 3 }
   0x4   : > { %p358_p2 = pnand %p3660_p0, %p357_p1 }
   0x5   : > { %p428_p3 = scmp.lt.s32.totalorder (!%p358_p2), %s3656_s10, 1 }
   0x6   : > { %361 = sbr.rel (%p358_p2) target bundleno = 1041 (0x411), region = 56 }
   0xb   : > { %v568_v0 = vld [vmem:[%s5960_s0 + $0x78] sm:$0xff]  ;;  %v567_v1 = vld [vmem:[%s5960_s0 + $0x70] sm:$0xff]  ;;  %v566_v2 = vld [vmem:[%s5960_s0 + $0x68] sm:$0xff]  ;;  %s5971_s10 = smov (!%p428_p3, %s3656_s10), 1  ;;  %vm859_vm0 = vcmask 523264   ;;  %vm3079_vm1 = vcmask 261120  }
   0xc   : > { %585 = vmatpush.msra.mxu0 %v568_v0  ;;  %3889 = vmatpush.msra.mxu2 %v568_v0  ;;  %v1899_v3 = vld [vmem:[%s5960_s0 + $0x2b8] sm:$0xff]  ;;  %v1898_v4 = vld [vmem:[%s5960_s0 + $0x2b0] sm:$0xff]  ;;  %v565_v5 = vld [vmem:[%s5960_s0 + $0x60] sm:$0xff]  ;;  %s3937_s21 = smul.u32 640, %s5971_s10 }
   0xd   : > { %3890 = vmatpush.msra.mxu3 %v568_v0  ;;  %1900 = vmatpush.msra.mxu1 %v1899_v3  ;;  %v1897_v6 = vld [vmem:[%s5960_s0 + $0x2a8] sm:$0xff]  ;;  %v564_v7 = vld [vmem:[%s5960_s0 + $0x58] sm:$0xff]  ;;  %v1896_v8 = vld [vmem:[%s5960_s0 + $0x2a0] sm:$0xff]  ;;  %s3941_s18 = smul.u32 384, %s5971_s10 }
   0xe   : > { %586 = vmatpush.msra.mxu0 %v567_v1  ;;  %3891 = vmatpush.msra.mxu2 %v567_v1  ;;  %v563_v9 = vld [vmem:[%s5960_s0 + $0x50] sm:$0xff]  ;;  %v1895_v10 = vld [vmem:[%s5960_s0 + $0x298] sm:$0xff]  ;;  %v562_v11 = vld [vmem:[%s5960_s0 + $0x48] sm:$0xff]  ;;  %s4114_s13 = scalar_lea.vmem %s5961_s1, %s3937_s21  ;;  %s3939_s21 = smul.u32 360, %s5971_s10 }
   0xf   : > { %3892 = vmatpush.msra.mxu3 %v567_v1  ;;  %1901 = vmatpush.msra.mxu1 %v1898_v4  ;;  %v1894_v12 = vld [vmem:[%s5960_s0 + $0x290] sm:$0xff]  ;;  %v561_v13 = vld [vmem:[%s5960_s0 + $0x40] sm:$0xff]  ;;  %v1893_v14 = vld [vmem:[%s5960_s0 + $0x288] sm:$0xff]  ;;  %s4138_s27 = scalar_lea.vmem %s5965_s5, %s3941_s18  ;;  %s3938_s14 = smul.u32 352, %s5971_s10 }
  0x10   : > { %587 = vmatpush.msra.mxu0 %v566_v2  ;;  %3893 = vmatpush.msra.mxu2 %v566_v2  ;;  %v560_v15 = vld [vmem:[%s5960_s0 + $0x38] sm:$0xff]  ;;  %v1892_v16 = vld [vmem:[%s5960_s0 + $0x280] sm:$0xff]  ;;  %v559_v17 = vld [vmem:[%s5960_s0 + $0x30] sm:$0xff]  ;;  %s4327_s29 = scalar_lea.vmem %s5963_s3, %s3939_s21  ;;  %s3945_s22 = smul.u32 3152, %s5971_s10 }
  0x11   : > { %3894 = vmatpush.msra.mxu3 %v566_v2  ;;  %1902 = vmatpush.msra.mxu1 %v1897_v6  ;;  %v1891_v18 = vld [vmem:[%s5960_s0 + $0x278] sm:$0xff]  ;;  %v558_v19 = vld [vmem:[%s5960_s0 + $0x28] sm:$0xff]  ;;  %v1890_v20 = vld [vmem:[%s5960_s0 + $0x270] sm:$0xff]  ;;  %s4347_s17 = scalar_lea.vmem %s5962_s2, %s3938_s14  ;;  %s3944_s26 = smul.u32 480, %s5971_s10 }
  0x12   : > { %588 = vmatpush.msra.mxu0 %v565_v5  ;;  %3895 = vmatpush.msra.mxu2 %v565_v5  ;;  %v557_v21 = vld [vmem:[%s5960_s0 + $0x20] sm:$0xff]  ;;  %v1889_v22 = vld [vmem:[%s5960_s0 + $0x268] sm:$0xff]  ;;  %v556_v23 = vld [vmem:[%s5960_s0 + $0x18] sm:$0xff]  ;;  %s4381_s25 = scalar_lea.vmem %s5969_s9, %s3945_s22  ;;  %s3943_s15 = smul.u32 432, %s5971_s10 }
  0x13   : > { %3896 = vmatpush.msra.mxu3 %v565_v5  ;;  %1903 = vmatpush.msra.mxu1 %v1896_v8  ;;  %v1888_v24 = vld [vmem:[%s5960_s0 + $0x260] sm:$0xff]  ;;  %v555_v25 = vld [vmem:[%s5960_s0 + $0x10] sm:$0xff]  ;;  %v1887_v26 = vld [vmem:[%s5960_s0 + $0x258] sm:$0xff]  ;;  %s4842_s11 = scalar_lea.vmem %s5968_s8, %s3944_s26  ;;  %s3940_s22 = smul.u32 400, %s5971_s10 }
  0x14   : > { %589 = vmatpush.msra.mxu0 %v564_v7  ;;  %3897 = vmatpush.msra.mxu2 %v564_v7  ;;  %v554_v27 = vld [vmem:[%s5960_s0 + $0x8] sm:$0xff]  ;;  %v1886_v28 = vld [vmem:[%s5960_s0 + $0x250] sm:$0xff]  ;;  %v553_v29 = vld [vmem:[%s5960_s0] sm:$0xff]  ;;  %s4922_s19 = scalar_lea.vmem %s5967_s7, %s3943_s15 }
  0x15   : > { %3898 = vmatpush.msra.mxu3 %v564_v7  ;;  %1904 = vmatpush.msra.mxu1 %v1895_v10  ;;  %v473_v30 = vld [vmem:[%s4114_s13] sm:$0xff]  ;;  %v519_v31 = vld [vmem:[%s4114_s13 + $0x170] sm:$0xff]  ;;  %v959_v33 = vld [vmem:[%s5960_s0 + $0x178] sm:$0xff]  ;;  %s5011_s24 = scalar_lea.vmem %s5964_s4, %s3940_s22 }
  0x16   : > { %590 = vmatpush.msra.mxu0 %v563_v9  ;;  %3899 = vmatpush.msra.mxu2 %v563_v9  ;;  %v543_v32 = vld [vmem:[%s4114_s13 + $0x230] sm:$0xff]  ;;  %v584_v34 = vld [vmem:[%s5960_s0 + $0xf8] sm:$0xff]  ;;  %v1885_v35 = vld [vmem:[%s5960_s0 + $0x248] sm:$0xff] }
  0x17   : > { %3900 = vmatpush.msra.mxu3 %v563_v9  ;;  %1905 = vmatpush.msra.mxu1 %v1894_v12  ;;  %v958_v36 = vld [vmem:[%s5960_s0 + $0x170] sm:$0xff]  ;;  %v1884_v38 = vld [vmem:[%s5960_s0 + $0x240] sm:$0xff]  ;;  %v957_v39 = vld [vmem:[%s5960_s0 + $0x168] sm:$0xff] }
  0x18   : > { %591 = vmatpush.msra.mxu0 %v562_v11  ;;  %3901 = vmatpush.msra.mxu2 %v562_v11  ;;  %v583_v37 = vld [vmem:[%s5960_s0 + $0xf0] sm:$0xff]  ;;  %v1836_v40 = vld [vmem:[%s4138_s27] sm:$0xff]  ;;  %v582_v41 = vld [vmem:[%s5960_s0 + $0xe8] sm:$0xff] }
  0x19   : > { %3902 = vmatpush.msra.mxu3 %v562_v11  ;;  %1906 = vmatpush.msra.mxu1 %v1893_v14  ;;  %v3078_v42 = vld [vmem:[%s5960_s0 + $0x358] sm:$0xff]  ;;  %v475_v43 = vld [vmem:[%s4114_s13 + $0x10] sm:$0xff]  ;;  %v956_v44 = vld [vmem:[%s5960_s0 + $0x160] sm:$0xff] }
  0x1a   : > { %592 = vmatpush.msra.mxu0 %v561_v13  ;;  %3903 = vmatpush.msra.mxu2 %v561_v13  ;;  %v521_v45 = vld [vmem:[%s4114_s13 + $0x180] sm:$0xff]  ;;  %v955_v48 = vld [vmem:[%s5960_s0 + $0x158] sm:$0xff]  ;;  %v954_v50 = vld [vmem:[%s5960_s0 + $0x150] sm:$0xff] }
  0x1b   : > { %3904 = vmatpush.msra.mxu3 %v561_v13  ;;  %1907 = vmatpush.msra.mxu1 %v1892_v16  ;;  %v545_v46 = vld [vmem:[%s4114_s13 + $0x240] sm:$0xff]  ;;  %v580_v49 = vld [vmem:[%s5960_s0 + $0xd8] sm:$0xff]  ;;  %v579_v51 = vld [vmem:[%s5960_s0 + $0xd0] sm:$0xff] }
  0x1c   : > { %593 = vmatpush.msra.mxu0 %v560_v15  ;;  %3905 = vmatpush.msra.mxu2 %v560_v15  ;;  %v581_v47 = vld [vmem:[%s5960_s0 + $0xe0] sm:$0xff]  ;;  %v1837_v52 = vld [vmem:[%s4138_s27 + $0x8] sm:$0xff]  ;;  %v523_v56 = vld [vmem:[%s4114_s13 + $0x190] sm:$0xff] }
  0x1d   : > { %3906 = vmatpush.msra.mxu3 %v560_v15  ;;  %1908 = vmatpush.msra.mxu1 %v1891_v18  ;;  %v953_v53 = vld [vmem:[%s5960_s0 + $0x148] sm:$0xff]  ;;  %v477_v54 = vld [vmem:[%s4114_s13 + $0x20] sm:$0xff]  ;;  %v547_v57 = vld [vmem:[%s4114_s13 + $0x250] sm:$0xff] }
  0x1e   : > { %594 = vmatpush.msra.mxu0 %v559_v17  ;;  %3907 = vmatpush.msra.mxu2 %v559_v17  ;;  %v578_v55 = vld [vmem:[%s5960_s0 + $0xc8] sm:$0xff]  ;;  %v577_v58 = vld [vmem:[%s5960_s0 + $0xc0] sm:$0xff]  ;;  %v576_v60 = vld [vmem:[%s5960_s0 + $0xb8] sm:$0xff] }
  0x1f   : > { %3908 = vmatpush.msra.mxu3 %v559_v17  ;;  %1909 = vmatpush.msra.mxu1 %v1890_v20  ;;  %v952_v59 = vld [vmem:[%s5960_s0 + $0x140] sm:$0xff]  ;;  %v951_v61 = vld [vmem:[%s5960_s0 + $0x138] sm:$0xff]  ;;  %v575_v62 = vld [vmem:[%s5960_s0 + $0xb0] sm:$0xff] }
  0x20   : > { %595 = vmatpush.msra.mxu0 %v558_v19  ;;  %3909 = vmatpush.msra.mxu2 %v558_v19  ;;  %v1838_v63 = vld [vmem:[%s4138_s27 + $0x10] sm:$0xff]  ;;  %v574_v2 = vld [vmem:[%s5960_s0 + $0xa8] sm:$0xff]  ;;  %v525_v3 = vld [vmem:[%s4114_s13 + $0x1a0] sm:$0xff] }
  0x21   : > { %3910 = vmatpush.msra.mxu3 %v558_v19  ;;  %1910 = vmatpush.msra.mxu1 %v1889_v22  ;;  %v950_v0 = vld [vmem:[%s5960_s0 + $0x130] sm:$0xff]  ;;  %v549_v4 = vld [vmem:[%s4114_s13 + $0x260] sm:$0xff]  ;;  %v572_v6 = vld [vmem:[%s5960_s0 + $0x98] sm:$0xff] }
  0x22   : > { %596 = vmatpush.msra.mxu0 %v557_v21  ;;  %3911 = vmatpush.msra.mxu2 %v557_v21  ;;  %v479_v1 = vld [vmem:[%s4114_s13 + $0x30] sm:$0xff]  ;;  %v573_v5 = vld [vmem:[%s5960_s0 + $0xa0] sm:$0xff]  ;;  %v949_v7 = vld [vmem:[%s5960_s0 + $0x128] sm:$0xff] }
  0x23   : > { %3912 = vmatpush.msra.mxu3 %v557_v21  ;;  %1911 = vmatpush.msra.mxu1 %v1888_v24  ;;  %v571_v8 = vld [vmem:[%s5960_s0 + $0x90] sm:$0xff]  ;;  %v1839_v9 = vld [vmem:[%s4138_s27 + $0x18] sm:$0xff]  ;;  %v481_v10 = vld [vmem:[%s4114_s13 + $0x40] sm:$0xff] }
  0x24   : > { %597 = vmatpush.msra.mxu0 %v556_v23  ;;  %3913 = vmatpush.msra.mxu2 %v556_v23  ;;  %v570_v11 = vld [vmem:[%s5960_s0 + $0x88] sm:$0xff]  ;;  %v527_v12 = vld [vmem:[%s4114_s13 + $0x1b0] sm:$0xff]  ;;  %v569_v14 = vld [vmem:[%s5960_s0 + $0x80] sm:$0xff] }
  0x25   : > { %3914 = vmatpush.msra.mxu3 %v556_v23  ;;  %1912 = vmatpush.msra.mxu1 %v1887_v26  ;;  %v551_v13 = vld [vmem:[%s4114_s13 + $0x270] sm:$0xff]  ;;  %v1213_v15 = vld [vmem:[%s5960_s0 + $0x1f8] sm:$0xff]  ;;  %v948_v16 = vld [vmem:[%s5960_s0 + $0x120] sm:$0xff] }
  0x26   : > { %598 = vmatpush.msra.mxu0 %v555_v25  ;;  %3915 = vmatpush.msra.mxu2 %v555_v25  ;;  %v1212_v17 = vld [vmem:[%s5960_s0 + $0x1f0] sm:$0xff]  ;;  %v1840_v18 = vld [vmem:[%s4138_s27 + $0x20] sm:$0xff]  ;;  %v1211_v19 = vld [vmem:[%s5960_s0 + $0x1e8] sm:$0xff] }
  0x27   : > { %3916 = vmatpush.msra.mxu3 %v555_v25  ;;  %1913 = vmatpush.msra.mxu1 %v1886_v28  ;;  %v483_v20 = vld [vmem:[%s4114_s13 + $0x50] sm:$0xff]  ;;  %v529_v21 = vld [vmem:[%s4114_s13 + $0x1c0] sm:$0xff]  ;;  %v546_v22 = vld [vmem:[%s4114_s13 + $0x248] sm:$0xff] }
  0x28   : > { %599 = vmatpush.msra.mxu0 %v554_v27  ;;  %3917 = vmatpush.msra.mxu2 %v554_v27  ;;  %v1210_v23 = vld [vmem:[%s5960_s0 + $0x1e0] sm:$0xff]  ;;  %v1209_v24 = vld [vmem:[%s5960_s0 + $0x1d8] sm:$0xff]  ;;  %v946_v26 = vld [vmem:[%s5960_s0 + $0x110] sm:$0xff] }
  0x29   : > { %3918 = vmatpush.msra.mxu3 %v554_v27  ;;  %1914 = vmatpush.msra.mxu1 %v1885_v35  ;;  %v947_v25 = vld [vmem:[%s5960_s0 + $0x118] sm:$0xff]  ;;  %v1841_v27 = vld [vmem:[%s4138_s27 + $0x28] sm:$0xff]  ;;  %v1208_v28 = vld [vmem:[%s5960_s0 + $0x1d0] sm:$0xff] }
  0x2a   : > { %600 = vmatpush.msra.mxu0 %v553_v29  ;;  %3919 = vmatpush.msra.mxu2 %v553_v29  ;;  %v945_v35 = vld [vmem:[%s5960_s0 + $0x108] sm:$0xff] }
  0x2b   : > { %3920 = vmatpush.msra.mxu3 %v553_v29  ;;  %601 = vmatmul.f32.vlgmr.msra.gmra.mxu0 %v473_v30  ;;  %v485_v29 = vld [vmem:[%s4114_s13 + $0x60] sm:$0xff]  ;;  %v1207_v30 = vld [vmem:[%s5960_s0 + $0x1c8] sm:$0xff] }
  0x2c   : > { %670 = vmatmul.f32.vlgmr.msra.gmra.mxu2 %v519_v31  ;;  %706 = vmatmul.f32.vlgmr.msra.gmra.mxu3 %v543_v32  ;;  %v531_v31 = vld [vmem:[%s4114_s13 + $0x1d0] sm:$0xff]  ;;  %v548_v32 = vld [vmem:[%s4114_s13 + $0x258] sm:$0xff] }
  0x2d   : > { %960 = vmatpush.msrb.mxu2 %v959_v33  ;;  %722 = vmatpush.msrb.mxu0 %v584_v34  ;;  %v1206_v33 = vld [vmem:[%s5960_s0 + $0x1c0] sm:$0xff] }
  0x2e   : > { %3921 = vmatpush.msrb.mxu3 %v584_v34  ;;  %1915 = vmatpush.msra.mxu1 %v1884_v38  ;;  %v1205_v34 = vld [vmem:[%s5960_s0 + $0x1b8] sm:$0xff]  ;;  %v487_v38 = vld [vmem:[%s4114_s13 + $0x70] sm:$0xff] }
  0x2f   : > { %961 = vmatpush.msrb.mxu2 %v958_v36  ;;  %723 = vmatpush.msrb.mxu0 %v583_v37  ;;  %v1842_v36 = vld [vmem:[%s4138_s27 + $0x30] sm:$0xff] }
  0x30   : > { %3922 = vmatpush.msrb.mxu3 %v583_v37  ;;  %1916 = vmatmul.f32.vlgmr.msra.gmra.mxu1 %v1836_v40  ;;  %v1204_v37 = vld [vmem:[%s5960_s0 + $0x1b0] sm:$0xff]  ;;  %v533_v40 = vld [vmem:[%s4114_s13 + $0x1e0] sm:$0xff] }
  0x31   : > { %962 = vmatpush.msrb.mxu2 %v957_v39  ;;  %3272 = vmatpush.msrb.mxu1 %v3078_v42  ;;  %v1203_v39 = vld [vmem:[%s5960_s0 + $0x1a8] sm:$0xff]  ;;  %v1202_v42 = vld [vmem:[%s5960_s0 + $0x1a0] sm:$0xff] }
  0x32   : > { %3923 = vmatpush.msrb.mxu3 %v582_v41  ;;  %724 = vmatpush.msrb.mxu0 %v582_v41  ;;  %v550_v41 = vld [vmem:[%s4114_s13 + $0x268] sm:$0xff] }
  0x33   : > { %604 = vmatmul.f32.gmra.mxu0 %v475_v43  ;;  %963 = vmatpush.msrb.mxu2 %v956_v44  ;;  %v1201_v43 = vld [vmem:[%s5960_s0 + $0x198] sm:$0xff]  ;;  %v944_v44 = vld [vmem:[%s5960_s0 + $0x100] sm:$0xff] }
  0x34   : > { %673 = vmatmul.f32.gmra.mxu2 %v521_v45  ;;  %709 = vmatmul.f32.gmra.mxu3 %v545_v46  ;;  %v1843_v45 = vld [vmem:[%s4138_s27 + $0x38] sm:$0xff]  ;;  %v1200_v46 = vld [vmem:[%s5960_s0 + $0x190] sm:$0xff] }
  0x35   : > { %3924 = vmatpush.msrb.mxu3 %v581_v47  ;;  %964 = vmatpush.msrb.mxu2 %v955_v48  ;;  %v1199_v48 = vld [vmem:[%s5960_s0 + $0x188] sm:$0xff] }
  0x36   : > { %725 = vmatpush.msrb.mxu0 %v581_v47  ;;  %v489_v47 = vld [vmem:[%s4114_s13 + $0x80] sm:$0xff] }
  0x37   : > { %3925 = vmatpush.msrb.mxu3 %v580_v49  ;;  %965 = vmatpush.msrb.mxu2 %v954_v50  ;;  %v552_v50 = vld [vmem:[%s4114_s13 + $0x278] sm:$0xff] }
  0x38   : > { %1919 = vmatmul.f32.gmra.mxu1 %v1837_v52  ;;  %726 = vmatpush.msrb.mxu0 %v580_v49  ;;  %v535_v49 = vld [vmem:[%s4114_s13 + $0x1f0] sm:$0xff]  ;;  %v2619_v52 = vld [vmem:[%s5960_s0 + $0x338] sm:$0xff] }
  0x39   : > { %3926 = vmatpush.msrb.mxu3 %v579_v51  ;;  %966 = vmatpush.msrb.mxu2 %v953_v53  ;;  %v2169_v53 = vld [vmem:[%s5960_s0 + $0x2f8] sm:$0xff] }
  0x3a   : > { %727 = vmatpush.msrb.mxu0 %v579_v51  ;;  %v1198_v51 = vld [vmem:[%s5960_s0 + $0x180] sm:$0xff] }
  0x3b   : > { %607 = vmatmul.f32.gmra.mxu0 %v477_v54  ;;  %3927 = vmatpush.msrb.mxu3 %v578_v55  ;;  %v1844_v54 = vld [vmem:[%s4138_s27 + $0x40] sm:$0xff] }
  0x3c   : > { %676 = vmatmul.f32.gmra.mxu2 %v523_v56  ;;  %712 = vmatmul.f32.gmra.mxu3 %v547_v57  ;;  %v537_v56 = vld [vmem:[%s4114_s13 + $0x200] sm:$0xff] }
  0x3d   : > { %3928 = vmatpush.msrb.mxu3 %v577_v58  ;;  %967 = vmatpush.msrb.mxu2 %v952_v59  ;;  %v1153_v57 = vld [vmem:[%s4327_s29] sm:$0xff]  ;;  %v1845_v59 = vld [vmem:[%s4138_s27 + $0x48] sm:$0xff] }
  0x3e   : > { %728 = vmatpush.msrb.mxu0 %v578_v55  ;;  %v491_v55 = vld [vmem:[%s4114_s13 + $0x90] sm:$0xff] }
  0x3f   : > { %3929 = vmatpush.msrb.mxu3 %v576_v60  ;;  %968 = vmatpush.msrb.mxu2 %v951_v61  ;;  %v539_v61 = vld [vmem:[%s4114_s13 + $0x210] sm:$0xff] }
  0x40   : > { %1922 = vmatmul.f32.gmra.mxu1 %v1838_v63  ;;  %729 = vmatpush.msrb.mxu0 %v577_v58  ;;  %v3077_v58 = vld [vmem:[%s5960_s0 + $0x350] sm:$0xff] }
  0x41   : > { %3930 = vmatpush.msrb.mxu3 %v575_v62  ;;  %969 = vmatpush.msrb.mxu2 %v950_v0  ;;  %v1846_v63 = vld [vmem:[%s4138_s27 + $0x50] sm:$0xff] }
  0x42   : > { %730 = vmatpush.msrb.mxu0 %v576_v60  ;;  %3273 = vmatpush.msrb.mxu1 %v3077_v58  ;;  %v493_v60 = vld [vmem:[%s4114_s13 + $0xa0] sm:$0xff]  ;;  %v495_v0 = vld [vmem:[%s4114_s13 + $0xb0] sm:$0xff] }
  0x43   : > { %610 = vmatmul.f32.gmra.mxu0 %v479_v1  ;;  %3931 = vmatpush.msrb.mxu3 %v574_v2  ;;  %v541_v1 = vld [vmem:[%s4114_s13 + $0x220] sm:$0xff] }
  0x44   : > { %679 = vmatmul.f32.gmra.mxu2 %v525_v3  ;;  %715 = vmatmul.f32.gmra.mxu3 %v549_v4  ;;  %v1847_v3 = vld [vmem:[%s4138_s27 + $0x58] sm:$0xff]  ;;  %v497_v4 = vld [vmem:[%s4114_s13 + $0xc0] sm:$0xff] }
  0x45   : > { %3932 = vmatpush.msrb.mxu3 %v573_v5  ;;  %970 = vmatpush.msrb.mxu2 %v949_v7  ;;  %v1156_v7 = vld [vmem:[%s4327_s29 + $0x18] sm:$0xff]  ;;  %v908_v58 = vld [vmem:[%s4347_s17 + $0x40] sm:$0xff] }
  0x46   : > { %731 = vmatpush.msrb.mxu0 %v575_v62  ;;  %v1154_v62 = vld [vmem:[%s4327_s29 + $0x8] sm:$0xff] }
  0x47   : > { %3933 = vmatpush.msrb.mxu3 %v572_v6  ;;  %971 = vmatpush.msrb.mxu2 %v948_v16  ;;  %v1158_v16 = vld [vmem:[%s4327_s29 + $0x28] sm:$0xff] }
  0x48   : > { %1925 = vmatmul.f32.gmra.mxu1 %v1839_v9  ;;  %732 = vmatpush.msrb.mxu0 %v574_v2  ;;  %v1155_v2 = vld [vmem:[%s4327_s29 + $0x10] sm:$0xff] }
  0x49   : > { %3934 = vmatpush.msrb.mxu3 %v571_v8  ;;  %972 = vmatpush.msrb.mxu2 %v947_v25  ;;  %v499_v9 = vld [vmem:[%s4114_s13 + $0xd0] sm:$0xff]  ;;  %v1160_v25 = vld [vmem:[%s4327_s29 + $0x38] sm:$0xff] }
  0x4a   : > { %733 = vmatpush.msrb.mxu0 %v573_v5  ;;  %v2618_v5 = vld [vmem:[%s5960_s0 + $0x330] sm:$0xff] }
  0x4b   : > { %613 = vmatmul.f32.gmra.mxu0 %v481_v10  ;;  %3935 = vmatpush.msrb.mxu3 %v570_v11  ;;  %v901_v10 = vld [vmem:[%s4347_s17 + $0x8] sm:$0xff] }
  0x4c   : > { %682 = vmatmul.f32.gmra.mxu2 %v527_v12  ;;  %718 = vmatmul.f32.gmra.mxu3 %v551_v13  ;;  %v1849_v12 = vld [vmem:[%s4138_s27 + $0x68] sm:$0xff]  ;;  %v2168_v13 = vld [vmem:[%s5960_s0 + $0x2f0] sm:$0xff] }
  0x4d   : > { %3936 = vmatpush.msrb.mxu3 %v569_v14  ;;  %734 = vmatpush.msrb.mxu0 %v572_v6  ;;  %v900_v6 = vld [vmem:[%s4347_s17] sm:$0xff] }
  0x4e   : > { %973 = vmatpush.msrb.mxu2 %v946_v26 }
  0x4f   : > { %1214 = vmatpush.msra.mxu3 %v1213_v15  ;;  %735 = vmatpush.msrb.mxu0 %v571_v8  ;;  %v1848_v8 = vld [vmem:[%s4138_s27 + $0x60] sm:$0xff]  ;;  %v902_v15 = vld [vmem:[%s4347_s17 + $0x10] sm:$0xff] }
  0x50   : > { %1928 = vmatmul.f32.gmra.mxu1 %v1840_v18  ;;  %974 = vmatpush.msrb.mxu2 %v945_v35  ;;  %v503_v18 = vld [vmem:[%s4114_s13 + $0xf0] sm:$0xff] }
  0x51   : > { %1215 = vmatpush.msra.mxu3 %v1212_v17  ;;  %736 = vmatpush.msrb.mxu0 %v570_v11  ;;  %v1157_v11 = vld [vmem:[%s4327_s29 + $0x20] sm:$0xff]  ;;  %v1850_v17 = vld [vmem:[%s4138_s27 + $0x70] sm:$0xff] }
  0x52   : > { %975 = vmatpush.msrb.mxu2 %v944_v44  ;;  %v1854_v44 = vld [vmem:[%s4138_s27 + $0x90] sm:$0xff] }
  0x53   : > { %1216 = vmatpush.msra.mxu3 %v1211_v19  ;;  %616 = vmatmul.f32.gmra.mxu0 %v483_v20  ;;  %v903_v19 = vld [vmem:[%s4347_s17 + $0x18] sm:$0xff]  ;;  %v1159_v20 = vld [vmem:[%s4327_s29 + $0x30] sm:$0xff] }
  0x54   : > { %685 = vmatmul.f32.gmra.mxu2 %v529_v21  ;;  %846 = vmatmul.f32.vlgmr.msrb.gmra.mxu3 %v546_v22  ;;  %v1851_v21 = vld [vmem:[%s4138_s27 + $0x78] sm:$0xff] }
  0x55   : > { %1217 = vmatpush.msra.mxu3 %v1210_v23  ;;  %737 = vmatpush.msrb.mxu0 %v569_v14  ;;  %v501_v14 = vld [vmem:[%s4114_s13 + $0xe0] sm:$0xff] }
  0x56   : > { %2337 = vmatpush.msra.mxu2 %v2169_v53  ;;  %v505_v23 = vld [vmem:[%s4114_s13 + $0x100] sm:$0xff]  ;;  %v1855_v53 = vld [vmem:[%s4138_s27 + $0x98] sm:$0xff] }
  0x57   : > { %1218 = vmatpush.msra.mxu3 %v1209_v24  ;;  %v904_v24 = vld [vmem:[%s4347_s17 + $0x20] sm:$0xff] }
  0x58   : > { %1931 = vmatmul.f32.gmra.mxu1 %v1841_v27  ;;  %2338 = vmatpush.msra.mxu2 %v2168_v13  ;;  %v1852_v27 = vld [vmem:[%s4138_s27 + $0x80] sm:$0xff]  ;;  %v910_v13 = vld [vmem:[%s4347_s17 + $0x50] sm:$0xff] }
  0x59   : > { %1219 = vmatpush.msra.mxu3 %v1208_v28 }
  0x5b   : > { %619 = vmatmul.f32.gmra.mxu0 %v485_v29  ;;  %1220 = vmatpush.msra.mxu3 %v1207_v30 }
  0x5c   : > { %688 = vmatmul.f32.gmra.mxu2 %v531_v31  ;;  %849 = vmatmul.f32.gmra.mxu3 %v548_v32  ;;  %v507_v31 = vld [vmem:[%s4114_s13 + $0x110] sm:$0xff]  ;;  %v905_v32 = vld [vmem:[%s4347_s17 + $0x28] sm:$0xff] }
  0x5d   : > { %1221 = vmatpush.msra.mxu3 %v1206_v33  ;;  %v1161_v33 = vld [vmem:[%s4327_s29 + $0x40] sm:$0xff] }
  0x5f   : > { %1222 = vmatpush.msra.mxu3 %v1205_v34  ;;  %v2617_v34 = vld [vmem:[%s5960_s0 + $0x328] sm:$0xff] }
  0x60   : > { %1934 = vmatmul.f32.gmra.mxu1 %v1842_v36  ;;  %v1853_v36 = vld [vmem:[%s4138_s27 + $0x88] sm:$0xff] }
  0x61   : > { %1223 = vmatpush.msra.mxu3 %v1204_v37 }
  0x63   : > { %622 = vmatmul.f32.gmra.mxu0 %v487_v38  ;;  %1224 = vmatpush.msra.mxu3 %v1203_v39 }
  0x64   : > { %691 = vmatmul.f32.gmra.mxu2 %v533_v40  ;;  %852 = vmatmul.f32.gmra.mxu3 %v550_v41  ;;  %v509_v40 = vld [vmem:[%s4114_s13 + $0x120] sm:$0xff]  ;;  %v906_v41 = vld [vmem:[%s4347_s17 + $0x30] sm:$0xff] }
  0x65   : > { %1225 = vmatpush.msra.mxu3 %v1202_v42  ;;  %v1162_v42 = vld [vmem:[%s4327_s29 + $0x48] sm:$0xff] }
  0x67   : > { %1226 = vmatpush.msra.mxu3 %v1201_v43 }
  0x68   : > { %1937 = vmatmul.f32.gmra.mxu1 %v1843_v45 }
  0x69   : > { %1227 = vmatpush.msra.mxu3 %v1200_v46 }
  0x6b   : > { %625 = vmatmul.f32.gmra.mxu0 %v489_v47  ;;  %1228 = vmatpush.msra.mxu3 %v1199_v48  ;;  %v511_v48 = vld [vmem:[%s4114_s13 + $0x130] sm:$0xff] }
  0x6c   : > { %694 = vmatmul.f32.gmra.mxu2 %v535_v49  ;;  %855 = vmatmul.f32.gmra.mxu3 %v552_v50  ;;  %v907_v49 = vld [vmem:[%s4347_s17 + $0x38] sm:$0xff]  ;;  %v1163_v50 = vld [vmem:[%s4327_s29 + $0x50] sm:$0xff] }
  0x6d   : > { %1229 = vmatpush.msra.mxu3 %v1198_v51  ;;  %v2167_v51 = vld [vmem:[%s5960_s0 + $0x2e8] sm:$0xff] }
  0x6e   : > { %2339 = vmatpush.msra.mxu2 %v2167_v51  ;;  %v913_v51 = vld [vmem:[%s4347_s17 + $0x68] sm:$0xff] }
  0x6f   : > { %2790 = vmatpush.msrb.mxu3 %v2619_v52 }
  0x70   : > { %1940 = vmatmul.f32.gmra.mxu1 %v1844_v54 }
  0x71   : > { %2791 = vmatpush.msrb.mxu3 %v2618_v5 }
  0x73   : > { %628 = vmatmul.f32.gmra.mxu0 %v491_v55  ;;  %2792 = vmatpush.msrb.mxu3 %v2617_v34 }
  0x74   : > { %697 = vmatmul.f32.gmra.mxu2 %v537_v56  ;;  %1230 = vmatmul.f32.vlgmr.msra.gmra.mxu3 %v1153_v57  ;;  %v513_v57 = vld [vmem:[%s4114_s13 + $0x140] sm:$0xff] }
  0x78   : > { %1943 = vmatmul.f32.gmra.mxu1 %v1845_v59  ;;  %v1164_v59 = vld [vmem:[%s4327_s29 + $0x58] sm:$0xff] }
  0x7b   : > { %631 = vmatmul.f32.gmra.mxu0 %v493_v60  ;;  %v1468_v60 = vld [vmem:[%s5960_s0 + $0x238] sm:$0xff] }
  0x7c   : > { %700 = vmatmul.f32.gmra.mxu2 %v539_v61  ;;  %1233 = vmatmul.f32.gmra.mxu3 %v1154_v62  ;;  %v1856_v62 = vld [vmem:[%s4138_s27 + $0xa0] sm:$0xff] }
  0x7d   : > { %1627 = vmatpush.msra.mxu0 %v1468_v60  ;;  %v480_v60 = vld [vmem:[%s4114_s13 + $0x38] sm:$0xff] }
  0x80   : > { %1946 = vmatmul.f32.gmra.mxu1 %v1846_v63 }
  0x83   : > { %634 = vmatmul.f32.gmra.mxu0 %v495_v0 }
  0x84   : > { %703 = vmatmul.f32.gmra.mxu2 %v541_v1  ;;  %1236 = vmatmul.f32.gmra.mxu3 %v1155_v2  ;;  %v515_v2 = vld [vmem:[%s4114_s13 + $0x150] sm:$0xff] }
  0x88   : > { %1949 = vmatmul.f32.gmra.mxu1 %v1847_v3  ;;  %v909_v3 = vld [vmem:[%s4347_s17 + $0x48] sm:$0xff] }
  0x8b   : > { %637 = vmatmul.f32.gmra.mxu0 %v497_v4  ;;  %v1165_v4 = vld [vmem:[%s4327_s29 + $0x60] sm:$0xff] }
  0x8c   : > { %976 = vmatmul.f32.vlgmr.msrb.gmra.mxu2 %v900_v6  ;;  %1239 = vmatmul.f32.gmra.mxu3 %v1156_v7  ;;  %v1857_v6 = vld [vmem:[%s4138_s27 + $0xa8] sm:$0xff] }
  0x90   : > { %1952 = vmatmul.f32.gmra.mxu1 %v1848_v8 }
  0x93   : > { %640 = vmatmul.f32.gmra.mxu0 %v499_v9 }
  0x94   : > { %979 = vmatmul.f32.gmra.mxu2 %v901_v10  ;;  %1242 = vmatmul.f32.gmra.mxu3 %v1157_v11  ;;  %v517_v11 = vld [vmem:[%s4114_s13 + $0x160] sm:$0xff] }
  0x98   : > { %1955 = vmatmul.f32.gmra.mxu1 %v1849_v12  ;;  %v3076_v12 = vld [vmem:[%s5960_s0 + $0x348] sm:$0xff] }
  0x99   : > { %3274 = vmatpush.msrb.mxu1 %v3076_v12  ;;  %v1863_v12 = vld [vmem:[%s4138_s27 + $0xd8] sm:$0xff] }
  0x9b   : > { %643 = vmatmul.f32.gmra.mxu0 %v501_v14  ;;  %v1166_v14 = vld [vmem:[%s4327_s29 + $0x68] sm:$0xff] }
  0x9c   : > { %982 = vmatmul.f32.gmra.mxu2 %v902_v15  ;;  %1245 = vmatmul.f32.gmra.mxu3 %v1158_v16  ;;  %v1858_v16 = vld [vmem:[%s4138_s27 + $0xb0] sm:$0xff] }
  0xa0   : > { %1958 = vmatmul.f32.gmra.mxu1 %v1850_v17 }
  0xa3   : > { %646 = vmatmul.f32.gmra.mxu0 %v503_v18 }
  0xa4   : > { %985 = vmatmul.f32.gmra.mxu2 %v903_v19  ;;  %1248 = vmatmul.f32.gmra.mxu3 %v1159_v20 }
  0xa8   : > { %v4372_v22 = vpop.f32.mrf.mxu0  ;;  %1961 = vmatmul.f32.gmra.mxu1 %v1851_v21  ;;  %v474_v21 = vld [vmem:[%s4114_s13 + $0x8] sm:$0xff] }
  0xab   : > { %649 = vmatmul.f32.gmra.mxu0 %v505_v23  ;;  %v2616_v23 = vld [vmem:[%s5960_s0 + $0x320] sm:$0xff] }
  0xac   : > { %988 = vmatmul.f32.gmra.mxu2 %v904_v24  ;;  %1251 = vmatmul.f32.gmra.mxu3 %v1160_v25  ;;  %v911_v24 = vld [vmem:[%s4347_s17 + $0x58] sm:$0xff]  ;;  %v1167_v25 = vld [vmem:[%s4327_s29 + $0x70] sm:$0xff] }
  0xad   : > { %v1917_v26 = vpop.f32.mrf.mxu1  ;;  %2793 = vmatpush.msrb.mxu3 %v2616_v23  ;;  %v1864_v23 = vld [vmem:[%s4138_s27 + $0xe0] sm:$0xff] }
  0xae   : > { %2061 = vst.msk [vmem:[%s4381_s25 + $0x598] sm:$0xff] %vm859_vm0, %v1917_v26 }
  0xaf   : > { %v4384_v28 = vpop.f32.mrf.mxu2  ;;  %v4386_v29 = vpop.f32.mrf.mxu3 }
  0xb0   : > { %v4390_v30 = vpop.f32.mrf.mxu0  ;;  %1964 = vmatmul.f32.gmra.mxu1 %v1852_v27  ;;  %v1859_v27 = vld [vmem:[%s4138_s27 + $0xb8] sm:$0xff] }
  0xb3   : > { %652 = vmatmul.f32.gmra.mxu0 %v507_v31 }
  0xb4   : > { %991 = vmatmul.f32.gmra.mxu2 %v905_v32  ;;  %1254 = vmatmul.f32.gmra.mxu3 %v1161_v33 }
  0xb5   : > { %v1920_v35 = vpop.f32.mrf.mxu1 }
  0xb6   : > { %2062 = vst.msk [vmem:[%s4381_s25 + $0x5a0] sm:$0xff] %vm859_vm0, %v1920_v35  ;;  %v476_v35 = vld [vmem:[%s4114_s13 + $0x18] sm:$0xff] }
  0xb7   : > { %v4399_v37 = vpop.f32.mrf.mxu2  ;;  %v710_v38 = vpop.f32.mrf.mxu3 }
  0xb8   : > { %v4403_v39 = vpop.f32.mrf.mxu0  ;;  %1967 = vmatmul.f32.gmra.mxu1 %v1853_v36  ;;  %v912_v36 = vld [vmem:[%s4347_s17 + $0x60] sm:$0xff] }
  0xbb   : > { %655 = vmatmul.f32.gmra.mxu0 %v509_v40  ;;  %v1467_v40 = vld [vmem:[%s5960_s0 + $0x230] sm:$0xff] }
  0xbc   : > { %994 = vmatmul.f32.gmra.mxu2 %v906_v41  ;;  %1257 = vmatmul.f32.gmra.mxu3 %v1162_v42  ;;  %v1860_v42 = vld [vmem:[%s4138_s27 + $0xc0] sm:$0xff] }
  0xbd   : > { %v1923_v43 = vpop.f32.mrf.mxu1  ;;  %1628 = vmatpush.msra.mxu0 %v1467_v40  ;;  %v1865_v40 = vld [vmem:[%s4138_s27 + $0xe8] sm:$0xff] }
  0xbe   : > { %2063 = vst.msk [vmem:[%s4381_s25 + $0x5a8] sm:$0xff] %vm859_vm0, %v1923_v43 }
  0xbf   : > { %v4409_v45 = vpop.f32.mrf.mxu2  ;;  %v713_v46 = vpop.f32.mrf.mxu3 }
  0xc0   : > { %v4413_v47 = vpop.f32.mrf.mxu0  ;;  %1970 = vmatmul.f32.gmra.mxu1 %v1854_v44 }
  0xc3   : > { %658 = vmatmul.f32.gmra.mxu0 %v511_v48 }
  0xc4   : > { %997 = vmatmul.f32.gmra.mxu2 %v907_v49  ;;  %1260 = vmatmul.f32.gmra.mxu3 %v1163_v50  ;;  %v478_v49 = vld [vmem:[%s4114_s13 + $0x28] sm:$0xff]  ;;  %v2166_v50 = vld [vmem:[%s5960_s0 + $0x2e0] sm:$0xff] }
  0xc5   : > { %v1926_v52 = vpop.f32.mrf.mxu1  ;;  %2340 = vmatpush.msra.mxu2 %v2166_v50  ;;  %v1174_v50 = vld [vmem:[%s4327_s29 + $0xa8] sm:$0xff] }
  0xc6   : > { %2064 = vst.msk [vmem:[%s4381_s25 + $0x5b0] sm:$0xff] %vm859_vm0, %v1926_v52  ;;  %v1169_v52 = vld [vmem:[%s4327_s29 + $0x80] sm:$0xff] }
  0xc7   : > { %v4422_v54 = vpop.f32.mrf.mxu2  ;;  %v4424_v55 = vpop.f32.mrf.mxu3 }
  0xc8   : > { %v4428_v56 = vpop.f32.mrf.mxu0  ;;  %1973 = vmatmul.f32.gmra.mxu1 %v1855_v53 }
  0xcb   : > { %661 = vmatmul.f32.gmra.mxu0 %v513_v57 }
  0xcc   : > { %1000 = vmatmul.f32.gmra.mxu2 %v908_v58  ;;  %1263 = vmatmul.f32.gmra.mxu3 %v1164_v59 }
  0xcd   : > { %v1929_v61 = vpop.f32.mrf.mxu1 }
  0xce   : > { %2065 = vst.msk [vmem:[%s4381_s25 + $0x5b8] sm:$0xff] %vm859_vm0, %v1929_v61  ;;  %v914_v61 = vld [vmem:[%s4347_s17 + $0x70] sm:$0xff] }
  0xcf   : > { %v4437_v63 = vpop.f32.mrf.mxu2  ;;  %v4439_v0 = vpop.f32.mrf.mxu3 }
  0xd0   : > { %v4443_v1 = vpop.f32.mrf.mxu0  ;;  %1976 = vmatmul.f32.gmra.mxu1 %v1856_v62  ;;  %v1170_v62 = vld [vmem:[%s4327_s29 + $0x88] sm:$0xff] }
  0xd3   : > { %664 = vmatmul.f32.gmra.mxu0 %v515_v2  ;;  %v1862_v2 = vld [vmem:[%s4138_s27 + $0xd0] sm:$0xff] }
  0xd4   : > { %1003 = vmatmul.f32.gmra.mxu2 %v909_v3  ;;  %1266 = vmatmul.f32.gmra.mxu3 %v1165_v4 }
  0xd5   : > { %v1932_v5 = vpop.f32.mrf.mxu1 }
  0xd6   : > { %2066 = vst.msk [vmem:[%s4381_s25 + $0x5c0] sm:$0xff] %vm859_vm0, %v1932_v5 }
  0xd7   : > { %v4449_v7 = vpop.f32.mrf.mxu2  ;;  %v847_v8 = vpop.f32.mrf.mxu3 }
  0xd8   : > { %v848_v9 = vadd.f32 %v847_v8, %v710_v38  ;;  %v4453_v10 = vpop.f32.mrf.mxu0  ;;  %1979 = vmatmul.f32.gmra.mxu1 %v1857_v6  ;;  %v1168_v38 = vld [vmem:[%s4327_s29 + $0x78] sm:$0xff]  ;;  %v482_v6 = vld [vmem:[%s4114_s13 + $0x48] sm:$0xff] }
  0xd9   : > { %v915_v8 = vld [vmem:[%s4347_s17 + $0x78] sm:$0xff] }
  0xda   : > { %896 = vst.msk [vmem:[%s4381_s25 + $0x120] sm:$0xff] %vm859_vm0, %v848_v9  ;;  %v1171_v9 = vld [vmem:[%s4327_s29 + $0x90] sm:$0xff] }
  0xdb   : > { %667 = vmatmul.f32.gmra.mxu0 %v517_v11 }
  0xdc   : > { %1006 = vmatmul.f32.gmra.mxu2 %v910_v13  ;;  %1269 = vmatmul.f32.gmra.mxu3 %v1166_v14 }
  0xdd   : > { %v1935_v15 = vpop.f32.mrf.mxu1 }
  0xde   : > { %2067 = vst.msk [vmem:[%s4381_s25 + $0x5c8] sm:$0xff] %vm859_vm0, %v1935_v15 }
  0xdf   : > { %v4464_v17 = vpop.f32.mrf.mxu2  ;;  %v850_v18 = vpop.f32.mrf.mxu3 }
  0xe0   : > { %v851_v19 = vadd.f32 %v850_v18, %v713_v46  ;;  %v4468_v20 = vpop.f32.mrf.mxu0  ;;  %1982 = vmatmul.f32.gmra.mxu1 %v1858_v16  ;;  %v484_v16 = vld [vmem:[%s4114_s13 + $0x58] sm:$0xff]  ;;  %v916_v18 = vld [vmem:[%s4347_s17 + $0x80] sm:$0xff] }
  0xe2   : > { %897 = vst.msk [vmem:[%s4381_s25 + $0x128] sm:$0xff] %vm859_vm0, %v851_v19  ;;  %v1172_v19 = vld [vmem:[%s4327_s29 + $0x98] sm:$0xff] }
  0xe3   : > { %738 = vmatmul.f32.vlgmr.msrb.gmra.mxu0 %v474_v21 }
  0xe4   : > { %1009 = vmatmul.f32.gmra.mxu2 %v911_v24  ;;  %1272 = vmatmul.f32.gmra.mxu3 %v1167_v25 }
  0xe5   : > { %v1938_v26 = vpop.f32.mrf.mxu1 }
  0xe6   : > { %2068 = vst.msk [vmem:[%s4381_s25 + $0x5d0] sm:$0xff] %vm859_vm0, %v1938_v26 }
  0xe7   : > { %v4479_v31 = vpop.f32.mrf.mxu2  ;;  %v853_v32 = vpop.f32.mrf.mxu3 }
  0xe8   : > { %v854_v33 = vadd.f32 %v853_v32, %v4424_v55  ;;  %v4484_v34 = vpop.f32.mrf.mxu0  ;;  %1985 = vmatmul.f32.gmra.mxu1 %v1859_v27  ;;  %v1861_v55 = vld [vmem:[%s4138_s27 + $0xc8] sm:$0xff]  ;;  %v2615_v32 = vld [vmem:[%s5960_s0 + $0x318] sm:$0xff] }
  0xe9   : > { %v486_v27 = vld [vmem:[%s4114_s13 + $0x68] sm:$0xff]  ;;  %2794 = vmatpush.msrb.mxu3 %v2615_v32  ;;  %v1465_v32 = vld [vmem:[%s5960_s0 + $0x220] sm:$0xff] }
  0xea   : > { %898 = vst.msk [vmem:[%s4381_s25 + $0x130] sm:$0xff] %vm859_vm0, %v854_v33  ;;  %v1466_v33 = vld [vmem:[%s5960_s0 + $0x228] sm:$0xff] }
  0xeb   : > { %741 = vmatmul.f32.gmra.mxu0 %v476_v35  ;;  %v917_v35 = vld [vmem:[%s4347_s17 + $0x88] sm:$0xff] }
  0xec   : > { %1012 = vmatmul.f32.gmra.mxu2 %v912_v36  ;;  %1275 = vmatmul.f32.gmra.mxu3 %v1168_v38  ;;  %v1173_v36 = vld [vmem:[%s4327_s29 + $0xa0] sm:$0xff] }
  0xed   : > { %v1941_v41 = vpop.f32.mrf.mxu1  ;;  %1629 = vmatpush.msra.mxu0 %v1466_v33 }
  0xee   : > { %2069 = vst.msk [vmem:[%s4381_s25 + $0x5d8] sm:$0xff] %vm859_vm0, %v1941_v41 }
  0xef   : > { %v4495_v43 = vpop.f32.mrf.mxu2  ;;  %v856_v44 = vpop.f32.mrf.mxu3  ;;  %1630 = vmatpush.msra.mxu0 %v1465_v32  ;;  %v502_v32 = vld [vmem:[%s4114_s13 + $0xe8] sm:$0xff] }
  0xf0   : > { %v857_v46 = vadd.f32 %v856_v44, %v4439_v0  ;;  %v4500_v48 = vpop.f32.mrf.mxu0  ;;  %1988 = vmatmul.f32.gmra.mxu1 %v1860_v42 }
  0xf2   : > { %899 = vst.msk [vmem:[%s4381_s25 + $0x138] sm:$0xff] %vm859_vm0, %v857_v46  ;;  %v488_v46 = vld [vmem:[%s4114_s13 + $0x78] sm:$0xff] }
  0xf3   : > { %744 = vmatmul.f32.gmra.mxu0 %v478_v49  ;;  %v918_v49 = vld [vmem:[%s4347_s17 + $0x90] sm:$0xff] }
  0xf4   : > { %1015 = vmatmul.f32.gmra.mxu2 %v913_v51  ;;  %1278 = vmatmul.f32.gmra.mxu3 %v1169_v52  ;;  %v2165_v51 = vld [vmem:[%s5960_s0 + $0x2d8] sm:$0xff] }
  0xf5   : > { %v1944_v53 = vpop.f32.mrf.mxu1  ;;  %2341 = vmatpush.msra.mxu2 %v2165_v51 }
  0xf6   : > { %2070 = vst.msk [vmem:[%s4381_s25 + $0x5e0] sm:$0xff] %vm859_vm0, %v1944_v53  ;;  %v1866_v53 = vld [vmem:[%s4138_s27 + $0xf0] sm:$0xff] }
  0xf7   : > { %v4511_v57 = vpop.f32.mrf.mxu2  ;;  %v1231_v58 = vpop.f32.mrf.mxu3 }
  0xf8   : > { %v4515_v59 = vpop.f32.mrf.mxu0  ;;  %1366 = vst.msk [vmem:[%s4381_s25 + $0x2a0] sm:$0xff] %vm859_vm0, %v1231_v58  ;;  %1991 = vmatmul.f32.gmra.mxu1 %v1861_v55 }
  0xfb   : > { %747 = vmatmul.f32.gmra.mxu0 %v480_v60 }
  0xfc   : > { %1018 = vmatmul.f32.gmra.mxu2 %v914_v61  ;;  %1281 = vmatmul.f32.gmra.mxu3 %v1170_v62  ;;  %v490_v61 = vld [vmem:[%s4114_s13 + $0x88] sm:$0xff]  ;;  %v919_v62 = vld [vmem:[%s4347_s17 + $0x98] sm:$0xff] }
  0xfd   : > { %v1947_v0 = vpop.f32.mrf.mxu1 }
  0xfe   : > { %2071 = vst.msk [vmem:[%s4381_s25 + $0x5e8] sm:$0xff] %vm859_vm0, %v1947_v0  ;;  %v1175_v0 = vld [vmem:[%s4327_s29 + $0xb0] sm:$0xff] }
  0xff   : > { %v4523_v3 = vpop.f32.mrf.mxu2  ;;  %v1234_v4 = vpop.f32.mrf.mxu3 }
 0x100   : > { %v4527_v5 = vpop.f32.mrf.mxu0  ;;  %1367 = vst.msk [vmem:[%s4381_s25 + $0x2a8] sm:$0xff] %vm859_vm0, %v1234_v4  ;;  %1994 = vmatmul.f32.gmra.mxu1 %v1862_v2  ;;  %v1867_v4 = vld [vmem:[%s4138_s27 + $0xf8] sm:$0xff] }
 0x103   : > { %750 = vmatmul.f32.gmra.mxu0 %v482_v6 }
 0x104   : > { %1021 = vmatmul.f32.gmra.mxu2 %v915_v8  ;;  %1284 = vmatmul.f32.gmra.mxu3 %v1171_v9 }
 0x105   : > { %v1950_v11 = vpop.f32.mrf.mxu1 }
 0x106   : > { %2072 = vst.msk [vmem:[%s4381_s25 + $0x5f0] sm:$0xff] %vm859_vm0, %v1950_v11  ;;  %v492_v11 = vld [vmem:[%s4114_s13 + $0x98] sm:$0xff] }
 0x107   : > { %v4535_v13 = vpop.f32.mrf.mxu2  ;;  %v1237_v14 = vpop.f32.mrf.mxu3 }
 0x108   : > { %v4539_v15 = vpop.f32.mrf.mxu0  ;;  %1368 = vst.msk [vmem:[%s4381_s25 + $0x2b0] sm:$0xff] %vm859_vm0, %v1237_v14  ;;  %1997 = vmatmul.f32.gmra.mxu1 %v1863_v12  ;;  %v920_v12 = vld [vmem:[%s4347_s17 + $0xa0] sm:$0xff]  ;;  %v1176_v14 = vld [vmem:[%s4327_s29 + $0xb8] sm:$0xff] }
 0x10b   : > { %753 = vmatmul.f32.gmra.mxu0 %v484_v16 }
 0x10c   : > { %1024 = vmatmul.f32.gmra.mxu2 %v916_v18  ;;  %1287 = vmatmul.f32.gmra.mxu3 %v1172_v19  ;;  %v1868_v18 = vld [vmem:[%s4138_s27 + $0x100] sm:$0xff] }
 0x10d   : > { %v1953_v21 = vpop.f32.mrf.mxu1 }
 0x10e   : > { %2073 = vst.msk [vmem:[%s4381_s25 + $0x5f8] sm:$0xff] %vm859_vm0, %v1953_v21 }
 0x10f   : > { %v977_v24 = vpop.f32.mrf.mxu2  ;;  %v1240_v25 = vpop.f32.mrf.mxu3 }
 0x110   : > { %1109 = vst.msk [vmem:[%s4381_s25 + $0x140] sm:$0xff] %vm859_vm0, %v977_v24  ;;  %v4551_v26 = vpop.f32.mrf.mxu0  ;;  %2000 = vmatmul.f32.gmra.mxu1 %v1864_v23  ;;  %v494_v24 = vld [vmem:[%s4114_s13 + $0xa8] sm:$0xff] }
 0x111   : > { %1369 = vst.msk [vmem:[%s4381_s25 + $0x2b8] sm:$0xff] %vm859_vm0, %v1240_v25  ;;  %v921_v25 = vld [vmem:[%s4347_s17 + $0xa8] sm:$0xff] }
 0x113   : > { %756 = vmatmul.f32.gmra.mxu0 %v486_v27  ;;  %v1177_v27 = vld [vmem:[%s4327_s29 + $0xc0] sm:$0xff] }
 0x114   : > { %1027 = vmatmul.f32.gmra.mxu2 %v917_v35  ;;  %1290 = vmatmul.f32.gmra.mxu3 %v1173_v36  ;;  %v1869_v35 = vld [vmem:[%s4138_s27 + $0x108] sm:$0xff] }
 0x115   : > { %v1956_v38 = vpop.f32.mrf.mxu1 }
 0x116   : > { %2074 = vst.msk [vmem:[%s4381_s25 + $0x600] sm:$0xff] %vm859_vm0, %v1956_v38 }
 0x117   : > { %v980_v41 = vpop.f32.mrf.mxu2  ;;  %v1243_v42 = vpop.f32.mrf.mxu3 }
 0x118   : > { %1110 = vst.msk [vmem:[%s4381_s25 + $0x148] sm:$0xff] %vm859_vm0, %v980_v41  ;;  %v4569_v44 = vpop.f32.mrf.mxu0  ;;  %2003 = vmatmul.f32.gmra.mxu1 %v1865_v40  ;;  %v496_v41 = vld [vmem:[%s4114_s13 + $0xb8] sm:$0xff] }
 0x119   : > { %1370 = vst.msk [vmem:[%s4381_s25 + $0x2c0] sm:$0xff] %vm859_vm0, %v1243_v42  ;;  %v3075_v42 = vld [vmem:[%s5960_s0 + $0x340] sm:$0xff] }
 0x11a   : > { %3275 = vmatpush.msrb.mxu1 %v3075_v42 }
 0x11b   : > { %759 = vmatmul.f32.gmra.mxu0 %v488_v46  ;;  %v922_v46 = vld [vmem:[%s4347_s17 + $0xb0] sm:$0xff] }
 0x11c   : > { %1030 = vmatmul.f32.gmra.mxu2 %v918_v49  ;;  %1293 = vmatmul.f32.gmra.mxu3 %v1174_v50  ;;  %v1178_v49 = vld [vmem:[%s4327_s29 + $0xc8] sm:$0xff]  ;;  %v2614_v50 = vld [vmem:[%s5960_s0 + $0x310] sm:$0xff] }
 0x11d   : > { %v1959_v52 = vpop.f32.mrf.mxu1  ;;  %2795 = vmatpush.msrb.mxu3 %v2614_v50  ;;  %v926_v50 = vld [vmem:[%s4347_s17 + $0xd0] sm:$0xff] }
 0x11e   : > { %2075 = vst.msk [vmem:[%s4381_s25 + $0x608] sm:$0xff] %vm859_vm0, %v1959_v52  ;;  %v1870_v52 = vld [vmem:[%s4138_s27 + $0x110] sm:$0xff] }
 0x11f   : > { %v983_v55 = vpop.f32.mrf.mxu2  ;;  %v1246_v58 = vpop.f32.mrf.mxu3 }
 0x120   : > { %1111 = vst.msk [vmem:[%s4381_s25 + $0x150] sm:$0xff] %vm859_vm0, %v983_v55  ;;  %v4584_v60 = vpop.f32.mrf.mxu0  ;;  %2006 = vmatmul.f32.gmra.mxu1 %v1866_v53 }
 0x121   : > { %1371 = vst.msk [vmem:[%s4381_s25 + $0x2c8] sm:$0xff] %vm859_vm0, %v1246_v58 }
 0x123   : > { %762 = vmatmul.f32.gmra.mxu0 %v490_v61  ;;  %v498_v61 = vld [vmem:[%s4114_s13 + $0xc8] sm:$0xff] }
 0x124   : > { %1033 = vmatmul.f32.gmra.mxu2 %v919_v62  ;;  %1296 = vmatmul.f32.gmra.mxu3 %v1175_v0  ;;  %v923_v62 = vld [vmem:[%s4347_s17 + $0xb8] sm:$0xff]  ;;  %v1179_v0 = vld [vmem:[%s4327_s29 + $0xd0] sm:$0xff] }
 0x125   : > { %v1962_v2 = vpop.f32.mrf.mxu1 }
 0x126   : > { %2076 = vst.msk [vmem:[%s4381_s25 + $0x610] sm:$0xff] %vm859_vm0, %v1962_v2 }
 0x127   : > { %v986_v6 = vpop.f32.mrf.mxu2  ;;  %v1249_v8 = vpop.f32.mrf.mxu3 }
 0x128   : > { %1112 = vst.msk [vmem:[%s4381_s25 + $0x158] sm:$0xff] %vm859_vm0, %v986_v6  ;;  %v4596_v9 = vpop.f32.mrf.mxu0  ;;  %2009 = vmatmul.f32.gmra.mxu1 %v1867_v4  ;;  %v1871_v4 = vld [vmem:[%s4138_s27 + $0x118] sm:$0xff] }
 0x129   : > { %1372 = vst.msk [vmem:[%s4381_s25 + $0x2d0] sm:$0xff] %vm859_vm0, %v1249_v8 }
 0x12b   : > { %765 = vmatmul.f32.gmra.mxu0 %v492_v11 }
 0x12c   : > { %1036 = vmatmul.f32.gmra.mxu2 %v920_v12  ;;  %1299 = vmatmul.f32.gmra.mxu3 %v1176_v14  ;;  %v500_v12 = vld [vmem:[%s4114_s13 + $0xd8] sm:$0xff]  ;;  %v2164_v14 = vld [vmem:[%s5960_s0 + $0x2d0] sm:$0xff] }
 0x12d   : > { %v1965_v16 = vpop.f32.mrf.mxu1  ;;  %2342 = vmatpush.msra.mxu2 %v2164_v14  ;;  %v1875_v14 = vld [vmem:[%s4138_s27 + $0x138] sm:$0xff] }
 0x12e   : > { %2077 = vst.msk [vmem:[%s4381_s25 + $0x618] sm:$0xff] %vm859_vm0, %v1965_v16  ;;  %v924_v16 = vld [vmem:[%s4347_s17 + $0xc0] sm:$0xff] }
 0x12f   : > { %v989_v19 = vpop.f32.mrf.mxu2  ;;  %v1252_v21 = vpop.f32.mrf.mxu3 }
 0x130   : > { %1113 = vst.msk [vmem:[%s4381_s25 + $0x160] sm:$0xff] %vm859_vm0, %v989_v19  ;;  %v4608_v23 = vpop.f32.mrf.mxu0  ;;  %2012 = vmatmul.f32.gmra.mxu1 %v1868_v18  ;;  %v1180_v18 = vld [vmem:[%s4327_s29 + $0xd8] sm:$0xff] }
 0x131   : > { %1373 = vst.msk [vmem:[%s4381_s25 + $0x2d8] sm:$0xff] %vm859_vm0, %v1252_v21  ;;  %v1872_v21 = vld [vmem:[%s4138_s27 + $0x120] sm:$0xff] }
 0x133   : > { %768 = vmatmul.f32.gmra.mxu0 %v494_v24 }
 0x134   : > { %1039 = vmatmul.f32.gmra.mxu2 %v921_v25  ;;  %1302 = vmatmul.f32.gmra.mxu3 %v1177_v27 }
 0x135   : > { %v1968_v33 = vpop.f32.mrf.mxu1 }
 0x136   : > { %2078 = vst.msk [vmem:[%s4381_s25 + $0x620] sm:$0xff] %vm859_vm0, %v1968_v33  ;;  %v925_v33 = vld [vmem:[%s4347_s17 + $0xc8] sm:$0xff] }
 0x137   : > { %v992_v36 = vpop.f32.mrf.mxu2  ;;  %v1255_v38 = vpop.f32.mrf.mxu3 }
 0x138   : > { %1114 = vst.msk [vmem:[%s4381_s25 + $0x168] sm:$0xff] %vm859_vm0, %v992_v36  ;;  %v4623_v40 = vpop.f32.mrf.mxu0  ;;  %2015 = vmatmul.f32.gmra.mxu1 %v1869_v35  ;;  %v1181_v35 = vld [vmem:[%s4327_s29 + $0xe0] sm:$0xff] }
 0x139   : > { %1374 = vst.msk [vmem:[%s4381_s25 + $0x2e0] sm:$0xff] %vm859_vm0, %v1255_v38  ;;  %v1873_v38 = vld [vmem:[%s4138_s27 + $0x128] sm:$0xff] }
 0x13b   : > { %771 = vmatmul.f32.gmra.mxu0 %v496_v41 }
 0x13c   : > { %1042 = vmatmul.f32.gmra.mxu2 %v922_v46  ;;  %1305 = vmatmul.f32.gmra.mxu3 %v1178_v49  ;;  %v504_v49 = vld [vmem:[%s4114_s13 + $0xf8] sm:$0xff] }
 0x13d   : > { %v1971_v51 = vpop.f32.mrf.mxu1 }
 0x13e   : > { %2079 = vst.msk [vmem:[%s4381_s25 + $0x628] sm:$0xff] %vm859_vm0, %v1971_v51  ;;  %v1182_v51 = vld [vmem:[%s4327_s29 + $0xe8] sm:$0xff] }
 0x13f   : > { %v995_v53 = vpop.f32.mrf.mxu2  ;;  %v1258_v55 = vpop.f32.mrf.mxu3 }
 0x140   : > { %1115 = vst.msk [vmem:[%s4381_s25 + $0x170] sm:$0xff] %vm859_vm0, %v995_v53  ;;  %v4641_v58 = vpop.f32.mrf.mxu0  ;;  %2018 = vmatmul.f32.gmra.mxu1 %v1870_v52  ;;  %v1464_v52 = vld [vmem:[%s5960_s0 + $0x218] sm:$0xff] }
 0x141   : > { %1375 = vst.msk [vmem:[%s4381_s25 + $0x2e8] sm:$0xff] %vm859_vm0, %v1258_v55  ;;  %1631 = vmatpush.msra.mxu0 %v1464_v52  ;;  %v1874_v55 = vld [vmem:[%s4138_s27 + $0x130] sm:$0xff]  ;;  %v1877_v52 = vld [vmem:[%s4138_s27 + $0x148] sm:$0xff] }
 0x143   : > { %774 = vmatmul.f32.gmra.mxu0 %v498_v61 }
 0x144   : > { %1045 = vmatmul.f32.gmra.mxu2 %v923_v62  ;;  %1308 = vmatmul.f32.gmra.mxu3 %v1179_v0 }
 0x145   : > { %v1974_v2 = vpop.f32.mrf.mxu1 }
 0x146   : > { %2080 = vst.msk [vmem:[%s4381_s25 + $0x630] sm:$0xff] %vm859_vm0, %v1974_v2  ;;  %v506_v2 = vld [vmem:[%s4114_s13 + $0x108] sm:$0xff] }
 0x147   : > { %v998_v6 = vpop.f32.mrf.mxu2  ;;  %v1261_v8 = vpop.f32.mrf.mxu3 }
 0x148   : > { %1116 = vst.msk [vmem:[%s4381_s25 + $0x178] sm:$0xff] %vm859_vm0, %v998_v6  ;;  %v4653_v11 = vpop.f32.mrf.mxu0  ;;  %2021 = vmatmul.f32.gmra.mxu1 %v1871_v4  ;;  %v927_v6 = vld [vmem:[%s4347_s17 + $0xd8] sm:$0xff] }
 0x149   : > { %1376 = vst.msk [vmem:[%s4381_s25 + $0x2f0] sm:$0xff] %vm859_vm0, %v1261_v8  ;;  %v1183_v8 = vld [vmem:[%s4327_s29 + $0xf0] sm:$0xff] }
 0x14b   : > { %777 = vmatmul.f32.gmra.mxu0 %v500_v12 }
 0x14c   : > { %1048 = vmatmul.f32.gmra.mxu2 %v924_v16  ;;  %1311 = vmatmul.f32.gmra.mxu3 %v1180_v18 }
 0x14d   : > { %v1977_v19 = vpop.f32.mrf.mxu1 }
 0x14e   : > { %2081 = vst.msk [vmem:[%s4381_s25 + $0x638] sm:$0xff] %vm859_vm0, %v1977_v19  ;;  %v508_v19 = vld [vmem:[%s4114_s13 + $0x118] sm:$0xff] }
 0x14f   : > { %v1001_v24 = vpop.f32.mrf.mxu2  ;;  %v1264_v25 = vpop.f32.mrf.mxu3 }
 0x150   : > { %1117 = vst.msk [vmem:[%s4381_s25 + $0x180] sm:$0xff] %vm859_vm0, %v1001_v24  ;;  %v4668_v27 = vpop.f32.mrf.mxu0  ;;  %2024 = vmatmul.f32.gmra.mxu1 %v1872_v21  ;;  %v928_v24 = vld [vmem:[%s4347_s17 + $0xe0] sm:$0xff] }
 0x151   : > { %1377 = vst.msk [vmem:[%s4381_s25 + $0x2f8] sm:$0xff] %vm859_vm0, %v1264_v25  ;;  %v1184_v25 = vld [vmem:[%s4327_s29 + $0xf8] sm:$0xff] }
 0x153   : > { %780 = vmatmul.f32.gmra.mxu0 %v502_v32  ;;  %v2613_v32 = vld [vmem:[%s5960_s0 + $0x308] sm:$0xff] }
 0x154   : > { %1051 = vmatmul.f32.gmra.mxu2 %v925_v33  ;;  %1314 = vmatmul.f32.gmra.mxu3 %v1181_v35  ;;  %v1876_v33 = vld [vmem:[%s4138_s27 + $0x140] sm:$0xff] }
 0x155   : > { %v1980_v36 = vpop.f32.mrf.mxu1  ;;  %2796 = vmatpush.msrb.mxu3 %v2613_v32 }
 0x156   : > { %2082 = vst.msk [vmem:[%s4381_s25 + $0x640] sm:$0xff] %vm859_vm0, %v1980_v36 }
 0x157   : > { %v1004_v41 = vpop.f32.mrf.mxu2  ;;  %v1267_v42 = vpop.f32.mrf.mxu3 }
 0x158   : > { %1118 = vst.msk [vmem:[%s4381_s25 + $0x188] sm:$0xff] %vm859_vm0, %v1004_v41  ;;  %v4680_v46 = vpop.f32.mrf.mxu0  ;;  %2027 = vmatmul.f32.gmra.mxu1 %v1873_v38  ;;  %v510_v41 = vld [vmem:[%s4114_s13 + $0x128] sm:$0xff] }
 0x159   : > { %1378 = vst.msk [vmem:[%s4381_s25 + $0x300] sm:$0xff] %vm859_vm0, %v1267_v42 }
 0x15b   : > { %783 = vmatmul.f32.gmra.mxu0 %v504_v49  ;;  %v929_v49 = vld [vmem:[%s4347_s17 + $0xe8] sm:$0xff] }
 0x15c   : > { %1054 = vmatmul.f32.gmra.mxu2 %v926_v50  ;;  %1317 = vmatmul.f32.gmra.mxu3 %v1182_v51  ;;  %v1185_v50 = vld [vmem:[%s4327_s29 + $0x100] sm:$0xff] }
 0x15d   : > { %v1983_v53 = vpop.f32.mrf.mxu1 }
 0x15e   : > { %2083 = vst.msk [vmem:[%s4381_s25 + $0x648] sm:$0xff] %vm859_vm0, %v1983_v53 }
 0x15f   : > { %v1007_v61 = vpop.f32.mrf.mxu2  ;;  %v1270_v62 = vpop.f32.mrf.mxu3 }
 0x160   : > { %1119 = vst.msk [vmem:[%s4381_s25 + $0x190] sm:$0xff] %vm859_vm0, %v1007_v61  ;;  %v739_v0 = vpop.f32.mrf.mxu0  ;;  %2030 = vmatmul.f32.gmra.mxu1 %v1874_v55 }
 0x161   : > { %v740_v4 = vadd.f32 %v739_v0, %v4372_v22  ;;  %1379 = vst.msk [vmem:[%s4381_s25 + $0x308] sm:$0xff] %vm859_vm0, %v1270_v62  ;;  %v512_v62 = vld [vmem:[%s4114_s13 + $0x138] sm:$0xff] }
 0x163   : > { %860 = vst.msk [vmem:[%s4381_s25] sm:$0xff] %vm859_vm0, %v740_v4  ;;  %786 = vmatmul.f32.gmra.mxu0 %v506_v2  ;;  %v930_v2 = vld [vmem:[%s4347_s17 + $0xf0] sm:$0xff]  ;;  %v1186_v4 = vld [vmem:[%s4327_s29 + $0x108] sm:$0xff] }
 0x164   : > { %1057 = vmatmul.f32.gmra.mxu2 %v927_v6  ;;  %1320 = vmatmul.f32.gmra.mxu3 %v1183_v8  ;;  %v1878_v8 = vld [vmem:[%s4138_s27 + $0x150] sm:$0xff] }
 0x165   : > { %v1986_v12 = vpop.f32.mrf.mxu1 }
 0x166   : > { %2084 = vst.msk [vmem:[%s4381_s25 + $0x650] sm:$0xff] %vm859_vm0, %v1986_v12 }
 0x167   : > { %v1010_v16 = vpop.f32.mrf.mxu2  ;;  %v1273_v18 = vpop.f32.mrf.mxu3 }
 0x168   : > { %1120 = vst.msk [vmem:[%s4381_s25 + $0x198] sm:$0xff] %vm859_vm0, %v1010_v16  ;;  %v742_v22 = vpop.f32.mrf.mxu0  ;;  %2033 = vmatmul.f32.gmra.mxu1 %v1875_v14 }
 0x169   : > { %v743_v21 = vadd.f32 %v742_v22, %v4390_v30  ;;  %1380 = vst.msk [vmem:[%s4381_s25 + $0x310] sm:$0xff] %vm859_vm0, %v1273_v18  ;;  %v514_v18 = vld [vmem:[%s4114_s13 + $0x148] sm:$0xff] }
 0x16b   : > { %861 = vst.msk [vmem:[%s4381_s25 + $0x8] sm:$0xff] %vm859_vm0, %v743_v21  ;;  %789 = vmatmul.f32.gmra.mxu0 %v508_v19  ;;  %v931_v19 = vld [vmem:[%s4347_s17 + $0xf8] sm:$0xff]  ;;  %v1187_v21 = vld [vmem:[%s4327_s29 + $0x110] sm:$0xff] }
 0x16c   : > { %1060 = vmatmul.f32.gmra.mxu2 %v928_v24  ;;  %1323 = vmatmul.f32.gmra.mxu3 %v1184_v25  ;;  %v1879_v25 = vld [vmem:[%s4138_s27 + $0x158] sm:$0xff] }
 0x16d   : > { %v1989_v30 = vpop.f32.mrf.mxu1 }
 0x16e   : > { %2085 = vst.msk [vmem:[%s4381_s25 + $0x658] sm:$0xff] %vm859_vm0, %v1989_v30 }
 0x16f   : > { %v1013_v35 = vpop.f32.mrf.mxu2  ;;  %v1276_v36 = vpop.f32.mrf.mxu3 }
 0x170   : > { %1121 = vst.msk [vmem:[%s4381_s25 + $0x1a0] sm:$0xff] %vm859_vm0, %v1013_v35  ;;  %v745_v38 = vpop.f32.mrf.mxu0  ;;  %2036 = vmatmul.f32.gmra.mxu1 %v1876_v33  ;;  %v516_v33 = vld [vmem:[%s4114_s13 + $0x158] sm:$0xff] }
 0x171   : > { %v746_v42 = vadd.f32 %v745_v38, %v4403_v39  ;;  %1381 = vst.msk [vmem:[%s4381_s25 + $0x318] sm:$0xff] %vm859_vm0, %v1276_v36  ;;  %v2163_v39 = vld [vmem:[%s5960_s0 + $0x2c8] sm:$0xff]  ;;  %v932_v36 = vld [vmem:[%s4347_s17 + $0x100] sm:$0xff]  ;;  %v1188_v38 = vld [vmem:[%s4327_s29 + $0x118] sm:$0xff] }
 0x172   : > { %2343 = vmatpush.msra.mxu2 %v2163_v39  ;;  %v518_v39 = vld [vmem:[%s4114_s13 + $0x168] sm:$0xff] }
 0x173   : > { %862 = vst.msk [vmem:[%s4381_s25 + $0x10] sm:$0xff] %vm859_vm0, %v746_v42  ;;  %792 = vmatmul.f32.gmra.mxu0 %v510_v41  ;;  %v1880_v42 = vld [vmem:[%s4138_s27 + $0x160] sm:$0xff] }
 0x174   : > { %1063 = vmatmul.f32.gmra.mxu2 %v929_v49  ;;  %1326 = vmatmul.f32.gmra.mxu3 %v1185_v50 }
 0x175   : > { %v1992_v51 = vpop.f32.mrf.mxu1 }
 0x176   : > { %2086 = vst.msk [vmem:[%s4381_s25 + $0x660] sm:$0xff] %vm859_vm0, %v1992_v51 }
 0x177   : > { %v1016_v53 = vpop.f32.mrf.mxu2  ;;  %v1279_v55 = vpop.f32.mrf.mxu3 }
 0x178   : > { %1122 = vst.msk [vmem:[%s4381_s25 + $0x1a8] sm:$0xff] %vm859_vm0, %v1016_v53  ;;  %v748_v61 = vpop.f32.mrf.mxu0  ;;  %2039 = vmatmul.f32.gmra.mxu1 %v1877_v52  ;;  %v933_v52 = vld [vmem:[%s4347_s17 + $0x108] sm:$0xff]  ;;  %v1189_v53 = vld [vmem:[%s4327_s29 + $0x120] sm:$0xff] }
 0x179   : > { %v749_v0 = vadd.f32 %v748_v61, %v4413_v47  ;;  %1382 = vst.msk [vmem:[%s4381_s25 + $0x320] sm:$0xff] %vm859_vm0, %v1279_v55  ;;  %v1463_v47 = vld [vmem:[%s5960_s0 + $0x210] sm:$0xff]  ;;  %v1881_v61 = vld [vmem:[%s4138_s27 + $0x168] sm:$0xff] }
 0x17a   : > { %1632 = vmatpush.msra.mxu0 %v1463_v47 }
 0x17b   : > { %863 = vst.msk [vmem:[%s4381_s25 + $0x18] sm:$0xff] %vm859_vm0, %v749_v0  ;;  %795 = vmatmul.f32.gmra.mxu0 %v512_v62 }
 0x17c   : > { %1066 = vmatmul.f32.gmra.mxu2 %v930_v2  ;;  %1329 = vmatmul.f32.gmra.mxu3 %v1186_v4  ;;  %v520_v2 = vld [vmem:[%s4114_s13 + $0x178] sm:$0xff]  ;;  %v2612_v4 = vld [vmem:[%s5960_s0 + $0x300] sm:$0xff] }
 0x17d   : > { %v1995_v6 = vpop.f32.mrf.mxu1  ;;  %2797 = vmatpush.msrb.mxu3 %v2612_v4 }
 0x17e   : > { %2087 = vst.msk [vmem:[%s4381_s25 + $0x668] sm:$0xff] %vm859_vm0, %v1995_v6  ;;  %v934_v6 = vld [vmem:[%s4347_s17 + $0x110] sm:$0xff] }
 0x17f   : > { %v1019_v12 = vpop.f32.mrf.mxu2  ;;  %v1282_v14 = vpop.f32.mrf.mxu3 }
 0x180   : > { %1123 = vst.msk [vmem:[%s4381_s25 + $0x1b0] sm:$0xff] %vm859_vm0, %v1019_v12  ;;  %v751_v16 = vpop.f32.mrf.mxu0  ;;  %2042 = vmatmul.f32.gmra.mxu1 %v1878_v8  ;;  %v1190_v8 = vld [vmem:[%s4327_s29 + $0x128] sm:$0xff] }
 0x181   : > { %v752_v22 = vadd.f32 %v751_v16, %v4428_v56  ;;  %1383 = vst.msk [vmem:[%s4381_s25 + $0x328] sm:$0xff] %vm859_vm0, %v1282_v14  ;;  %v1882_v14 = vld [vmem:[%s4138_s27 + $0x170] sm:$0xff] }
 0x183   : > { %864 = vst.msk [vmem:[%s4381_s25 + $0x20] sm:$0xff] %vm859_vm0, %v752_v22  ;;  %798 = vmatmul.f32.gmra.mxu0 %v514_v18  ;;  %v522_v22 = vld [vmem:[%s4114_s13 + $0x188] sm:$0xff] }
 0x184   : > { %1069 = vmatmul.f32.gmra.mxu2 %v931_v19  ;;  %1332 = vmatmul.f32.gmra.mxu3 %v1187_v21  ;;  %v2162_v19 = vld [vmem:[%s5960_s0 + $0x2c0] sm:$0xff] }
 0x185   : > { %v1998_v24 = vpop.f32.mrf.mxu1  ;;  %2344 = vmatpush.msra.mxu2 %v2162_v19  ;;  %v1195_v19 = vld [vmem:[%s4327_s29 + $0x150] sm:$0xff] }
 0x186   : > { %2088 = vst.msk [vmem:[%s4381_s25 + $0x670] sm:$0xff] %vm859_vm0, %v1998_v24  ;;  %v935_v24 = vld [vmem:[%s4347_s17 + $0x118] sm:$0xff] }
 0x187   : > { %v1022_v32 = vpop.f32.mrf.mxu2  ;;  %v1285_v56 = vpop.f32.mrf.mxu3 }
 0x188   : > { %1124 = vst.msk [vmem:[%s4381_s25 + $0x1b8] sm:$0xff] %vm859_vm0, %v1022_v32  ;;  %v754_v30 = vpop.f32.mrf.mxu0  ;;  %2045 = vmatmul.f32.gmra.mxu1 %v1879_v25  ;;  %v1191_v25 = vld [vmem:[%s4327_s29 + $0x130] sm:$0xff]  ;;  %v1462_v32 = vld [vmem:[%s5960_s0 + $0x208] sm:$0xff] }
 0x189   : > { %v755_v35 = vadd.f32 %v754_v30, %v4443_v1  ;;  %1384 = vst.msk [vmem:[%s4381_s25 + $0x330] sm:$0xff] %vm859_vm0, %v1285_v56  ;;  %1633 = vmatpush.msra.mxu0 %v1462_v32  ;;  %v1883_v56 = vld [vmem:[%s4138_s27 + $0x178] sm:$0xff] }
 0x18b   : > { %865 = vst.msk [vmem:[%s4381_s25 + $0x28] sm:$0xff] %vm859_vm0, %v755_v35  ;;  %801 = vmatmul.f32.gmra.mxu0 %v516_v33 }
 0x18c   : > { %1072 = vmatmul.f32.gmra.mxu2 %v932_v36  ;;  %1335 = vmatmul.f32.gmra.mxu3 %v1188_v38  ;;  %v524_v36 = vld [vmem:[%s4114_s13 + $0x198] sm:$0xff] }
 0x18d   : > { %v2001_v41 = vpop.f32.mrf.mxu1 }
 0x18e   : > { %2089 = vst.msk [vmem:[%s4381_s25 + $0x678] sm:$0xff] %vm859_vm0, %v2001_v41  ;;  %v936_v41 = vld [vmem:[%s4347_s17 + $0x120] sm:$0xff] }
 0x18f   : > { %v1025_v49 = vpop.f32.mrf.mxu2  ;;  %v1288_v1 = vpop.f32.mrf.mxu3 }
 0x190   : > { %1125 = vst.msk [vmem:[%s4381_s25 + $0x1c0] sm:$0xff] %vm859_vm0, %v1025_v49  ;;  %v757_v50 = vpop.f32.mrf.mxu0  ;;  %2048 = vmatmul.f32.gmra.mxu1 %v1880_v42  ;;  %v1192_v42 = vld [vmem:[%s4327_s29 + $0x138] sm:$0xff]  ;;  %v3015_v49 = vld [vmem:[%s4842_s11] sm:$0xff] }
 0x191   : > { %v758_v51 = vadd.f32 %v757_v50, %v4453_v10  ;;  %1385 = vst.msk [vmem:[%s4381_s25 + $0x338] sm:$0xff] %vm859_vm0, %v1288_v1 }
 0x193   : > { %866 = vst.msk [vmem:[%s4381_s25 + $0x30] sm:$0xff] %vm859_vm0, %v758_v51  ;;  %804 = vmatmul.f32.gmra.mxu0 %v518_v39  ;;  %v526_v51 = vld [vmem:[%s4114_s13 + $0x1a8] sm:$0xff] }
 0x194   : > { %1075 = vmatmul.f32.gmra.mxu2 %v933_v52  ;;  %1338 = vmatmul.f32.gmra.mxu3 %v1189_v53  ;;  %v937_v53 = vld [vmem:[%s4347_s17 + $0x128] sm:$0xff] }
 0x195   : > { %v2004_v55 = vpop.f32.mrf.mxu1 }
 0x196   : > { %2090 = vst.msk [vmem:[%s4381_s25 + $0x680] sm:$0xff] %vm859_vm0, %v2004_v55  ;;  %v1193_v55 = vld [vmem:[%s4327_s29 + $0x140] sm:$0xff] }
 0x197   : > { %v1028_v62 = vpop.f32.mrf.mxu2  ;;  %v1291_v0 = vpop.f32.mrf.mxu3 }
 0x198   : > { %1126 = vst.msk [vmem:[%s4381_s25 + $0x1c8] sm:$0xff] %vm859_vm0, %v1028_v62  ;;  %v760_v10 = vpop.f32.mrf.mxu0  ;;  %2051 = vmatmul.f32.gmra.mxu1 %v1881_v61  ;;  %v3016_v62 = vld [vmem:[%s4842_s11 + $0x8] sm:$0xff] }
 0x199   : > { %v761_v47 = vadd.f32 %v760_v10, %v4468_v20  ;;  %1386 = vst.msk [vmem:[%s4381_s25 + $0x340] sm:$0xff] %vm859_vm0, %v1291_v0 }
 0x19b   : > { %867 = vst.msk [vmem:[%s4381_s25 + $0x38] sm:$0xff] %vm859_vm0, %v761_v47  ;;  %807 = vmatmul.f32.gmra.mxu0 %v520_v2  ;;  %v528_v2 = vld [vmem:[%s4114_s13 + $0x1b8] sm:$0xff]  ;;  %v938_v47 = vld [vmem:[%s4347_s17 + $0x130] sm:$0xff] }
 0x19c   : > { %1078 = vmatmul.f32.gmra.mxu2 %v934_v6  ;;  %1341 = vmatmul.f32.gmra.mxu3 %v1190_v8  ;;  %v1194_v6 = vld [vmem:[%s4327_s29 + $0x148] sm:$0xff] }
 0x19d   : > { %v2007_v12 = vpop.f32.mrf.mxu1 }
 0x19e   : > { %2091 = vst.msk [vmem:[%s4381_s25 + $0x688] sm:$0xff] %vm859_vm0, %v2007_v12  ;;  %v3017_v12 = vld [vmem:[%s4842_s11 + $0x10] sm:$0xff] }
 0x19f   : > { %v1031_v16 = vpop.f32.mrf.mxu2  ;;  %v1294_v20 = vpop.f32.mrf.mxu3 }
 0x1a0   : > { %1127 = vst.msk [vmem:[%s4381_s25 + $0x1d0] sm:$0xff] %vm859_vm0, %v1031_v16  ;;  %v763_v18 = vpop.f32.mrf.mxu0  ;;  %2054 = vmatmul.f32.gmra.mxu1 %v1882_v14 }
 0x1a1   : > { %v764_v21 = vadd.f32 %v763_v18, %v4484_v34  ;;  %1387 = vst.msk [vmem:[%s4381_s25 + $0x348] sm:$0xff] %vm859_vm0, %v1294_v20  ;;  %v530_v20 = vld [vmem:[%s4114_s13 + $0x1c8] sm:$0xff] }
 0x1a3   : > { %868 = vst.msk [vmem:[%s4381_s25 + $0x40] sm:$0xff] %vm859_vm0, %v764_v21  ;;  %810 = vmatmul.f32.gmra.mxu0 %v522_v22  ;;  %v939_v22 = vld [vmem:[%s4347_s17 + $0x138] sm:$0xff] }
 0x1a4   : > { %1081 = vmatmul.f32.gmra.mxu2 %v935_v24  ;;  %1344 = vmatmul.f32.gmra.mxu3 %v1191_v25  ;;  %v3018_v24 = vld [vmem:[%s4842_s11 + $0x18] sm:$0xff] }
 0x1a5   : > { %v2010_v34 = vpop.f32.mrf.mxu1 }
 0x1a6   : > { %2092 = vst.msk [vmem:[%s4381_s25 + $0x690] sm:$0xff] %vm859_vm0, %v2010_v34 }
 0x1a7   : > { %v1034_v30 = vpop.f32.mrf.mxu2  ;;  %v1297_v33 = vpop.f32.mrf.mxu3 }
 0x1a8   : > { %1128 = vst.msk [vmem:[%s4381_s25 + $0x1d8] sm:$0xff] %vm859_vm0, %v1034_v30  ;;  %v766_v35 = vpop.f32.mrf.mxu0  ;;  %2057 = vmatmul.f32.gmra.mxu1 %v1883_v56  ;;  %v532_v56 = vld [vmem:[%s4114_s13 + $0x1d8] sm:$0xff] }
 0x1a9   : > { %v767_v38 = vadd.f32 %v766_v35, %v4500_v48  ;;  %1388 = vst.msk [vmem:[%s4381_s25 + $0x350] sm:$0xff] %vm859_vm0, %v1297_v33  ;;  %v940_v33 = vld [vmem:[%s4347_s17 + $0x140] sm:$0xff]  ;;  %v1196_v35 = vld [vmem:[%s4327_s29 + $0x158] sm:$0xff] }
 0x1ab   : > { %869 = vst.msk [vmem:[%s4381_s25 + $0x48] sm:$0xff] %vm859_vm0, %v767_v38  ;;  %813 = vmatmul.f32.gmra.mxu0 %v524_v36  ;;  %v3019_v38 = vld [vmem:[%s4842_s11 + $0x20] sm:$0xff] }
 0x1ac   : > { %1084 = vmatmul.f32.gmra.mxu2 %v936_v41  ;;  %1347 = vmatmul.f32.gmra.mxu3 %v1192_v42 }
 0x1ad   : > { %v2013_v48 = vpop.f32.mrf.mxu1 }
 0x1ae   : > { %2093 = vst.msk [vmem:[%s4381_s25 + $0x698] sm:$0xff] %vm859_vm0, %v2013_v48  ;;  %v534_v48 = vld [vmem:[%s4114_s13 + $0x1e8] sm:$0xff] }
 0x1af   : > { %v1037_v1 = vpop.f32.mrf.mxu2  ;;  %v1300_v50 = vpop.f32.mrf.mxu3 }
 0x1b0   : > { %1129 = vst.msk [vmem:[%s4381_s25 + $0x1e0] sm:$0xff] %vm859_vm0, %v1037_v1  ;;  %v769_v39 = vpop.f32.mrf.mxu0  ;;  %3827 = vmatmul.msk.f32.vlgmr.msrb.gmra.mxu1 %vm3079_vm1, %v3015_v49  ;;  %v941_v1 = vld [vmem:[%s4347_s17 + $0x148] sm:$0xff] }
 0x1b1   : > { %v770_v52 = vadd.f32 %v769_v39, %v4515_v59  ;;  %1389 = vst.msk [vmem:[%s4381_s25 + $0x358] sm:$0xff] %vm859_vm0, %v1300_v50  ;;  %v1197_v50 = vld [vmem:[%s4327_s29 + $0x160] sm:$0xff]  ;;  %s3942_s29 = smul.u32 424, %s5971_s10 }
 0x1b3   : > { %870 = vst.msk [vmem:[%s4381_s25 + $0x50] sm:$0xff] %vm859_vm0, %v770_v52  ;;  %816 = vmatmul.f32.gmra.mxu0 %v526_v51  ;;  %v3020_v51 = vld [vmem:[%s4842_s11 + $0x28] sm:$0xff] }
 0x1b4   : > { %1087 = vmatmul.f32.gmra.mxu2 %v937_v53  ;;  %1350 = vmatmul.f32.gmra.mxu3 %v1193_v55  ;;  %v536_v55 = vld [vmem:[%s4114_s13 + $0x1f8] sm:$0xff] }
 0x1b5   : > { %v2016_v61 = vpop.f32.mrf.mxu1 }
 0x1b6   : > { %2094 = vst.msk [vmem:[%s4381_s25 + $0x6a0] sm:$0xff] %vm859_vm0, %v2016_v61 }
 0x1b7   : > { %v1040_v0 = vpop.f32.mrf.mxu2  ;;  %v1303_v59 = vpop.f32.mrf.mxu3 }
 0x1b8   : > { %1130 = vst.msk [vmem:[%s4381_s25 + $0x1e8] sm:$0xff] %vm859_vm0, %v1040_v0  ;;  %v772_v10 = vpop.f32.mrf.mxu0  ;;  %3828 = vmatmul.msk.f32.gmra.mxu1 %vm3079_vm1, %v3016_v62  ;;  %v942_v62 = vld [vmem:[%s4347_s17 + $0x150] sm:$0xff]  ;;  %v2558_v0 = vld [vmem:[%s4922_s19] sm:$0xff] }
 0x1b9   : > { %v773_v4 = vadd.f32 %v772_v10, %v4527_v5  ;;  %1390 = vst.msk [vmem:[%s4381_s25 + $0x360] sm:$0xff] %vm859_vm0, %v1303_v59 }
 0x1bb   : > { %871 = vst.msk [vmem:[%s4381_s25 + $0x58] sm:$0xff] %vm859_vm0, %v773_v4  ;;  %819 = vmatmul.f32.gmra.mxu0 %v528_v2 }
 0x1bc   : > { %1090 = vmatmul.f32.gmra.mxu2 %v938_v47  ;;  %1353 = vmatmul.f32.gmra.mxu3 %v1194_v6  ;;  %v538_v47 = vld [vmem:[%s4114_s13 + $0x208] sm:$0xff] }
 0x1bd   : > { %v2019_v8 = vpop.f32.mrf.mxu1 }
 0x1be   : > { %2095 = vst.msk [vmem:[%s4381_s25 + $0x6a8] sm:$0xff] %vm859_vm0, %v2019_v8  ;;  %v943_v8 = vld [vmem:[%s4347_s17 + $0x158] sm:$0xff]  ;;  %s4957_s17 = scalar_lea.vmem %s5966_s6, %s3942_s29 }
 0x1bf   : > { %v1043_v14 = vpop.f32.mrf.mxu2  ;;  %v1306_v5 = vpop.f32.mrf.mxu3 }
 0x1c0   : > { %1131 = vst.msk [vmem:[%s4381_s25 + $0x1f0] sm:$0xff] %vm859_vm0, %v1043_v14  ;;  %v775_v16 = vpop.f32.mrf.mxu0  ;;  %3829 = vmatmul.msk.f32.gmra.mxu1 %vm3079_vm1, %v3017_v12  ;;  %v2559_v12 = vld [vmem:[%s4922_s19 + $0x8] sm:$0xff]  ;;  %v3022_v14 = vld [vmem:[%s4842_s11 + $0x38] sm:$0xff] }
 0x1c1   : > { %v776_v18 = vadd.f32 %v775_v16, %v4539_v15  ;;  %1391 = vst.msk [vmem:[%s4381_s25 + $0x368] sm:$0xff] %vm859_vm0, %v1306_v5  ;;  %v1461_v15 = vld [vmem:[%s5960_s0 + $0x200] sm:$0xff] }
 0x1c2   : > { %1634 = vmatpush.msra.mxu0 %v1461_v15  ;;  %v2560_v15 = vld [vmem:[%s4922_s19 + $0x10] sm:$0xff] }
 0x1c3   : > { %872 = vst.msk [vmem:[%s4381_s25 + $0x60] sm:$0xff] %vm859_vm0, %v776_v18  ;;  %822 = vmatmul.f32.gmra.mxu0 %v530_v20  ;;  %v540_v18 = vld [vmem:[%s4114_s13 + $0x218] sm:$0xff] }
 0x1c4   : > { %1093 = vmatmul.f32.gmra.mxu2 %v939_v22  ;;  %1356 = vmatmul.f32.gmra.mxu3 %v1195_v19  ;;  %v2109_v19 = vld [vmem:[%s4957_s17] sm:$0xff] }
 0x1c5   : > { %v2022_v21 = vpop.f32.mrf.mxu1 }
 0x1c6   : > { %2096 = vst.msk [vmem:[%s4381_s25 + $0x6b0] sm:$0xff] %vm859_vm0, %v2022_v21 }
 0x1c7   : > { %v1046_v25 = vpop.f32.mrf.mxu2  ;;  %v1309_v32 = vpop.f32.mrf.mxu3 }
 0x1c8   : > { %1132 = vst.msk [vmem:[%s4381_s25 + $0x1f8] sm:$0xff] %vm859_vm0, %v1046_v25  ;;  %v778_v34 = vpop.f32.mrf.mxu0  ;;  %3830 = vmatmul.msk.f32.gmra.mxu1 %vm3079_vm1, %v3018_v24 }
 0x1c9   : > { %v779_v30 = vadd.f32 %v778_v34, %v4551_v26  ;;  %1392 = vst.msk [vmem:[%s4381_s25 + $0x370] sm:$0xff] %vm859_vm0, %v1309_v32  ;;  %v542_v34 = vld [vmem:[%s4114_s13 + $0x228] sm:$0xff] }
 0x1cb   : > { %873 = vst.msk [vmem:[%s4381_s25 + $0x68] sm:$0xff] %vm859_vm0, %v779_v30  ;;  %825 = vmatmul.f32.gmra.mxu0 %v532_v56  ;;  %v2110_v30 = vld [vmem:[%s4957_s17 + $0x8] sm:$0xff] }
 0x1cc   : > { %1096 = vmatmul.f32.gmra.mxu2 %v940_v33  ;;  %1359 = vmatmul.f32.gmra.mxu3 %v1196_v35  ;;  %v2561_v33 = vld [vmem:[%s4922_s19 + $0x18] sm:$0xff]  ;;  %v3024_v35 = vld [vmem:[%s4842_s11 + $0x48] sm:$0xff] }
 0x1cd   : > { %v2025_v36 = vpop.f32.mrf.mxu1 }
 0x1ce   : > { %2097 = vst.msk [vmem:[%s4381_s25 + $0x6b8] sm:$0xff] %vm859_vm0, %v2025_v36 }
 0x1cf   : > { %v1049_v26 = vpop.f32.mrf.mxu2  ;;  %v1312_v41 = vpop.f32.mrf.mxu3 }
 0x1d0   : > { %1133 = vst.msk [vmem:[%s4381_s25 + $0x200] sm:$0xff] %vm859_vm0, %v1049_v26  ;;  %v781_v42 = vpop.f32.mrf.mxu0  ;;  %3831 = vmatmul.msk.f32.gmra.mxu1 %vm3079_vm1, %v3019_v38 }
 0x1d1   : > { %v782_v49 = vadd.f32 %v781_v42, %v4569_v44  ;;  %1393 = vst.msk [vmem:[%s4381_s25 + $0x378] sm:$0xff] %vm859_vm0, %v1312_v41  ;;  %v544_v41 = vld [vmem:[%s4114_s13 + $0x238] sm:$0xff] }
 0x1d3   : > { %874 = vst.msk [vmem:[%s4381_s25 + $0x70] sm:$0xff] %vm859_vm0, %v782_v49  ;;  %828 = vmatmul.f32.gmra.mxu0 %v534_v48  ;;  %v2111_v48 = vld [vmem:[%s4957_s17 + $0x10] sm:$0xff]  ;;  %v2562_v49 = vld [vmem:[%s4922_s19 + $0x20] sm:$0xff] }
 0x1d4   : > { %1099 = vmatmul.f32.gmra.mxu2 %v941_v1  ;;  %1362 = vmatmul.f32.gmra.mxu3 %v1197_v50  ;;  %v3025_v1 = vld [vmem:[%s4842_s11 + $0x50] sm:$0xff] }
 0x1d5   : > { %v2028_v39 = vpop.f32.mrf.mxu1 }
 0x1d6   : > { %2098 = vst.msk [vmem:[%s4381_s25 + $0x6c0] sm:$0xff] %vm859_vm0, %v2028_v39 }
 0x1d7   : > { %v1052_v44 = vpop.f32.mrf.mxu2  ;;  %v1315_v52 = vpop.f32.mrf.mxu3 }
 0x1d8   : > { %1134 = vst.msk [vmem:[%s4381_s25 + $0x208] sm:$0xff] %vm859_vm0, %v1052_v44  ;;  %v784_v53 = vpop.f32.mrf.mxu0  ;;  %3832 = vmatmul.msk.f32.gmra.mxu1 %vm3079_vm1, %v3020_v51  ;;  %v1411_v44 = vld [vmem:[%s5011_s24] sm:$0xff] }
 0x1d9   : > { %v785_v61 = vadd.f32 %v784_v53, %v4584_v60  ;;  %1394 = vst.msk [vmem:[%s4381_s25 + $0x380] sm:$0xff] %vm859_vm0, %v1315_v52  ;;  %v3021_v60 = vld [vmem:[%s4842_s11 + $0x30] sm:$0xff]  ;;  %v2112_v53 = vld [vmem:[%s4957_s17 + $0x18] sm:$0xff] }
 0x1db   : > { %875 = vst.msk [vmem:[%s4381_s25 + $0x78] sm:$0xff] %vm859_vm0, %v785_v61  ;;  %831 = vmatmul.f32.gmra.mxu0 %v536_v55  ;;  %v2563_v55 = vld [vmem:[%s4922_s19 + $0x28] sm:$0xff]  ;;  %v3026_v61 = vld [vmem:[%s4842_s11 + $0x58] sm:$0xff] }
 0x1dc   : > { %1102 = vmatmul.f32.gmra.mxu2 %v942_v62  ;;  %3773 = vmatmul.msk.f32.vlgmr.msrb.gmra.mxu3 %vm859_vm0, %v2558_v0 }
 0x1dd   : > { %v2031_v59 = vpop.f32.mrf.mxu1 }
 0x1de   : > { %2099 = vst.msk [vmem:[%s4381_s25 + $0x6c8] sm:$0xff] %vm859_vm0, %v2031_v59 }
 0x1df   : > { %v1055_v10 = vpop.f32.mrf.mxu2  ;;  %v1318_v2 = vpop.f32.mrf.mxu3 }
 0x1e0   : > { %1135 = vst.msk [vmem:[%s4381_s25 + $0x210] sm:$0xff] %vm859_vm0, %v1055_v10  ;;  %v787_v4 = vpop.f32.mrf.mxu0  ;;  %3833 = vmatmul.msk.f32.gmra.mxu1 %vm3079_vm1, %v3021_v60  ;;  %v1412_v60 = vld [vmem:[%s5011_s24 + $0x8] sm:$0xff] }
 0x1e1   : > { %v788_v6 = vadd.f32 %v787_v4, %v4596_v9  ;;  %1395 = vst.msk [vmem:[%s4381_s25 + $0x388] sm:$0xff] %vm859_vm0, %v1318_v2  ;;  %v2113_v2 = vld [vmem:[%s4957_s17 + $0x20] sm:$0xff]  ;;  %v2564_v4 = vld [vmem:[%s4922_s19 + $0x30] sm:$0xff] }
 0x1e3   : > { %876 = vst.msk [vmem:[%s4381_s25 + $0x80] sm:$0xff] %vm859_vm0, %v788_v6  ;;  %834 = vmatmul.f32.gmra.mxu0 %v538_v47  ;;  %v3027_v47 = vld [vmem:[%s4842_s11 + $0x60] sm:$0xff] }
 0x1e4   : > { %1105 = vmatmul.f32.gmra.mxu2 %v943_v8  ;;  %3774 = vmatmul.msk.f32.gmra.mxu3 %vm859_vm0, %v2559_v12 }
 0x1e5   : > { %v2034_v9 = vpop.f32.mrf.mxu1 }
 0x1e6   : > { %2100 = vst.msk [vmem:[%s4381_s25 + $0x6d0] sm:$0xff] %vm859_vm0, %v2034_v9  ;;  %v1413_v9 = vld [vmem:[%s5011_s24 + $0x10] sm:$0xff] }
 0x1e7   : > { %v1058_v5 = vpop.f32.mrf.mxu2  ;;  %v1321_v16 = vpop.f32.mrf.mxu3 }
 0x1e8   : > { %1136 = vst.msk [vmem:[%s4381_s25 + $0x218] sm:$0xff] %vm859_vm0, %v1058_v5  ;;  %v790_v20 = vpop.f32.mrf.mxu0  ;;  %3834 = vmatmul.msk.f32.gmra.mxu1 %vm3079_vm1, %v3022_v14  ;;  %v2114_v5 = vld [vmem:[%s4957_s17 + $0x28] sm:$0xff] }
 0x1e9   : > { %v791_v22 = vadd.f32 %v790_v20, %v4608_v23  ;;  %1396 = vst.msk [vmem:[%s4381_s25 + $0x390] sm:$0xff] %vm859_vm0, %v1321_v16  ;;  %v3023_v23 = vld [vmem:[%s4842_s11 + $0x40] sm:$0xff]  ;;  %v2565_v16 = vld [vmem:[%s4922_s19 + $0x38] sm:$0xff]  ;;  %v3028_v20 = vld [vmem:[%s4842_s11 + $0x68] sm:$0xff] }
 0x1eb   : > { %877 = vst.msk [vmem:[%s4381_s25 + $0x88] sm:$0xff] %vm859_vm0, %v791_v22  ;;  %837 = vmatmul.f32.gmra.mxu0 %v540_v18 }
 0x1ec   : > { %3720 = vmatmul.msk.f32.vlgmr.msra.gmra.mxu2 %vm859_vm0, %v2109_v19  ;;  %3775 = vmatmul.msk.f32.gmra.mxu3 %vm859_vm0, %v2560_v15  ;;  %v1414_v15 = vld [vmem:[%s5011_s24 + $0x18] sm:$0xff] }
 0x1ed   : > { %v2037_v21 = vpop.f32.mrf.mxu1 }
 0x1ee   : > { %2101 = vst.msk [vmem:[%s4381_s25 + $0x6d8] sm:$0xff] %vm859_vm0, %v2037_v21 }
 0x1ef   : > { %v1061_v24 = vpop.f32.mrf.mxu2  ;;  %v1324_v25 = vpop.f32.mrf.mxu3 }
 0x1f0   : > { %1137 = vst.msk [vmem:[%s4381_s25 + $0x220] sm:$0xff] %vm859_vm0, %v1061_v24  ;;  %v793_v32 = vpop.f32.mrf.mxu0  ;;  %3835 = vmatmul.msk.f32.gmra.mxu1 %vm3079_vm1, %v3023_v23  ;;  %v2115_v23 = vld [vmem:[%s4957_s17 + $0x30] sm:$0xff]  ;;  %v2566_v24 = vld [vmem:[%s4922_s19 + $0x40] sm:$0xff] }
 0x1f1   : > { %v794_v56 = vadd.f32 %v793_v32, %v4623_v40  ;;  %1397 = vst.msk [vmem:[%s4381_s25 + $0x398] sm:$0xff] %vm859_vm0, %v1324_v25  ;;  %v3029_v25 = vld [vmem:[%s4842_s11 + $0x70] sm:$0xff] }
 0x1f3   : > { %878 = vst.msk [vmem:[%s4381_s25 + $0x90] sm:$0xff] %vm859_vm0, %v794_v56  ;;  %840 = vmatmul.f32.gmra.mxu0 %v542_v34 }
 0x1f4   : > { %3721 = vmatmul.msk.f32.gmra.mxu2 %vm859_vm0, %v2110_v30  ;;  %3776 = vmatmul.msk.f32.gmra.mxu3 %vm859_vm0, %v2561_v33  ;;  %v1415_v30 = vld [vmem:[%s5011_s24 + $0x20] sm:$0xff] }
 0x1f5   : > { %v2040_v40 = vpop.f32.mrf.mxu1 }
 0x1f6   : > { %2102 = vst.msk [vmem:[%s4381_s25 + $0x6e0] sm:$0xff] %vm859_vm0, %v2040_v40  ;;  %v2116_v40 = vld [vmem:[%s4957_s17 + $0x38] sm:$0xff] }
 0x1f7   : > { %v1064_v36 = vpop.f32.mrf.mxu2  ;;  %v1327_v38 = vpop.f32.mrf.mxu3 }
 0x1f8   : > { %1138 = vst.msk [vmem:[%s4381_s25 + $0x228] sm:$0xff] %vm859_vm0, %v1064_v36  ;;  %v796_v26 = vpop.f32.mrf.mxu0  ;;  %3836 = vmatmul.msk.f32.gmra.mxu1 %vm3079_vm1, %v3024_v35  ;;  %v2567_v35 = vld [vmem:[%s4922_s19 + $0x48] sm:$0xff]  ;;  %v3030_v36 = vld [vmem:[%s4842_s11 + $0x78] sm:$0xff] }
 0x1f9   : > { %v797_v42 = vadd.f32 %v796_v26, %v4641_v58  ;;  %1398 = vst.msk [vmem:[%s4381_s25 + $0x3a0] sm:$0xff] %vm859_vm0, %v1327_v38 }
 0x1fb   : > { %879 = vst.msk [vmem:[%s4381_s25 + $0x98] sm:$0xff] %vm859_vm0, %v797_v42  ;;  %843 = vmatmul.f32.gmra.mxu0 %v544_v41  ;;  %v1416_v42 = vld [vmem:[%s5011_s24 + $0x28] sm:$0xff] }
 0x1fc   : > { %3722 = vmatmul.msk.f32.gmra.mxu2 %vm859_vm0, %v2111_v48  ;;  %3777 = vmatmul.msk.f32.gmra.mxu3 %vm859_vm0, %v2562_v49  ;;  %v2117_v49 = vld [vmem:[%s4957_s17 + $0x40] sm:$0xff] }
 0x1fd   : > { %v2043_v58 = vpop.f32.mrf.mxu1 }
 0x1fe   : > { %2103 = vst.msk [vmem:[%s4381_s25 + $0x6e8] sm:$0xff] %vm859_vm0, %v2043_v58  ;;  %v2568_v58 = vld [vmem:[%s4922_s19 + $0x50] sm:$0xff] }
 0x1ff   : > { %v1067_v50 = vpop.f32.mrf.mxu2  ;;  %v1330_v39 = vpop.f32.mrf.mxu3 }
 0x200   : > { %1139 = vst.msk [vmem:[%s4381_s25 + $0x230] sm:$0xff] %vm859_vm0, %v1067_v50  ;;  %v799_v51 = vpop.f32.mrf.mxu0  ;;  %3837 = vmatmul.msk.f32.gmra.mxu1 %vm3079_vm1, %v3025_v1  ;;  %v3031_v1 = vld [vmem:[%s4842_s11 + $0x80] sm:$0xff] }
 0x201   : > { %v800_v52 = vadd.f32 %v799_v51, %v4653_v11  ;;  %1399 = vst.msk [vmem:[%s4381_s25 + $0x3a8] sm:$0xff] %vm859_vm0, %v1330_v39 }
 0x203   : > { %880 = vst.msk [vmem:[%s4381_s25 + $0xa0] sm:$0xff] %vm859_vm0, %v800_v52  ;;  %3670 = vmatmul.msk.f32.vlgmr.msra.gmra.mxu0 %vm859_vm0, %v1411_v44  ;;  %v1417_v44 = vld [vmem:[%s5011_s24 + $0x30] sm:$0xff] }
 0x204   : > { %3723 = vmatmul.msk.f32.gmra.mxu2 %vm859_vm0, %v2112_v53  ;;  %3778 = vmatmul.msk.f32.gmra.mxu3 %vm859_vm0, %v2563_v55  ;;  %v2118_v53 = vld [vmem:[%s4957_s17 + $0x48] sm:$0xff]  ;;  %v2569_v55 = vld [vmem:[%s4922_s19 + $0x58] sm:$0xff] }
 0x205   : > { %v2046_v11 = vpop.f32.mrf.mxu1 }
 0x206   : > { %2104 = vst.msk [vmem:[%s4381_s25 + $0x6f0] sm:$0xff] %vm859_vm0, %v2046_v11  ;;  %v3032_v11 = vld [vmem:[%s4842_s11 + $0x88] sm:$0xff] }
 0x207   : > { %v1070_v62 = vpop.f32.mrf.mxu2  ;;  %v1333_v0 = vpop.f32.mrf.mxu3 }
 0x208   : > { %1140 = vst.msk [vmem:[%s4381_s25 + $0x238] sm:$0xff] %vm859_vm0, %v1070_v62  ;;  %v802_v59 = vpop.f32.mrf.mxu0  ;;  %3838 = vmatmul.msk.f32.gmra.mxu1 %vm3079_vm1, %v3026_v61 }
 0x209   : > { %v803_v10 = vadd.f32 %v802_v59, %v4668_v27  ;;  %1400 = vst.msk [vmem:[%s4381_s25 + $0x3b0] sm:$0xff] %vm859_vm0, %v1333_v0  ;;  %v1418_v59 = vld [vmem:[%s5011_s24 + $0x38] sm:$0xff] }
 0x20b   : > { %881 = vst.msk [vmem:[%s4381_s25 + $0xa8] sm:$0xff] %vm859_vm0, %v803_v10  ;;  %3671 = vmatmul.msk.f32.gmra.mxu0 %vm859_vm0, %v1412_v60  ;;  %v2119_v10 = vld [vmem:[%s4957_s17 + $0x50] sm:$0xff] }
 0x20c   : > { %3724 = vmatmul.msk.f32.gmra.mxu2 %vm859_vm0, %v2113_v2  ;;  %3779 = vmatmul.msk.f32.gmra.mxu3 %vm859_vm0, %v2564_v4  ;;  %v2570_v2 = vld [vmem:[%s4922_s19 + $0x60] sm:$0xff]  ;;  %v3033_v4 = vld [vmem:[%s4842_s11 + $0x90] sm:$0xff] }
 0x20d   : > { %v2049_v27 = vpop.f32.mrf.mxu1 }
 0x20e   : > { %2105 = vst.msk [vmem:[%s4381_s25 + $0x6f8] sm:$0xff] %vm859_vm0, %v2049_v27 }
 0x20f   : > { %v1073_v6 = vpop.f32.mrf.mxu2  ;;  %v1336_v8 = vpop.f32.mrf.mxu3 }
 0x210   : > { %1141 = vst.msk [vmem:[%s4381_s25 + $0x240] sm:$0xff] %vm859_vm0, %v1073_v6  ;;  %v805_v12 = vpop.f32.mrf.mxu0  ;;  %3839 = vmatmul.msk.f32.gmra.mxu1 %vm3079_vm1, %v3027_v47 }
 0x211   : > { %v806_v14 = vadd.f32 %v805_v12, %v4680_v46  ;;  %1401 = vst.msk [vmem:[%s4381_s25 + $0x3b8] sm:$0xff] %vm859_vm0, %v1336_v8  ;;  %v1419_v8 = vld [vmem:[%s5011_s24 + $0x40] sm:$0xff] }
 0x213   : > { %882 = vst.msk [vmem:[%s4381_s25 + $0xb0] sm:$0xff] %vm859_vm0, %v806_v14  ;;  %3672 = vmatmul.msk.f32.gmra.mxu0 %vm859_vm0, %v1413_v9  ;;  %v2120_v9 = vld [vmem:[%s4957_s17 + $0x58] sm:$0xff]  ;;  %v2571_v14 = vld [vmem:[%s4922_s19 + $0x68] sm:$0xff] }
 0x214   : > { %3725 = vmatmul.msk.f32.gmra.mxu2 %vm859_vm0, %v2114_v5  ;;  %3780 = vmatmul.msk.f32.gmra.mxu3 %vm859_vm0, %v2565_v16  ;;  %v3034_v5 = vld [vmem:[%s4842_s11 + $0x98] sm:$0xff] }
 0x215   : > { %v2052_v46 = vpop.f32.mrf.mxu1 }
 0x216   : > { %2106 = vst.msk [vmem:[%s4381_s25 + $0x700] sm:$0xff] %vm859_vm0, %v2052_v46 }
 0x217   : > { %v1076_v18 = vpop.f32.mrf.mxu2  ;;  %v1339_v22 = vpop.f32.mrf.mxu3 }
 0x218   : > { %1142 = vst.msk [vmem:[%s4381_s25 + $0x248] sm:$0xff] %vm859_vm0, %v1076_v18  ;;  %v808_v19 = vpop.f32.mrf.mxu0  ;;  %3840 = vmatmul.msk.f32.gmra.mxu1 %vm3079_vm1, %v3028_v20  ;;  %v1420_v18 = vld [vmem:[%s5011_s24 + $0x48] sm:$0xff] }
 0x219   : > { %v809_v21 = vadd.f32 %v808_v19, %v4384_v28  ;;  %1402 = vst.msk [vmem:[%s4381_s25 + $0x3c0] sm:$0xff] %vm859_vm0, %v1339_v22  ;;  %v2121_v19 = vld [vmem:[%s4957_s17 + $0x60] sm:$0xff] }
 0x21b   : > { %883 = vst.msk [vmem:[%s4381_s25 + $0xb8] sm:$0xff] %vm859_vm0, %v809_v21  ;;  %3673 = vmatmul.msk.f32.gmra.mxu0 %vm859_vm0, %v1414_v15  ;;  %v2572_v15 = vld [vmem:[%s4922_s19 + $0x70] sm:$0xff]  ;;  %v3035_v21 = vld [vmem:[%s4842_s11 + $0xa0] sm:$0xff] }
 0x21c   : > { %3726 = vmatmul.msk.f32.gmra.mxu2 %vm859_vm0, %v2115_v23  ;;  %3781 = vmatmul.msk.f32.gmra.mxu3 %vm859_vm0, %v2566_v24 }
 0x21d   : > { %v2055_v28 = vpop.f32.mrf.mxu1 }
 0x21e   : > { %2107 = vst.msk [vmem:[%s4381_s25 + $0x708] sm:$0xff] %vm859_vm0, %v2055_v28 }
 0x21f   : > { %v1079_v32 = vpop.f32.mrf.mxu2  ;;  %v1342_v34 = vpop.f32.mrf.mxu3 }
 0x220   : > { %1143 = vst.msk [vmem:[%s4381_s25 + $0x250] sm:$0xff] %vm859_vm0, %v1079_v32  ;;  %v811_v56 = vpop.f32.mrf.mxu0  ;;  %3841 = vmatmul.msk.f32.gmra.mxu1 %vm3079_vm1, %v3029_v25  ;;  %v1421_v25 = vld [vmem:[%s5011_s24 + $0x50] sm:$0xff] }
 0x221   : > { %v812_v33 = vadd.f32 %v811_v56, %v4399_v37  ;;  %1403 = vst.msk [vmem:[%s4381_s25 + $0x3c8] sm:$0xff] %vm859_vm0, %v1342_v34  ;;  %v2122_v34 = vld [vmem:[%s4957_s17 + $0x68] sm:$0xff]  ;;  %v2573_v56 = vld [vmem:[%s4922_s19 + $0x78] sm:$0xff] }
 0x223   : > { %884 = vst.msk [vmem:[%s4381_s25 + $0xc0] sm:$0xff] %vm859_vm0, %v812_v33  ;;  %3674 = vmatmul.msk.f32.gmra.mxu0 %vm859_vm0, %v1415_v30  ;;  %v3036_v30 = vld [vmem:[%s4842_s11 + $0xa8] sm:$0xff] }
 0x224   : > { %3727 = vmatmul.msk.f32.gmra.mxu2 %vm859_vm0, %v2116_v40  ;;  %3782 = vmatmul.msk.f32.gmra.mxu3 %vm859_vm0, %v2567_v35 }
 0x225   : > { %v2058_v37 = vpop.f32.mrf.mxu1 }
 0x226   : > { %2108 = vst.msk [vmem:[%s4381_s25 + $0x710] sm:$0xff] %vm859_vm0, %v2058_v37  ;;  %v1422_v37 = vld [vmem:[%s5011_s24 + $0x58] sm:$0xff] }
 0x227   : > { %v1082_v38 = vpop.f32.mrf.mxu2  ;;  %v1345_v26 = vpop.f32.mrf.mxu3 }
 0x228   : > { %1144 = vst.msk [vmem:[%s4381_s25 + $0x258] sm:$0xff] %vm859_vm0, %v1082_v38  ;;  %v814_v41 = vpop.f32.mrf.mxu0  ;;  %3842 = vmatmul.msk.f32.gmra.mxu1 %vm3079_vm1, %v3030_v36  ;;  %v2123_v38 = vld [vmem:[%s4957_s17 + $0x70] sm:$0xff] }
 0x229   : > { %v815_v48 = vadd.f32 %v814_v41, %v4409_v45  ;;  %1404 = vst.msk [vmem:[%s4381_s25 + $0x3d0] sm:$0xff] %vm859_vm0, %v1345_v26  ;;  %v2574_v26 = vld [vmem:[%s4922_s19 + $0x80] sm:$0xff]  ;;  %v3037_v41 = vld [vmem:[%s4842_s11 + $0xb0] sm:$0xff] }
 0x22b   : > { %885 = vst.msk [vmem:[%s4381_s25 + $0xc8] sm:$0xff] %vm859_vm0, %v815_v48  ;;  %3675 = vmatmul.msk.f32.gmra.mxu0 %vm859_vm0, %v1416_v42 }
 0x22c   : > { %3728 = vmatmul.msk.f32.gmra.mxu2 %vm859_vm0, %v2117_v49  ;;  %3783 = vmatmul.msk.f32.gmra.mxu3 %vm859_vm0, %v2568_v58  ;;  %v1423_v58 = vld [vmem:[%s5011_s24 + $0x60] sm:$0xff] }
 0x22d   : > { %v3277_v45 = vpop.f32.mrf.mxu1 }
 0x22e   : > { %3457 = vst.msk [vmem:[%s4381_s25 + $0xa70] sm:$0xff] %vm859_vm0, %v3277_v45 }
 0x22f   : > { %v1085_v50 = vpop.f32.mrf.mxu2  ;;  %v1348_v39 = vpop.f32.mrf.mxu3 }
 0x230   : > { %1145 = vst.msk [vmem:[%s4381_s25 + $0x260] sm:$0xff] %vm859_vm0, %v1085_v50  ;;  %v817_v51 = vpop.f32.mrf.mxu0  ;;  %3843 = vmatmul.msk.f32.gmra.mxu1 %vm3079_vm1, %v3031_v1  ;;  %v2124_v1 = vld [vmem:[%s4957_s17 + $0x78] sm:$0xff]  ;;  %v2575_v50 = vld [vmem:[%s4922_s19 + $0x88] sm:$0xff] }
 0x231   : > { %v818_v52 = vadd.f32 %v817_v51, %v4422_v54  ;;  %1405 = vst.msk [vmem:[%s4381_s25 + $0x3d8] sm:$0xff] %vm859_vm0, %v1348_v39  ;;  %v3038_v39 = vld [vmem:[%s4842_s11 + $0xb8] sm:$0xff] }
 0x233   : > { %886 = vst.msk [vmem:[%s4381_s25 + $0xd0] sm:$0xff] %vm859_vm0, %v818_v52  ;;  %3676 = vmatmul.msk.f32.gmra.mxu0 %vm859_vm0, %v1417_v44 }
 0x234   : > { %3729 = vmatmul.msk.f32.gmra.mxu2 %vm859_vm0, %v2118_v53  ;;  %3784 = vmatmul.msk.f32.gmra.mxu3 %vm859_vm0, %v2569_v55  ;;  %v1424_v53 = vld [vmem:[%s5011_s24 + $0x68] sm:$0xff] }
 0x235   : > { %v3280_v54 = vpop.f32.mrf.mxu1 }
 0x236   : > { %3458 = vst.msk [vmem:[%s4381_s25 + $0xa78] sm:$0xff] %vm859_vm0, %v3280_v54  ;;  %v2125_v54 = vld [vmem:[%s4957_s17 + $0x80] sm:$0xff] }
 0x237   : > { %v1088_v61 = vpop.f32.mrf.mxu2  ;;  %v1351_v62 = vpop.f32.mrf.mxu3 }
 0x238   : > { %1146 = vst.msk [vmem:[%s4381_s25 + $0x268] sm:$0xff] %vm859_vm0, %v1088_v61  ;;  %v820_v0 = vpop.f32.mrf.mxu0  ;;  %3844 = vmatmul.msk.f32.gmra.mxu1 %vm3079_vm1, %v3032_v11  ;;  %v2576_v11 = vld [vmem:[%s4922_s19 + $0x90] sm:$0xff]  ;;  %v3039_v61 = vld [vmem:[%s4842_s11 + $0xc0] sm:$0xff] }
 0x239   : > { %v821_v60 = vadd.f32 %v820_v0, %v4437_v63  ;;  %1406 = vst.msk [vmem:[%s4381_s25 + $0x3e0] sm:$0xff] %vm859_vm0, %v1351_v62 }
 0x23b   : > { %887 = vst.msk [vmem:[%s4381_s25 + $0xd8] sm:$0xff] %vm859_vm0, %v821_v60  ;;  %3677 = vmatmul.msk.f32.gmra.mxu0 %vm859_vm0, %v1418_v59  ;;  %v1425_v60 = vld [vmem:[%s5011_s24 + $0x70] sm:$0xff] }
 0x23c   : > { %3730 = vmatmul.msk.f32.gmra.mxu2 %vm859_vm0, %v2119_v10  ;;  %3785 = vmatmul.msk.f32.gmra.mxu3 %vm859_vm0, %v2570_v2  ;;  %v2126_v2 = vld [vmem:[%s4957_s17 + $0x88] sm:$0xff] }
 0x23d   : > { %v3283_v63 = vpop.f32.mrf.mxu1 }
 0x23e   : > { %3459 = vst.msk [vmem:[%s4381_s25 + $0xa80] sm:$0xff] %vm859_vm0, %v3283_v63  ;;  %v2577_v63 = vld [vmem:[%s4922_s19 + $0x98] sm:$0xff] }
 0x23f   : > { %v1091_v27 = vpop.f32.mrf.mxu2  ;;  %v1354_v47 = vpop.f32.mrf.mxu3 }
 0x240   : > { %1147 = vst.msk [vmem:[%s4381_s25 + $0x270] sm:$0xff] %vm859_vm0, %v1091_v27  ;;  %v823_v6 = vpop.f32.mrf.mxu0  ;;  %3845 = vmatmul.msk.f32.gmra.mxu1 %vm3079_vm1, %v3033_v4  ;;  %v3040_v4 = vld [vmem:[%s4842_s11 + $0xc8] sm:$0xff] }
 0x241   : > { %v824_v12 = vadd.f32 %v823_v6, %v4449_v7  ;;  %1407 = vst.msk [vmem:[%s4381_s25 + $0x3e8] sm:$0xff] %vm859_vm0, %v1354_v47 }
 0x243   : > { %888 = vst.msk [vmem:[%s4381_s25 + $0xe0] sm:$0xff] %vm859_vm0, %v824_v12  ;;  %3678 = vmatmul.msk.f32.gmra.mxu0 %vm859_vm0, %v1419_v8  ;;  %v1426_v8 = vld [vmem:[%s5011_s24 + $0x78] sm:$0xff] }
 0x244   : > { %3731 = vmatmul.msk.f32.gmra.mxu2 %vm859_vm0, %v2120_v9  ;;  %3786 = vmatmul.msk.f32.gmra.mxu3 %vm859_vm0, %v2571_v14  ;;  %v2127_v9 = vld [vmem:[%s4957_s17 + $0x90] sm:$0xff]  ;;  %v2578_v14 = vld [vmem:[%s4922_s19 + $0xa0] sm:$0xff] }
 0x245   : > { %v3286_v7 = vpop.f32.mrf.mxu1 }
 0x246   : > { %3460 = vst.msk [vmem:[%s4381_s25 + $0xa88] sm:$0xff] %vm859_vm0, %v3286_v7  ;;  %v3041_v7 = vld [vmem:[%s4842_s11 + $0xd0] sm:$0xff] }
 0x247   : > { %v1094_v16 = vpop.f32.mrf.mxu2  ;;  %v1357_v46 = vpop.f32.mrf.mxu3 }
 0x248   : > { %1148 = vst.msk [vmem:[%s4381_s25 + $0x278] sm:$0xff] %vm859_vm0, %v1094_v16  ;;  %v826_v20 = vpop.f32.mrf.mxu0  ;;  %3846 = vmatmul.msk.f32.gmra.mxu1 %vm3079_vm1, %v3034_v5 }
 0x249   : > { %v827_v22 = vadd.f32 %v826_v20, %v4464_v17  ;;  %1408 = vst.msk [vmem:[%s4381_s25 + $0x3f0] sm:$0xff] %vm859_vm0, %v1357_v46  ;;  %v1427_v20 = vld [vmem:[%s5011_s24 + $0x80] sm:$0xff] }
 0x24b   : > { %889 = vst.msk [vmem:[%s4381_s25 + $0xe8] sm:$0xff] %vm859_vm0, %v827_v22  ;;  %3679 = vmatmul.msk.f32.gmra.mxu0 %vm859_vm0, %v1420_v18  ;;  %v2128_v18 = vld [vmem:[%s4957_s17 + $0x98] sm:$0xff]  ;;  %v2579_v22 = vld [vmem:[%s4922_s19 + $0xa8] sm:$0xff] }
 0x24c   : > { %3732 = vmatmul.msk.f32.gmra.mxu2 %vm859_vm0, %v2121_v19  ;;  %3787 = vmatmul.msk.f32.gmra.mxu3 %vm859_vm0, %v2572_v15  ;;  %v3042_v15 = vld [vmem:[%s4842_s11 + $0xd8] sm:$0xff] }
 0x24d   : > { %v3289_v17 = vpop.f32.mrf.mxu1 }
 0x24e   : > { %3461 = vst.msk [vmem:[%s4381_s25 + $0xa90] sm:$0xff] %vm859_vm0, %v3289_v17 }
 0x24f   : > { %v1097_v23 = vpop.f32.mrf.mxu2  ;;  %v1360_v24 = vpop.f32.mrf.mxu3 }
 0x250   : > { %1149 = vst.msk [vmem:[%s4381_s25 + $0x280] sm:$0xff] %vm859_vm0, %v1097_v23  ;;  %v829_v28 = vpop.f32.mrf.mxu0  ;;  %3847 = vmatmul.msk.f32.gmra.mxu1 %vm3079_vm1, %v3035_v21 }
 0x251   : > { %v830_v32 = vadd.f32 %v829_v28, %v4479_v31  ;;  %1409 = vst.msk [vmem:[%s4381_s25 + $0x3f8] sm:$0xff] %vm859_vm0, %v1360_v24  ;;  %v1428_v24 = vld [vmem:[%s5011_s24 + $0x88] sm:$0xff]  ;;  %v2129_v28 = vld [vmem:[%s4957_s17 + $0xa0] sm:$0xff] }
 0x253   : > { %890 = vst.msk [vmem:[%s4381_s25 + $0xf0] sm:$0xff] %vm859_vm0, %v830_v32  ;;  %3680 = vmatmul.msk.f32.gmra.mxu0 %vm859_vm0, %v1421_v25  ;;  %v2580_v25 = vld [vmem:[%s4922_s19 + $0xb0] sm:$0xff] }
 0x254   : > { %3733 = vmatmul.msk.f32.gmra.mxu2 %vm859_vm0, %v2122_v34  ;;  %3788 = vmatmul.msk.f32.gmra.mxu3 %vm859_vm0, %v2573_v56  ;;  %v3043_v34 = vld [vmem:[%s4842_s11 + $0xe0] sm:$0xff] }
 0x255   : > { %v3292_v31 = vpop.f32.mrf.mxu1 }
 0x256   : > { %3462 = vst.msk [vmem:[%s4381_s25 + $0xa98] sm:$0xff] %vm859_vm0, %v3292_v31 }
 0x257   : > { %v1100_v33 = vpop.f32.mrf.mxu2  ;;  %v1363_v40 = vpop.f32.mrf.mxu3 }
 0x258   : > { %1150 = vst.msk [vmem:[%s4381_s25 + $0x288] sm:$0xff] %vm859_vm0, %v1100_v33  ;;  %v832_v35 = vpop.f32.mrf.mxu0  ;;  %3848 = vmatmul.msk.f32.gmra.mxu1 %vm3079_vm1, %v3036_v30  ;;  %v1429_v33 = vld [vmem:[%s5011_s24 + $0x90] sm:$0xff] }
 0x259   : > { %v833_v36 = vadd.f32 %v832_v35, %v4495_v43  ;;  %1410 = vst.msk [vmem:[%s4381_s25 + $0x400] sm:$0xff] %vm859_vm0, %v1363_v40  ;;  %v2130_v40 = vld [vmem:[%s4957_s17 + $0xa8] sm:$0xff]  ;;  %v2581_v35 = vld [vmem:[%s4922_s19 + $0xb8] sm:$0xff] }
 0x25b   : > { %891 = vst.msk [vmem:[%s4381_s25 + $0xf8] sm:$0xff] %vm859_vm0, %v833_v36  ;;  %3681 = vmatmul.msk.f32.gmra.mxu0 %vm859_vm0, %v1422_v37  ;;  %v3044_v36 = vld [vmem:[%s4842_s11 + $0xe8] sm:$0xff] }
 0x25c   : > { %3734 = vmatmul.msk.f32.gmra.mxu2 %vm859_vm0, %v2123_v38  ;;  %3789 = vmatmul.msk.f32.gmra.mxu3 %vm859_vm0, %v2574_v26 }
 0x25d   : > { %v3295_v43 = vpop.f32.mrf.mxu1 }
 0x25e   : > { %3463 = vst.msk [vmem:[%s4381_s25 + $0xaa0] sm:$0xff] %vm859_vm0, %v3295_v43 }
 0x25f   : > { %v1103_v42 = vpop.f32.mrf.mxu2  ;;  %v2799_v48 = vpop.f32.mrf.mxu3 }
 0x260   : > { %1151 = vst.msk [vmem:[%s4381_s25 + $0x290] sm:$0xff] %vm859_vm0, %v1103_v42  ;;  %v835_v49 = vpop.f32.mrf.mxu0  ;;  %3849 = vmatmul.msk.f32.gmra.mxu1 %vm3079_vm1, %v3037_v41  ;;  %v1430_v41 = vld [vmem:[%s5011_s24 + $0x98] sm:$0xff]  ;;  %v2131_v42 = vld [vmem:[%s4957_s17 + $0xb0] sm:$0xff] }
 0x261   : > { %v836_v45 = vadd.f32 %v835_v49, %v4511_v57  ;;  %2961 = vst.msk [vmem:[%s4381_s25 + $0x8c0] sm:$0xff] %vm859_vm0, %v2799_v48  ;;  %v2582_v48 = vld [vmem:[%s4922_s19 + $0xc0] sm:$0xff] }
 0x263   : > { %892 = vst.msk [vmem:[%s4381_s25 + $0x100] sm:$0xff] %vm859_vm0, %v836_v45  ;;  %3682 = vmatmul.msk.f32.gmra.mxu0 %vm859_vm0, %v1423_v58  ;;  %v3045_v58 = vld [vmem:[%s4842_s11 + $0xf0] sm:$0xff] }
 0x264   : > { %3735 = vmatmul.msk.f32.gmra.mxu2 %vm859_vm0, %v2124_v1  ;;  %3790 = vmatmul.msk.f32.gmra.mxu3 %vm859_vm0, %v2575_v50 }
 0x265   : > { %v3298_v57 = vpop.f32.mrf.mxu1 }
 0x266   : > { %3464 = vst.msk [vmem:[%s4381_s25 + $0xaa8] sm:$0xff] %vm859_vm0, %v3298_v57  ;;  %v1431_v57 = vld [vmem:[%s5011_s24 + $0xa0] sm:$0xff] }
 0x267   : > { %v1106_v51 = vpop.f32.mrf.mxu2  ;;  %v2802_v44 = vpop.f32.mrf.mxu3 }
 0x268   : > { %1152 = vst.msk [vmem:[%s4381_s25 + $0x298] sm:$0xff] %vm859_vm0, %v1106_v51  ;;  %v838_v52 = vpop.f32.mrf.mxu0  ;;  %3850 = vmatmul.msk.f32.gmra.mxu1 %vm3079_vm1, %v3038_v39  ;;  %v2132_v39 = vld [vmem:[%s4957_s17 + $0xb8] sm:$0xff]  ;;  %v2583_v51 = vld [vmem:[%s4922_s19 + $0xc8] sm:$0xff] }
 0x269   : > { %v839_v55 = vadd.f32 %v838_v52, %v4523_v3  ;;  %2962 = vst.msk [vmem:[%s4381_s25 + $0x8c8] sm:$0xff] %vm859_vm0, %v2802_v44  ;;  %v3046_v52 = vld [vmem:[%s4842_s11 + $0xf8] sm:$0xff] }
 0x26b   : > { %893 = vst.msk [vmem:[%s4381_s25 + $0x108] sm:$0xff] %vm859_vm0, %v839_v55  ;;  %3683 = vmatmul.msk.f32.gmra.mxu0 %vm859_vm0, %v1424_v53 }
 0x26c   : > { %3736 = vmatmul.msk.f32.gmra.mxu2 %vm859_vm0, %v2125_v54  ;;  %3791 = vmatmul.msk.f32.gmra.mxu3 %vm859_vm0, %v2576_v11  ;;  %v1432_v11 = vld [vmem:[%s5011_s24 + $0xa8] sm:$0xff] }
 0x26d   : > { %v3301_v3 = vpop.f32.mrf.mxu1 }
 0x26e   : > { %3465 = vst.msk [vmem:[%s4381_s25 + $0xab0] sm:$0xff] %vm859_vm0, %v3301_v3  ;;  %v2133_v3 = vld [vmem:[%s4957_s17 + $0xc0] sm:$0xff] }
 0x26f   : > { %v2346_v62 = vpop.f32.mrf.mxu2  ;;  %v2805_v0 = vpop.f32.mrf.mxu3 }
 0x270   : > { %2505 = vst.msk [vmem:[%s4381_s25 + $0x718] sm:$0xff] %vm859_vm0, %v2346_v62  ;;  %v841_v59 = vpop.f32.mrf.mxu0  ;;  %3851 = vmatmul.msk.f32.gmra.mxu1 %vm3079_vm1, %v3039_v61  ;;  %v2584_v61 = vld [vmem:[%s4922_s19 + $0xd0] sm:$0xff] }
 0x271   : > { %v842_v10 = vadd.f32 %v841_v59, %v4535_v13  ;;  %2963 = vst.msk [vmem:[%s4381_s25 + $0x8d0] sm:$0xff] %vm859_vm0, %v2805_v0  ;;  %v3047_v0 = vld [vmem:[%s4842_s11 + $0x100] sm:$0xff] }
 0x273   : > { %894 = vst.msk [vmem:[%s4381_s25 + $0x110] sm:$0xff] %vm859_vm0, %v842_v10  ;;  %3684 = vmatmul.msk.f32.gmra.mxu0 %vm859_vm0, %v1425_v60 }
 0x274   : > { %3737 = vmatmul.msk.f32.gmra.mxu2 %vm859_vm0, %v2126_v2  ;;  %3792 = vmatmul.msk.f32.gmra.mxu3 %vm859_vm0, %v2577_v63  ;;  %v1433_v2 = vld [vmem:[%s5011_s24 + $0xb0] sm:$0xff]  ;;  %v2134_v63 = vld [vmem:[%s4957_s17 + $0xc8] sm:$0xff] }
 0x275   : > { %v3304_v13 = vpop.f32.mrf.mxu1 }
 0x276   : > { %3466 = vst.msk [vmem:[%s4381_s25 + $0xab8] sm:$0xff] %vm859_vm0, %v3304_v13  ;;  %v2585_v13 = vld [vmem:[%s4922_s19 + $0xd8] sm:$0xff] }
 0x277   : > { %v2349_v27 = vpop.f32.mrf.mxu2  ;;  %v2808_v47 = vpop.f32.mrf.mxu3 }
 0x278   : > { %2506 = vst.msk [vmem:[%s4381_s25 + $0x720] sm:$0xff] %vm859_vm0, %v2349_v27  ;;  %v844_v6 = vpop.f32.mrf.mxu0  ;;  %3852 = vmatmul.msk.f32.gmra.mxu1 %vm3079_vm1, %v3040_v4  ;;  %v3048_v27 = vld [vmem:[%s4842_s11 + $0x108] sm:$0xff] }
 0x279   : > { %v845_v12 = vadd.f32 %v844_v6, %v4386_v29  ;;  %2964 = vst.msk [vmem:[%s4381_s25 + $0x8d8] sm:$0xff] %vm859_vm0, %v2808_v47 }
 0x27b   : > { %895 = vst.msk [vmem:[%s4381_s25 + $0x118] sm:$0xff] %vm859_vm0, %v845_v12  ;;  %3685 = vmatmul.msk.f32.gmra.mxu0 %vm859_vm0, %v1426_v8  ;;  %v1434_v12 = vld [vmem:[%s5011_s24 + $0xb8] sm:$0xff] }
 0x27c   : > { %3738 = vmatmul.msk.f32.gmra.mxu2 %vm859_vm0, %v2127_v9  ;;  %3793 = vmatmul.msk.f32.gmra.mxu3 %vm859_vm0, %v2578_v14  ;;  %v2135_v9 = vld [vmem:[%s4957_s17 + $0xd0] sm:$0xff]  ;;  %v2586_v14 = vld [vmem:[%s4922_s19 + $0xe0] sm:$0xff] }
 0x27d   : > { %v3307_v29 = vpop.f32.mrf.mxu1 }
 0x27e   : > { %3467 = vst.msk [vmem:[%s4381_s25 + $0xac0] sm:$0xff] %vm859_vm0, %v3307_v29 }
 0x27f   : > { %v2352_v5 = vpop.f32.mrf.mxu2  ;;  %v2811_v16 = vpop.f32.mrf.mxu3 }
 0x280   : > { %2507 = vst.msk [vmem:[%s4381_s25 + $0x728] sm:$0xff] %vm859_vm0, %v2352_v5  ;;  %v1636_v46 = vpop.f32.mrf.mxu0  ;;  %3853 = vmatmul.msk.f32.gmra.mxu1 %vm3079_vm1, %v3041_v7  ;;  %v3049_v7 = vld [vmem:[%s4842_s11 + $0x110] sm:$0xff] }
 0x281   : > { %1786 = vst.msk [vmem:[%s4381_s25 + $0x408] sm:$0xff] %vm859_vm0, %v1636_v46 }
 0x282   : > { %2965 = vst.msk [vmem:[%s4381_s25 + $0x8e0] sm:$0xff] %vm859_vm0, %v2811_v16 }
 0x283   : > { %3686 = vmatmul.msk.f32.gmra.mxu0 %vm859_vm0, %v1427_v20  ;;  %v1435_v20 = vld [vmem:[%s5011_s24 + $0xc0] sm:$0xff] }
 0x284   : > { %3739 = vmatmul.msk.f32.gmra.mxu2 %vm859_vm0, %v2128_v18  ;;  %3794 = vmatmul.msk.f32.gmra.mxu3 %vm859_vm0, %v2579_v22  ;;  %v2136_v18 = vld [vmem:[%s4957_s17 + $0xd8] sm:$0xff]  ;;  %v2587_v22 = vld [vmem:[%s4922_s19 + $0xe8] sm:$0xff] }
 0x285   : > { %v3310_v19 = vpop.f32.mrf.mxu1 }
 0x286   : > { %3468 = vst.msk [vmem:[%s4381_s25 + $0xac8] sm:$0xff] %vm859_vm0, %v3310_v19 }
 0x287   : > { %v2355_v17 = vpop.f32.mrf.mxu2  ;;  %v2814_v21 = vpop.f32.mrf.mxu3 }
 0x288   : > { %2508 = vst.msk [vmem:[%s4381_s25 + $0x730] sm:$0xff] %vm859_vm0, %v2355_v17  ;;  %v1639_v23 = vpop.f32.mrf.mxu0  ;;  %3854 = vmatmul.msk.f32.gmra.mxu1 %vm3079_vm1, %v3042_v15  ;;  %v3050_v15 = vld [vmem:[%s4842_s11 + $0x118] sm:$0xff] }
 0x289   : > { %1787 = vst.msk [vmem:[%s4381_s25 + $0x410] sm:$0xff] %vm859_vm0, %v1639_v23 }
 0x28a   : > { %2966 = vst.msk [vmem:[%s4381_s25 + $0x8e8] sm:$0xff] %vm859_vm0, %v2814_v21 }
 0x28b   : > { %3687 = vmatmul.msk.f32.gmra.mxu0 %vm859_vm0, %v1428_v24  ;;  %v1436_v24 = vld [vmem:[%s5011_s24 + $0xc8] sm:$0xff] }
 0x28c   : > { %3740 = vmatmul.msk.f32.gmra.mxu2 %vm859_vm0, %v2129_v28  ;;  %3795 = vmatmul.msk.f32.gmra.mxu3 %vm859_vm0, %v2580_v25  ;;  %v2137_v28 = vld [vmem:[%s4957_s17 + $0xe0] sm:$0xff]  ;;  %v2588_v25 = vld [vmem:[%s4922_s19 + $0xf0] sm:$0xff] }
 0x28d   : > { %v3313_v32 = vpop.f32.mrf.mxu1 }
 0x28e   : > { %3469 = vst.msk [vmem:[%s4381_s25 + $0xad0] sm:$0xff] %vm859_vm0, %v3313_v32 }
 0x28f   : > { %v2358_v56 = vpop.f32.mrf.mxu2  ;;  %v2817_v31 = vpop.f32.mrf.mxu3 }
 0x290   : > { %2509 = vst.msk [vmem:[%s4381_s25 + $0x738] sm:$0xff] %vm859_vm0, %v2358_v56  ;;  %v1642_v30 = vpop.f32.mrf.mxu0  ;;  %3855 = vmatmul.msk.f32.gmra.mxu1 %vm3079_vm1, %v3043_v34  ;;  %v3051_v34 = vld [vmem:[%s4842_s11 + $0x120] sm:$0xff] }
 0x291   : > { %1788 = vst.msk [vmem:[%s4381_s25 + $0x418] sm:$0xff] %vm859_vm0, %v1642_v30 }
 0x292   : > { %2967 = vst.msk [vmem:[%s4381_s25 + $0x8f0] sm:$0xff] %vm859_vm0, %v2817_v31 }
 0x293   : > { %3688 = vmatmul.msk.f32.gmra.mxu0 %vm859_vm0, %v1429_v33  ;;  %v1437_v33 = vld [vmem:[%s5011_s24 + $0xd0] sm:$0xff] }
 0x294   : > { %3741 = vmatmul.msk.f32.gmra.mxu2 %vm859_vm0, %v2130_v40  ;;  %3796 = vmatmul.msk.f32.gmra.mxu3 %vm859_vm0, %v2581_v35  ;;  %v2138_v40 = vld [vmem:[%s4957_s17 + $0xe8] sm:$0xff]  ;;  %v2589_v35 = vld [vmem:[%s4922_s19 + $0xf8] sm:$0xff] }
 0x295   : > { %v3316_v37 = vpop.f32.mrf.mxu1 }
 0x296   : > { %3470 = vst.msk [vmem:[%s4381_s25 + $0xad8] sm:$0xff] %vm859_vm0, %v3316_v37 }
 0x297   : > { %v2361_v38 = vpop.f32.mrf.mxu2  ;;  %v2820_v26 = vpop.f32.mrf.mxu3 }
 0x298   : > { %2510 = vst.msk [vmem:[%s4381_s25 + $0x740] sm:$0xff] %vm859_vm0, %v2361_v38  ;;  %v1645_v43 = vpop.f32.mrf.mxu0  ;;  %3856 = vmatmul.msk.f32.gmra.mxu1 %vm3079_vm1, %v3044_v36  ;;  %v3052_v36 = vld [vmem:[%s4842_s11 + $0x128] sm:$0xff] }
 0x299   : > { %1789 = vst.msk [vmem:[%s4381_s25 + $0x420] sm:$0xff] %vm859_vm0, %v1645_v43 }
 0x29a   : > { %2968 = vst.msk [vmem:[%s4381_s25 + $0x8f8] sm:$0xff] %vm859_vm0, %v2820_v26 }
 0x29b   : > { %3689 = vmatmul.msk.f32.gmra.mxu0 %vm859_vm0, %v1430_v41  ;;  %v1438_v41 = vld [vmem:[%s5011_s24 + $0xd8] sm:$0xff] }
 0x29c   : > { %3742 = vmatmul.msk.f32.gmra.mxu2 %vm859_vm0, %v2131_v42  ;;  %3797 = vmatmul.msk.f32.gmra.mxu3 %vm859_vm0, %v2582_v48  ;;  %v2139_v42 = vld [vmem:[%s4957_s17 + $0xf0] sm:$0xff]  ;;  %v2590_v48 = vld [vmem:[%s4922_s19 + $0x100] sm:$0xff] }
 0x29d   : > { %v3319_v49 = vpop.f32.mrf.mxu1 }
 0x29e   : > { %3471 = vst.msk [vmem:[%s4381_s25 + $0xae0] sm:$0xff] %vm859_vm0, %v3319_v49 }
 0x29f   : > { %v2364_v45 = vpop.f32.mrf.mxu2  ;;  %v2823_v1 = vpop.f32.mrf.mxu3 }
 0x2a0   : > { %2511 = vst.msk [vmem:[%s4381_s25 + $0x748] sm:$0xff] %vm859_vm0, %v2364_v45  ;;  %v1648_v50 = vpop.f32.mrf.mxu0  ;;  %3857 = vmatmul.msk.f32.gmra.mxu1 %vm3079_vm1, %v3045_v58  ;;  %v3053_v58 = vld [vmem:[%s4842_s11 + $0x130] sm:$0xff] }
 0x2a1   : > { %1790 = vst.msk [vmem:[%s4381_s25 + $0x428] sm:$0xff] %vm859_vm0, %v1648_v50 }
 0x2a2   : > { %2969 = vst.msk [vmem:[%s4381_s25 + $0x900] sm:$0xff] %vm859_vm0, %v2823_v1 }
 0x2a3   : > { %3690 = vmatmul.msk.f32.gmra.mxu0 %vm859_vm0, %v1431_v57  ;;  %v1439_v57 = vld [vmem:[%s5011_s24 + $0xe0] sm:$0xff] }
 0x2a4   : > { %3743 = vmatmul.msk.f32.gmra.mxu2 %vm859_vm0, %v2132_v39  ;;  %3798 = vmatmul.msk.f32.gmra.mxu3 %vm859_vm0, %v2583_v51  ;;  %v2140_v39 = vld [vmem:[%s4957_s17 + $0xf8] sm:$0xff]  ;;  %v2591_v51 = vld [vmem:[%s4922_s19 + $0x108] sm:$0xff] }
 0x2a5   : > { %v3322_v44 = vpop.f32.mrf.mxu1 }
 0x2a6   : > { %3472 = vst.msk [vmem:[%s4381_s25 + $0xae8] sm:$0xff] %vm859_vm0, %v3322_v44 }
 0x2a7   : > { %v2367_v53 = vpop.f32.mrf.mxu2  ;;  %v2826_v55 = vpop.f32.mrf.mxu3 }
 0x2a8   : > { %2512 = vst.msk [vmem:[%s4381_s25 + $0x750] sm:$0xff] %vm859_vm0, %v2367_v53  ;;  %v1651_v54 = vpop.f32.mrf.mxu0  ;;  %3858 = vmatmul.msk.f32.gmra.mxu1 %vm3079_vm1, %v3046_v52  ;;  %v3054_v52 = vld [vmem:[%s4842_s11 + $0x138] sm:$0xff] }
 0x2a9   : > { %1791 = vst.msk [vmem:[%s4381_s25 + $0x430] sm:$0xff] %vm859_vm0, %v1651_v54 }
 0x2aa   : > { %2970 = vst.msk [vmem:[%s4381_s25 + $0x908] sm:$0xff] %vm859_vm0, %v2826_v55 }
 0x2ab   : > { %3691 = vmatmul.msk.f32.gmra.mxu0 %vm859_vm0, %v1432_v11  ;;  %v1440_v11 = vld [vmem:[%s5011_s24 + $0xe8] sm:$0xff] }
 0x2ac   : > { %3744 = vmatmul.msk.f32.gmra.mxu2 %vm859_vm0, %v2133_v3  ;;  %3799 = vmatmul.msk.f32.gmra.mxu3 %vm859_vm0, %v2584_v61  ;;  %v2141_v3 = vld [vmem:[%s4957_s17 + $0x100] sm:$0xff]  ;;  %v2592_v61 = vld [vmem:[%s4922_s19 + $0x110] sm:$0xff] }
 0x2ad   : > { %v3325_v62 = vpop.f32.mrf.mxu1 }
 0x2ae   : > { %3473 = vst.msk [vmem:[%s4381_s25 + $0xaf0] sm:$0xff] %vm859_vm0, %v3325_v62 }
 0x2af   : > { %v2370_v59 = vpop.f32.mrf.mxu2  ;;  %v2829_v60 = vpop.f32.mrf.mxu3 }
 0x2b0   : > { %2513 = vst.msk [vmem:[%s4381_s25 + $0x758] sm:$0xff] %vm859_vm0, %v2370_v59  ;;  %v1654_v10 = vpop.f32.mrf.mxu0  ;;  %3859 = vmatmul.msk.f32.gmra.mxu1 %vm3079_vm1, %v3047_v0  ;;  %v3055_v0 = vld [vmem:[%s4842_s11 + $0x140] sm:$0xff] }
 0x2b1   : > { %1792 = vst.msk [vmem:[%s4381_s25 + $0x438] sm:$0xff] %vm859_vm0, %v1654_v10 }
 0x2b2   : > { %2971 = vst.msk [vmem:[%s4381_s25 + $0x910] sm:$0xff] %vm859_vm0, %v2829_v60 }
 0x2b3   : > { %3692 = vmatmul.msk.f32.gmra.mxu0 %vm859_vm0, %v1433_v2  ;;  %v1441_v2 = vld [vmem:[%s5011_s24 + $0xf0] sm:$0xff] }
 0x2b4   : > { %3745 = vmatmul.msk.f32.gmra.mxu2 %vm859_vm0, %v2134_v63  ;;  %3800 = vmatmul.msk.f32.gmra.mxu3 %vm859_vm0, %v2585_v13  ;;  %v2142_v63 = vld [vmem:[%s4957_s17 + $0x108] sm:$0xff]  ;;  %v2593_v13 = vld [vmem:[%s4922_s19 + $0x118] sm:$0xff] }
 0x2b5   : > { %v3328_v4 = vpop.f32.mrf.mxu1 }
 0x2b6   : > { %3474 = vst.msk [vmem:[%s4381_s25 + $0xaf8] sm:$0xff] %vm859_vm0, %v3328_v4 }
 0x2b7   : > { %v2373_v47 = vpop.f32.mrf.mxu2  ;;  %v2832_v6 = vpop.f32.mrf.mxu3 }
 0x2b8   : > { %2514 = vst.msk [vmem:[%s4381_s25 + $0x760] sm:$0xff] %vm859_vm0, %v2373_v47  ;;  %v1657_v8 = vpop.f32.mrf.mxu0  ;;  %3860 = vmatmul.msk.f32.gmra.mxu1 %vm3079_vm1, %v3048_v27  ;;  %v3056_v27 = vld [vmem:[%s4842_s11 + $0x148] sm:$0xff] }
 0x2b9   : > { %1793 = vst.msk [vmem:[%s4381_s25 + $0x440] sm:$0xff] %vm859_vm0, %v1657_v8 }
 0x2ba   : > { %2972 = vst.msk [vmem:[%s4381_s25 + $0x918] sm:$0xff] %vm859_vm0, %v2832_v6 }
 0x2bb   : > { %3693 = vmatmul.msk.f32.gmra.mxu0 %vm859_vm0, %v1434_v12  ;;  %v1442_v12 = vld [vmem:[%s5011_s24 + $0xf8] sm:$0xff] }
 0x2bc   : > { %3746 = vmatmul.msk.f32.gmra.mxu2 %vm859_vm0, %v2135_v9  ;;  %3801 = vmatmul.msk.f32.gmra.mxu3 %vm859_vm0, %v2586_v14  ;;  %v2143_v9 = vld [vmem:[%s4957_s17 + $0x110] sm:$0xff]  ;;  %v2594_v14 = vld [vmem:[%s4922_s19 + $0x120] sm:$0xff] }
 0x2bd   : > { %v3331_v29 = vpop.f32.mrf.mxu1 }
 0x2be   : > { %3475 = vst.msk [vmem:[%s4381_s25 + $0xb00] sm:$0xff] %vm859_vm0, %v3331_v29 }
 0x2bf   : > { %v2376_v5 = vpop.f32.mrf.mxu2  ;;  %v2835_v16 = vpop.f32.mrf.mxu3 }
 0x2c0   : > { %2515 = vst.msk [vmem:[%s4381_s25 + $0x768] sm:$0xff] %vm859_vm0, %v2376_v5  ;;  %v1660_v46 = vpop.f32.mrf.mxu0  ;;  %3861 = vmatmul.msk.f32.gmra.mxu1 %vm3079_vm1, %v3049_v7  ;;  %v3057_v7 = vld [vmem:[%s4842_s11 + $0x150] sm:$0xff] }
 0x2c1   : > { %1794 = vst.msk [vmem:[%s4381_s25 + $0x448] sm:$0xff] %vm859_vm0, %v1660_v46 }
 0x2c2   : > { %2973 = vst.msk [vmem:[%s4381_s25 + $0x920] sm:$0xff] %vm859_vm0, %v2835_v16 }
 0x2c3   : > { %3694 = vmatmul.msk.f32.gmra.mxu0 %vm859_vm0, %v1435_v20  ;;  %v1443_v20 = vld [vmem:[%s5011_s24 + $0x100] sm:$0xff] }
 0x2c4   : > { %3747 = vmatmul.msk.f32.gmra.mxu2 %vm859_vm0, %v2136_v18  ;;  %3802 = vmatmul.msk.f32.gmra.mxu3 %vm859_vm0, %v2587_v22  ;;  %v2144_v18 = vld [vmem:[%s4957_s17 + $0x118] sm:$0xff]  ;;  %v2595_v22 = vld [vmem:[%s4922_s19 + $0x128] sm:$0xff] }
 0x2c5   : > { %v3334_v19 = vpop.f32.mrf.mxu1 }
 0x2c6   : > { %3476 = vst.msk [vmem:[%s4381_s25 + $0xb08] sm:$0xff] %vm859_vm0, %v3334_v19 }
 0x2c7   : > { %v2379_v17 = vpop.f32.mrf.mxu2  ;;  %v2838_v21 = vpop.f32.mrf.mxu3 }
 0x2c8   : > { %2516 = vst.msk [vmem:[%s4381_s25 + $0x770] sm:$0xff] %vm859_vm0, %v2379_v17  ;;  %v1663_v23 = vpop.f32.mrf.mxu0  ;;  %3862 = vmatmul.msk.f32.gmra.mxu1 %vm3079_vm1, %v3050_v15  ;;  %v3058_v15 = vld [vmem:[%s4842_s11 + $0x158] sm:$0xff] }
 0x2c9   : > { %1795 = vst.msk [vmem:[%s4381_s25 + $0x450] sm:$0xff] %vm859_vm0, %v1663_v23 }
 0x2ca   : > { %2974 = vst.msk [vmem:[%s4381_s25 + $0x928] sm:$0xff] %vm859_vm0, %v2838_v21 }
 0x2cb   : > { %3695 = vmatmul.msk.f32.gmra.mxu0 %vm859_vm0, %v1436_v24  ;;  %v1444_v24 = vld [vmem:[%s5011_s24 + $0x108] sm:$0xff] }
 0x2cc   : > { %3748 = vmatmul.msk.f32.gmra.mxu2 %vm859_vm0, %v2137_v28  ;;  %3803 = vmatmul.msk.f32.gmra.mxu3 %vm859_vm0, %v2588_v25  ;;  %v2145_v28 = vld [vmem:[%s4957_s17 + $0x120] sm:$0xff]  ;;  %v2596_v25 = vld [vmem:[%s4922_s19 + $0x130] sm:$0xff] }
 0x2cd   : > { %v3337_v32 = vpop.f32.mrf.mxu1 }
 0x2ce   : > { %3477 = vst.msk [vmem:[%s4381_s25 + $0xb10] sm:$0xff] %vm859_vm0, %v3337_v32 }
 0x2cf   : > { %v2382_v56 = vpop.f32.mrf.mxu2  ;;  %v2841_v31 = vpop.f32.mrf.mxu3 }
 0x2d0   : > { %2517 = vst.msk [vmem:[%s4381_s25 + $0x778] sm:$0xff] %vm859_vm0, %v2382_v56  ;;  %v1666_v30 = vpop.f32.mrf.mxu0  ;;  %3863 = vmatmul.msk.f32.gmra.mxu1 %vm3079_vm1, %v3051_v34  ;;  %v3059_v34 = vld [vmem:[%s4842_s11 + $0x160] sm:$0xff] }
 0x2d1   : > { %1796 = vst.msk [vmem:[%s4381_s25 + $0x458] sm:$0xff] %vm859_vm0, %v1666_v30 }
 0x2d2   : > { %2975 = vst.msk [vmem:[%s4381_s25 + $0x930] sm:$0xff] %vm859_vm0, %v2841_v31 }
 0x2d3   : > { %3696 = vmatmul.msk.f32.gmra.mxu0 %vm859_vm0, %v1437_v33  ;;  %v1445_v33 = vld [vmem:[%s5011_s24 + $0x110] sm:$0xff] }
 0x2d4   : > { %3749 = vmatmul.msk.f32.gmra.mxu2 %vm859_vm0, %v2138_v40  ;;  %3804 = vmatmul.msk.f32.gmra.mxu3 %vm859_vm0, %v2589_v35  ;;  %v2146_v40 = vld [vmem:[%s4957_s17 + $0x128] sm:$0xff]  ;;  %v2597_v35 = vld [vmem:[%s4922_s19 + $0x138] sm:$0xff] }
 0x2d5   : > { %v3340_v37 = vpop.f32.mrf.mxu1 }
 0x2d6   : > { %3478 = vst.msk [vmem:[%s4381_s25 + $0xb18] sm:$0xff] %vm859_vm0, %v3340_v37 }
 0x2d7   : > { %v2385_v38 = vpop.f32.mrf.mxu2  ;;  %v2844_v26 = vpop.f32.mrf.mxu3 }
 0x2d8   : > { %2518 = vst.msk [vmem:[%s4381_s25 + $0x780] sm:$0xff] %vm859_vm0, %v2385_v38  ;;  %v1669_v43 = vpop.f32.mrf.mxu0  ;;  %3864 = vmatmul.msk.f32.gmra.mxu1 %vm3079_vm1, %v3052_v36  ;;  %v3060_v36 = vld [vmem:[%s4842_s11 + $0x168] sm:$0xff] }
 0x2d9   : > { %1797 = vst.msk [vmem:[%s4381_s25 + $0x460] sm:$0xff] %vm859_vm0, %v1669_v43 }
 0x2da   : > { %2976 = vst.msk [vmem:[%s4381_s25 + $0x938] sm:$0xff] %vm859_vm0, %v2844_v26 }
 0x2db   : > { %3697 = vmatmul.msk.f32.gmra.mxu0 %vm859_vm0, %v1438_v41  ;;  %v1446_v41 = vld [vmem:[%s5011_s24 + $0x118] sm:$0xff] }
 0x2dc   : > { %3750 = vmatmul.msk.f32.gmra.mxu2 %vm859_vm0, %v2139_v42  ;;  %3805 = vmatmul.msk.f32.gmra.mxu3 %vm859_vm0, %v2590_v48  ;;  %v2147_v42 = vld [vmem:[%s4957_s17 + $0x130] sm:$0xff]  ;;  %v2598_v48 = vld [vmem:[%s4922_s19 + $0x140] sm:$0xff] }
 0x2dd   : > { %v3343_v49 = vpop.f32.mrf.mxu1 }
 0x2de   : > { %3479 = vst.msk [vmem:[%s4381_s25 + $0xb20] sm:$0xff] %vm859_vm0, %v3343_v49 }
 0x2df   : > { %v2388_v45 = vpop.f32.mrf.mxu2  ;;  %v2847_v1 = vpop.f32.mrf.mxu3 }
 0x2e0   : > { %2519 = vst.msk [vmem:[%s4381_s25 + $0x788] sm:$0xff] %vm859_vm0, %v2388_v45  ;;  %v1672_v50 = vpop.f32.mrf.mxu0  ;;  %3865 = vmatmul.msk.f32.gmra.mxu1 %vm3079_vm1, %v3053_v58  ;;  %v3061_v58 = vld [vmem:[%s4842_s11 + $0x170] sm:$0xff] }
 0x2e1   : > { %1798 = vst.msk [vmem:[%s4381_s25 + $0x468] sm:$0xff] %vm859_vm0, %v1672_v50 }
 0x2e2   : > { %2977 = vst.msk [vmem:[%s4381_s25 + $0x940] sm:$0xff] %vm859_vm0, %v2847_v1 }
 0x2e3   : > { %3698 = vmatmul.msk.f32.gmra.mxu0 %vm859_vm0, %v1439_v57  ;;  %v1447_v57 = vld [vmem:[%s5011_s24 + $0x120] sm:$0xff] }
 0x2e4   : > { %3751 = vmatmul.msk.f32.gmra.mxu2 %vm859_vm0, %v2140_v39  ;;  %3806 = vmatmul.msk.f32.gmra.mxu3 %vm859_vm0, %v2591_v51  ;;  %v2148_v39 = vld [vmem:[%s4957_s17 + $0x138] sm:$0xff]  ;;  %v2599_v51 = vld [vmem:[%s4922_s19 + $0x148] sm:$0xff] }
 0x2e5   : > { %v3346_v44 = vpop.f32.mrf.mxu1 }
 0x2e6   : > { %3480 = vst.msk [vmem:[%s4381_s25 + $0xb28] sm:$0xff] %vm859_vm0, %v3346_v44 }
 0x2e7   : > { %v2391_v53 = vpop.f32.mrf.mxu2  ;;  %v2850_v55 = vpop.f32.mrf.mxu3 }
 0x2e8   : > { %2520 = vst.msk [vmem:[%s4381_s25 + $0x790] sm:$0xff] %vm859_vm0, %v2391_v53  ;;  %v1675_v54 = vpop.f32.mrf.mxu0  ;;  %3866 = vmatmul.msk.f32.gmra.mxu1 %vm3079_vm1, %v3054_v52  ;;  %v3062_v52 = vld [vmem:[%s4842_s11 + $0x178] sm:$0xff] }
 0x2e9   : > { %1799 = vst.msk [vmem:[%s4381_s25 + $0x470] sm:$0xff] %vm859_vm0, %v1675_v54 }
 0x2ea   : > { %2978 = vst.msk [vmem:[%s4381_s25 + $0x948] sm:$0xff] %vm859_vm0, %v2850_v55 }
 0x2eb   : > { %3699 = vmatmul.msk.f32.gmra.mxu0 %vm859_vm0, %v1440_v11  ;;  %v1448_v11 = vld [vmem:[%s5011_s24 + $0x128] sm:$0xff] }
 0x2ec   : > { %3752 = vmatmul.msk.f32.gmra.mxu2 %vm859_vm0, %v2141_v3  ;;  %3807 = vmatmul.msk.f32.gmra.mxu3 %vm859_vm0, %v2592_v61  ;;  %v2149_v3 = vld [vmem:[%s4957_s17 + $0x140] sm:$0xff]  ;;  %v2600_v61 = vld [vmem:[%s4922_s19 + $0x150] sm:$0xff] }
 0x2ed   : > { %v3349_v62 = vpop.f32.mrf.mxu1 }
 0x2ee   : > { %3481 = vst.msk [vmem:[%s4381_s25 + $0xb30] sm:$0xff] %vm859_vm0, %v3349_v62 }
 0x2ef   : > { %v2394_v59 = vpop.f32.mrf.mxu2  ;;  %v2853_v60 = vpop.f32.mrf.mxu3 }
 0x2f0   : > { %2521 = vst.msk [vmem:[%s4381_s25 + $0x798] sm:$0xff] %vm859_vm0, %v2394_v59  ;;  %v1678_v10 = vpop.f32.mrf.mxu0  ;;  %3867 = vmatmul.msk.f32.gmra.mxu1 %vm3079_vm1, %v3055_v0  ;;  %v3063_v0 = vld [vmem:[%s4842_s11 + $0x180] sm:$0xff] }
 0x2f1   : > { %1800 = vst.msk [vmem:[%s4381_s25 + $0x478] sm:$0xff] %vm859_vm0, %v1678_v10 }
 0x2f2   : > { %2979 = vst.msk [vmem:[%s4381_s25 + $0x950] sm:$0xff] %vm859_vm0, %v2853_v60 }
 0x2f3   : > { %3700 = vmatmul.msk.f32.gmra.mxu0 %vm859_vm0, %v1441_v2  ;;  %v1449_v2 = vld [vmem:[%s5011_s24 + $0x130] sm:$0xff] }
 0x2f4   : > { %3753 = vmatmul.msk.f32.gmra.mxu2 %vm859_vm0, %v2142_v63  ;;  %3808 = vmatmul.msk.f32.gmra.mxu3 %vm859_vm0, %v2593_v13  ;;  %v2150_v63 = vld [vmem:[%s4957_s17 + $0x148] sm:$0xff]  ;;  %v2601_v13 = vld [vmem:[%s4922_s19 + $0x158] sm:$0xff] }
 0x2f5   : > { %v3352_v4 = vpop.f32.mrf.mxu1 }
 0x2f6   : > { %3482 = vst.msk [vmem:[%s4381_s25 + $0xb38] sm:$0xff] %vm859_vm0, %v3352_v4 }
 0x2f7   : > { %v2397_v47 = vpop.f32.mrf.mxu2  ;;  %v2856_v6 = vpop.f32.mrf.mxu3 }
 0x2f8   : > { %2522 = vst.msk [vmem:[%s4381_s25 + $0x7a0] sm:$0xff] %vm859_vm0, %v2397_v47  ;;  %v1681_v8 = vpop.f32.mrf.mxu0  ;;  %3868 = vmatmul.msk.f32.gmra.mxu1 %vm3079_vm1, %v3056_v27  ;;  %v3064_v27 = vld [vmem:[%s4842_s11 + $0x188] sm:$0xff] }
 0x2f9   : > { %1801 = vst.msk [vmem:[%s4381_s25 + $0x480] sm:$0xff] %vm859_vm0, %v1681_v8 }
 0x2fa   : > { %2980 = vst.msk [vmem:[%s4381_s25 + $0x958] sm:$0xff] %vm859_vm0, %v2856_v6 }
 0x2fb   : > { %3701 = vmatmul.msk.f32.gmra.mxu0 %vm859_vm0, %v1442_v12  ;;  %v1450_v12 = vld [vmem:[%s5011_s24 + $0x138] sm:$0xff] }
 0x2fc   : > { %3754 = vmatmul.msk.f32.gmra.mxu2 %vm859_vm0, %v2143_v9  ;;  %3809 = vmatmul.msk.f32.gmra.mxu3 %vm859_vm0, %v2594_v14  ;;  %v2151_v9 = vld [vmem:[%s4957_s17 + $0x150] sm:$0xff]  ;;  %v2602_v14 = vld [vmem:[%s4922_s19 + $0x160] sm:$0xff] }
 0x2fd   : > { %v3355_v29 = vpop.f32.mrf.mxu1 }
 0x2fe   : > { %3483 = vst.msk [vmem:[%s4381_s25 + $0xb40] sm:$0xff] %vm859_vm0, %v3355_v29 }
 0x2ff   : > { %v2400_v5 = vpop.f32.mrf.mxu2  ;;  %v2859_v16 = vpop.f32.mrf.mxu3 }
 0x300   : > { %2523 = vst.msk [vmem:[%s4381_s25 + $0x7a8] sm:$0xff] %vm859_vm0, %v2400_v5  ;;  %v1684_v46 = vpop.f32.mrf.mxu0  ;;  %3869 = vmatmul.msk.f32.gmra.mxu1 %vm3079_vm1, %v3057_v7  ;;  %v3065_v7 = vld [vmem:[%s4842_s11 + $0x190] sm:$0xff] }
 0x301   : > { %1802 = vst.msk [vmem:[%s4381_s25 + $0x488] sm:$0xff] %vm859_vm0, %v1684_v46 }
 0x302   : > { %2981 = vst.msk [vmem:[%s4381_s25 + $0x960] sm:$0xff] %vm859_vm0, %v2859_v16 }
 0x303   : > { %3702 = vmatmul.msk.f32.gmra.mxu0 %vm859_vm0, %v1443_v20  ;;  %v1451_v20 = vld [vmem:[%s5011_s24 + $0x140] sm:$0xff] }
 0x304   : > { %3755 = vmatmul.msk.f32.gmra.mxu2 %vm859_vm0, %v2144_v18  ;;  %3810 = vmatmul.msk.f32.gmra.mxu3 %vm859_vm0, %v2595_v22  ;;  %v2152_v18 = vld [vmem:[%s4957_s17 + $0x158] sm:$0xff]  ;;  %v2603_v22 = vld [vmem:[%s4922_s19 + $0x168] sm:$0xff] }
 0x305   : > { %v3358_v19 = vpop.f32.mrf.mxu1 }
 0x306   : > { %3484 = vst.msk [vmem:[%s4381_s25 + $0xb48] sm:$0xff] %vm859_vm0, %v3358_v19 }
 0x307   : > { %v2403_v17 = vpop.f32.mrf.mxu2  ;;  %v2862_v21 = vpop.f32.mrf.mxu3 }
 0x308   : > { %2524 = vst.msk [vmem:[%s4381_s25 + $0x7b0] sm:$0xff] %vm859_vm0, %v2403_v17  ;;  %v1687_v23 = vpop.f32.mrf.mxu0  ;;  %3870 = vmatmul.msk.f32.gmra.mxu1 %vm3079_vm1, %v3058_v15  ;;  %v3066_v15 = vld [vmem:[%s4842_s11 + $0x198] sm:$0xff] }
 0x309   : > { %1803 = vst.msk [vmem:[%s4381_s25 + $0x490] sm:$0xff] %vm859_vm0, %v1687_v23 }
 0x30a   : > { %2982 = vst.msk [vmem:[%s4381_s25 + $0x968] sm:$0xff] %vm859_vm0, %v2862_v21 }
 0x30b   : > { %3703 = vmatmul.msk.f32.gmra.mxu0 %vm859_vm0, %v1444_v24  ;;  %v1452_v24 = vld [vmem:[%s5011_s24 + $0x148] sm:$0xff] }
 0x30c   : > { %3756 = vmatmul.msk.f32.gmra.mxu2 %vm859_vm0, %v2145_v28  ;;  %3811 = vmatmul.msk.f32.gmra.mxu3 %vm859_vm0, %v2596_v25  ;;  %v2153_v28 = vld [vmem:[%s4957_s17 + $0x160] sm:$0xff]  ;;  %v2604_v25 = vld [vmem:[%s4922_s19 + $0x170] sm:$0xff] }
 0x30d   : > { %v3361_v32 = vpop.f32.mrf.mxu1 }
 0x30e   : > { %3485 = vst.msk [vmem:[%s4381_s25 + $0xb50] sm:$0xff] %vm859_vm0, %v3361_v32 }
 0x30f   : > { %v2406_v56 = vpop.f32.mrf.mxu2  ;;  %v2865_v31 = vpop.f32.mrf.mxu3 }
 0x310   : > { %2525 = vst.msk [vmem:[%s4381_s25 + $0x7b8] sm:$0xff] %vm859_vm0, %v2406_v56  ;;  %v1690_v30 = vpop.f32.mrf.mxu0  ;;  %3871 = vmatmul.msk.f32.gmra.mxu1 %vm3079_vm1, %v3059_v34  ;;  %v3067_v34 = vld [vmem:[%s4842_s11 + $0x1a0] sm:$0xff] }
 0x311   : > { %1804 = vst.msk [vmem:[%s4381_s25 + $0x498] sm:$0xff] %vm859_vm0, %v1690_v30 }
 0x312   : > { %2983 = vst.msk [vmem:[%s4381_s25 + $0x970] sm:$0xff] %vm859_vm0, %v2865_v31 }
 0x313   : > { %3704 = vmatmul.msk.f32.gmra.mxu0 %vm859_vm0, %v1445_v33  ;;  %v1453_v33 = vld [vmem:[%s5011_s24 + $0x150] sm:$0xff] }
 0x314   : > { %3757 = vmatmul.msk.f32.gmra.mxu2 %vm859_vm0, %v2146_v40  ;;  %3812 = vmatmul.msk.f32.gmra.mxu3 %vm859_vm0, %v2597_v35  ;;  %v2154_v40 = vld [vmem:[%s4957_s17 + $0x168] sm:$0xff]  ;;  %v2605_v35 = vld [vmem:[%s4922_s19 + $0x178] sm:$0xff] }
 0x315   : > { %v3364_v37 = vpop.f32.mrf.mxu1 }
 0x316   : > { %3486 = vst.msk [vmem:[%s4381_s25 + $0xb58] sm:$0xff] %vm859_vm0, %v3364_v37 }
 0x317   : > { %v2409_v38 = vpop.f32.mrf.mxu2  ;;  %v2868_v26 = vpop.f32.mrf.mxu3 }
 0x318   : > { %2526 = vst.msk [vmem:[%s4381_s25 + $0x7c0] sm:$0xff] %vm859_vm0, %v2409_v38  ;;  %v1693_v43 = vpop.f32.mrf.mxu0  ;;  %3872 = vmatmul.msk.f32.gmra.mxu1 %vm3079_vm1, %v3060_v36  ;;  %v3068_v36 = vld [vmem:[%s4842_s11 + $0x1a8] sm:$0xff] }
 0x319   : > { %1805 = vst.msk [vmem:[%s4381_s25 + $0x4a0] sm:$0xff] %vm859_vm0, %v1693_v43 }
 0x31a   : > { %2984 = vst.msk [vmem:[%s4381_s25 + $0x978] sm:$0xff] %vm859_vm0, %v2868_v26 }
 0x31b   : > { %3705 = vmatmul.msk.f32.gmra.mxu0 %vm859_vm0, %v1446_v41  ;;  %v1454_v41 = vld [vmem:[%s5011_s24 + $0x158] sm:$0xff] }
 0x31c   : > { %3758 = vmatmul.msk.f32.gmra.mxu2 %vm859_vm0, %v2147_v42  ;;  %3813 = vmatmul.msk.f32.gmra.mxu3 %vm859_vm0, %v2598_v48  ;;  %v2155_v42 = vld [vmem:[%s4957_s17 + $0x170] sm:$0xff]  ;;  %v2606_v48 = vld [vmem:[%s4922_s19 + $0x180] sm:$0xff] }
 0x31d   : > { %v3367_v49 = vpop.f32.mrf.mxu1 }
 0x31e   : > { %3487 = vst.msk [vmem:[%s4381_s25 + $0xb60] sm:$0xff] %vm859_vm0, %v3367_v49 }
 0x31f   : > { %v2412_v45 = vpop.f32.mrf.mxu2  ;;  %v2871_v1 = vpop.f32.mrf.mxu3 }
 0x320   : > { %2527 = vst.msk [vmem:[%s4381_s25 + $0x7c8] sm:$0xff] %vm859_vm0, %v2412_v45  ;;  %v1696_v50 = vpop.f32.mrf.mxu0  ;;  %3873 = vmatmul.msk.f32.gmra.mxu1 %vm3079_vm1, %v3061_v58  ;;  %v3069_v58 = vld [vmem:[%s4842_s11 + $0x1b0] sm:$0xff] }
 0x321   : > { %1806 = vst.msk [vmem:[%s4381_s25 + $0x4a8] sm:$0xff] %vm859_vm0, %v1696_v50 }
 0x322   : > { %2985 = vst.msk [vmem:[%s4381_s25 + $0x980] sm:$0xff] %vm859_vm0, %v2871_v1 }
 0x323   : > { %3706 = vmatmul.msk.f32.gmra.mxu0 %vm859_vm0, %v1447_v57  ;;  %v1455_v57 = vld [vmem:[%s5011_s24 + $0x160] sm:$0xff] }
 0x324   : > { %3759 = vmatmul.msk.f32.gmra.mxu2 %vm859_vm0, %v2148_v39  ;;  %3814 = vmatmul.msk.f32.gmra.mxu3 %vm859_vm0, %v2599_v51  ;;  %v2156_v39 = vld [vmem:[%s4957_s17 + $0x178] sm:$0xff]  ;;  %v2607_v51 = vld [vmem:[%s4922_s19 + $0x188] sm:$0xff] }
 0x325   : > { %v3370_v44 = vpop.f32.mrf.mxu1 }
 0x326   : > { %3488 = vst.msk [vmem:[%s4381_s25 + $0xb68] sm:$0xff] %vm859_vm0, %v3370_v44 }
 0x327   : > { %v2415_v53 = vpop.f32.mrf.mxu2  ;;  %v2874_v55 = vpop.f32.mrf.mxu3 }
 0x328   : > { %2528 = vst.msk [vmem:[%s4381_s25 + $0x7d0] sm:$0xff] %vm859_vm0, %v2415_v53  ;;  %v1699_v54 = vpop.f32.mrf.mxu0  ;;  %3874 = vmatmul.msk.f32.gmra.mxu1 %vm3079_vm1, %v3062_v52  ;;  %v3070_v52 = vld [vmem:[%s4842_s11 + $0x1b8] sm:$0xff] }
 0x329   : > { %1807 = vst.msk [vmem:[%s4381_s25 + $0x4b0] sm:$0xff] %vm859_vm0, %v1699_v54 }
 0x32a   : > { %2986 = vst.msk [vmem:[%s4381_s25 + $0x988] sm:$0xff] %vm859_vm0, %v2874_v55 }
 0x32b   : > { %3707 = vmatmul.msk.f32.gmra.mxu0 %vm859_vm0, %v1448_v11  ;;  %v1456_v11 = vld [vmem:[%s5011_s24 + $0x168] sm:$0xff] }
 0x32c   : > { %3760 = vmatmul.msk.f32.gmra.mxu2 %vm859_vm0, %v2149_v3  ;;  %3815 = vmatmul.msk.f32.gmra.mxu3 %vm859_vm0, %v2600_v61  ;;  %v2157_v3 = vld [vmem:[%s4957_s17 + $0x180] sm:$0xff]  ;;  %v2608_v61 = vld [vmem:[%s4922_s19 + $0x190] sm:$0xff] }
 0x32d   : > { %v3373_v62 = vpop.f32.mrf.mxu1 }
 0x32e   : > { %3489 = vst.msk [vmem:[%s4381_s25 + $0xb70] sm:$0xff] %vm859_vm0, %v3373_v62 }
 0x32f   : > { %v2418_v59 = vpop.f32.mrf.mxu2  ;;  %v2877_v60 = vpop.f32.mrf.mxu3 }
 0x330   : > { %2529 = vst.msk [vmem:[%s4381_s25 + $0x7d8] sm:$0xff] %vm859_vm0, %v2418_v59  ;;  %v1702_v10 = vpop.f32.mrf.mxu0  ;;  %3875 = vmatmul.msk.f32.gmra.mxu1 %vm3079_vm1, %v3063_v0  ;;  %v3071_v0 = vld [vmem:[%s4842_s11 + $0x1c0] sm:$0xff] }
 0x331   : > { %1808 = vst.msk [vmem:[%s4381_s25 + $0x4b8] sm:$0xff] %vm859_vm0, %v1702_v10 }
 0x332   : > { %2987 = vst.msk [vmem:[%s4381_s25 + $0x990] sm:$0xff] %vm859_vm0, %v2877_v60 }
 0x333   : > { %3708 = vmatmul.msk.f32.gmra.mxu0 %vm859_vm0, %v1449_v2  ;;  %v1457_v2 = vld [vmem:[%s5011_s24 + $0x170] sm:$0xff] }
 0x334   : > { %3761 = vmatmul.msk.f32.gmra.mxu2 %vm859_vm0, %v2150_v63  ;;  %3816 = vmatmul.msk.f32.gmra.mxu3 %vm859_vm0, %v2601_v13  ;;  %v2158_v63 = vld [vmem:[%s4957_s17 + $0x188] sm:$0xff]  ;;  %v2609_v13 = vld [vmem:[%s4922_s19 + $0x198] sm:$0xff] }
 0x335   : > { %v3376_v4 = vpop.f32.mrf.mxu1 }
 0x336   : > { %3490 = vst.msk [vmem:[%s4381_s25 + $0xb78] sm:$0xff] %vm859_vm0, %v3376_v4 }
 0x337   : > { %v2421_v47 = vpop.f32.mrf.mxu2  ;;  %v2880_v6 = vpop.f32.mrf.mxu3 }
 0x338   : > { %2530 = vst.msk [vmem:[%s4381_s25 + $0x7e0] sm:$0xff] %vm859_vm0, %v2421_v47  ;;  %v1705_v8 = vpop.f32.mrf.mxu0  ;;  %3876 = vmatmul.msk.f32.gmra.mxu1 %vm3079_vm1, %v3064_v27  ;;  %v3072_v27 = vld [vmem:[%s4842_s11 + $0x1c8] sm:$0xff] }
 0x339   : > { %1809 = vst.msk [vmem:[%s4381_s25 + $0x4c0] sm:$0xff] %vm859_vm0, %v1705_v8 }
 0x33a   : > { %2988 = vst.msk [vmem:[%s4381_s25 + $0x998] sm:$0xff] %vm859_vm0, %v2880_v6 }
 0x33b   : > { %3709 = vmatmul.msk.f32.gmra.mxu0 %vm859_vm0, %v1450_v12  ;;  %v1458_v12 = vld [vmem:[%s5011_s24 + $0x178] sm:$0xff] }
 0x33c   : > { %3762 = vmatmul.msk.f32.gmra.mxu2 %vm859_vm0, %v2151_v9  ;;  %3817 = vmatmul.msk.f32.gmra.mxu3 %vm859_vm0, %v2602_v14  ;;  %v2159_v9 = vld [vmem:[%s4957_s17 + $0x190] sm:$0xff]  ;;  %v2610_v14 = vld [vmem:[%s4922_s19 + $0x1a0] sm:$0xff] }
 0x33d   : > { %v3379_v29 = vpop.f32.mrf.mxu1 }
 0x33e   : > { %3491 = vst.msk [vmem:[%s4381_s25 + $0xb80] sm:$0xff] %vm859_vm0, %v3379_v29 }
 0x33f   : > { %v2424_v5 = vpop.f32.mrf.mxu2  ;;  %v2883_v16 = vpop.f32.mrf.mxu3 }
 0x340   : > { %2531 = vst.msk [vmem:[%s4381_s25 + $0x7e8] sm:$0xff] %vm859_vm0, %v2424_v5  ;;  %v1708_v46 = vpop.f32.mrf.mxu0  ;;  %3877 = vmatmul.msk.f32.gmra.mxu1 %vm3079_vm1, %v3065_v7  ;;  %v3073_v7 = vld [vmem:[%s4842_s11 + $0x1d0] sm:$0xff] }
 0x341   : > { %1810 = vst.msk [vmem:[%s4381_s25 + $0x4c8] sm:$0xff] %vm859_vm0, %v1708_v46 }
 0x342   : > { %2989 = vst.msk [vmem:[%s4381_s25 + $0x9a0] sm:$0xff] %vm859_vm0, %v2883_v16 }
 0x343   : > { %3710 = vmatmul.msk.f32.gmra.mxu0 %vm859_vm0, %v1451_v20  ;;  %v1459_v20 = vld [vmem:[%s5011_s24 + $0x180] sm:$0xff] }
 0x344   : > { %3763 = vmatmul.msk.f32.gmra.mxu2 %vm859_vm0, %v2152_v18  ;;  %3818 = vmatmul.msk.f32.gmra.mxu3 %vm859_vm0, %v2603_v22  ;;  %v2160_v18 = vld [vmem:[%s4957_s17 + $0x198] sm:$0xff]  ;;  %v2611_v22 = vld [vmem:[%s4922_s19 + $0x1a8] sm:$0xff] }
 0x345   : > { %v3382_v19 = vpop.f32.mrf.mxu1 }
 0x346   : > { %3492 = vst.msk [vmem:[%s4381_s25 + $0xb88] sm:$0xff] %vm859_vm0, %v3382_v19 }
 0x347   : > { %v2427_v17 = vpop.f32.mrf.mxu2  ;;  %v2886_v21 = vpop.f32.mrf.mxu3 }
 0x348   : > { %2532 = vst.msk [vmem:[%s4381_s25 + $0x7f0] sm:$0xff] %vm859_vm0, %v2427_v17  ;;  %v1711_v23 = vpop.f32.mrf.mxu0  ;;  %3878 = vmatmul.msk.f32.gmra.mxu1 %vm3079_vm1, %v3066_v15  ;;  %v3074_v15 = vld [vmem:[%s4842_s11 + $0x1d8] sm:$0xff] }
 0x349   : > { %1811 = vst.msk [vmem:[%s4381_s25 + $0x4d0] sm:$0xff] %vm859_vm0, %v1711_v23 }
 0x34a   : > { %2990 = vst.msk [vmem:[%s4381_s25 + $0x9a8] sm:$0xff] %vm859_vm0, %v2886_v21 }
 0x34b   : > { %3711 = vmatmul.msk.f32.gmra.mxu0 %vm859_vm0, %v1452_v24  ;;  %v1460_v24 = vld [vmem:[%s5011_s24 + $0x188] sm:$0xff] }
 0x34c   : > { %3764 = vmatmul.msk.f32.gmra.mxu2 %vm859_vm0, %v2153_v28  ;;  %3819 = vmatmul.msk.f32.gmra.mxu3 %vm859_vm0, %v2604_v25  ;;  %v2161_v28 = vld [vmem:[%s4957_s17 + $0x1a0] sm:$0xff] }
 0x34d   : > { %v3385_v32 = vpop.f32.mrf.mxu1 }
 0x34e   : > { %3493 = vst.msk [vmem:[%s4381_s25 + $0xb90] sm:$0xff] %vm859_vm0, %v3385_v32 }
 0x34f   : > { %v2430_v56 = vpop.f32.mrf.mxu2  ;;  %v2889_v31 = vpop.f32.mrf.mxu3 }
 0x350   : > { %2533 = vst.msk [vmem:[%s4381_s25 + $0x7f8] sm:$0xff] %vm859_vm0, %v2430_v56  ;;  %v1714_v30 = vpop.f32.mrf.mxu0  ;;  %3879 = vmatmul.msk.f32.gmra.mxu1 %vm3079_vm1, %v3067_v34 }
 0x351   : > { %1812 = vst.msk [vmem:[%s4381_s25 + $0x4d8] sm:$0xff] %vm859_vm0, %v1714_v30 }
 0x352   : > { %2991 = vst.msk [vmem:[%s4381_s25 + $0x9b0] sm:$0xff] %vm859_vm0, %v2889_v31 }
 0x353   : > { %3712 = vmatmul.msk.f32.gmra.mxu0 %vm859_vm0, %v1453_v33 }
 0x354   : > { %3765 = vmatmul.msk.f32.gmra.mxu2 %vm859_vm0, %v2154_v40  ;;  %3820 = vmatmul.msk.f32.gmra.mxu3 %vm859_vm0, %v2605_v35 }
 0x355   : > { %v3388_v37 = vpop.f32.mrf.mxu1 }
 0x356   : > { %3494 = vst.msk [vmem:[%s4381_s25 + $0xb98] sm:$0xff] %vm859_vm0, %v3388_v37 }
 0x357   : > { %v2433_v38 = vpop.f32.mrf.mxu2  ;;  %v2892_v26 = vpop.f32.mrf.mxu3 }
 0x358   : > { %2534 = vst.msk [vmem:[%s4381_s25 + $0x800] sm:$0xff] %vm859_vm0, %v2433_v38  ;;  %v1717_v43 = vpop.f32.mrf.mxu0  ;;  %3880 = vmatmul.msk.f32.gmra.mxu1 %vm3079_vm1, %v3068_v36 }
 0x359   : > { %1813 = vst.msk [vmem:[%s4381_s25 + $0x4e0] sm:$0xff] %vm859_vm0, %v1717_v43 }
 0x35a   : > { %2992 = vst.msk [vmem:[%s4381_s25 + $0x9b8] sm:$0xff] %vm859_vm0, %v2892_v26 }
 0x35b   : > { %3713 = vmatmul.msk.f32.gmra.mxu0 %vm859_vm0, %v1454_v41 }
 0x35c   : > { %3766 = vmatmul.msk.f32.gmra.mxu2 %vm859_vm0, %v2155_v42  ;;  %3821 = vmatmul.msk.f32.gmra.mxu3 %vm859_vm0, %v2606_v48 }
 0x35d   : > { %v3391_v49 = vpop.f32.mrf.mxu1 }
 0x35e   : > { %3495 = vst.msk [vmem:[%s4381_s25 + $0xba0] sm:$0xff] %vm859_vm0, %v3391_v49 }
 0x35f   : > { %v2436_v45 = vpop.f32.mrf.mxu2  ;;  %v2895_v1 = vpop.f32.mrf.mxu3 }
 0x360   : > { %2535 = vst.msk [vmem:[%s4381_s25 + $0x808] sm:$0xff] %vm859_vm0, %v2436_v45  ;;  %v1720_v50 = vpop.f32.mrf.mxu0  ;;  %3881 = vmatmul.msk.f32.gmra.mxu1 %vm3079_vm1, %v3069_v58 }
 0x361   : > { %1814 = vst.msk [vmem:[%s4381_s25 + $0x4e8] sm:$0xff] %vm859_vm0, %v1720_v50 }
 0x362   : > { %2993 = vst.msk [vmem:[%s4381_s25 + $0x9c0] sm:$0xff] %vm859_vm0, %v2895_v1 }
 0x363   : > { %3714 = vmatmul.msk.f32.gmra.mxu0 %vm859_vm0, %v1455_v57 }
 0x364   : > { %3767 = vmatmul.msk.f32.gmra.mxu2 %vm859_vm0, %v2156_v39  ;;  %3822 = vmatmul.msk.f32.gmra.mxu3 %vm859_vm0, %v2607_v51 }
 0x365   : > { %v3394_v44 = vpop.f32.mrf.mxu1 }
 0x366   : > { %3496 = vst.msk [vmem:[%s4381_s25 + $0xba8] sm:$0xff] %vm859_vm0, %v3394_v44 }
 0x367   : > { %v2439_v53 = vpop.f32.mrf.mxu2  ;;  %v2898_v55 = vpop.f32.mrf.mxu3 }
 0x368   : > { %2536 = vst.msk [vmem:[%s4381_s25 + $0x810] sm:$0xff] %vm859_vm0, %v2439_v53  ;;  %v1723_v54 = vpop.f32.mrf.mxu0  ;;  %3882 = vmatmul.msk.f32.gmra.mxu1 %vm3079_vm1, %v3070_v52 }
 0x369   : > { %1815 = vst.msk [vmem:[%s4381_s25 + $0x4f0] sm:$0xff] %vm859_vm0, %v1723_v54 }
 0x36a   : > { %2994 = vst.msk [vmem:[%s4381_s25 + $0x9c8] sm:$0xff] %vm859_vm0, %v2898_v55 }
 0x36b   : > { %3715 = vmatmul.msk.f32.gmra.mxu0 %vm859_vm0, %v1456_v11 }
 0x36c   : > { %3768 = vmatmul.msk.f32.gmra.mxu2 %vm859_vm0, %v2157_v3  ;;  %3823 = vmatmul.msk.f32.gmra.mxu3 %vm859_vm0, %v2608_v61 }
 0x36d   : > { %v3397_v62 = vpop.f32.mrf.mxu1 }
 0x36e   : > { %3497 = vst.msk [vmem:[%s4381_s25 + $0xbb0] sm:$0xff] %vm859_vm0, %v3397_v62 }
 0x36f   : > { %v2442_v59 = vpop.f32.mrf.mxu2  ;;  %v2901_v60 = vpop.f32.mrf.mxu3 }
 0x370   : > { %2537 = vst.msk [vmem:[%s4381_s25 + $0x818] sm:$0xff] %vm859_vm0, %v2442_v59  ;;  %v1726_v10 = vpop.f32.mrf.mxu0  ;;  %3883 = vmatmul.msk.f32.gmra.mxu1 %vm3079_vm1, %v3071_v0 }
 0x371   : > { %1816 = vst.msk [vmem:[%s4381_s25 + $0x4f8] sm:$0xff] %vm859_vm0, %v1726_v10 }
 0x372   : > { %2995 = vst.msk [vmem:[%s4381_s25 + $0x9d0] sm:$0xff] %vm859_vm0, %v2901_v60 }
 0x373   : > { %3716 = vmatmul.msk.f32.gmra.mxu0 %vm859_vm0, %v1457_v2 }
 0x374   : > { %3769 = vmatmul.msk.f32.gmra.mxu2 %vm859_vm0, %v2158_v63  ;;  %3824 = vmatmul.msk.f32.gmra.mxu3 %vm859_vm0, %v2609_v13 }
 0x375   : > { %v3400_v4 = vpop.f32.mrf.mxu1 }
 0x376   : > { %3498 = vst.msk [vmem:[%s4381_s25 + $0xbb8] sm:$0xff] %vm859_vm0, %v3400_v4 }
 0x377   : > { %v2445_v47 = vpop.f32.mrf.mxu2  ;;  %v2904_v6 = vpop.f32.mrf.mxu3 }
 0x378   : > { %2538 = vst.msk [vmem:[%s4381_s25 + $0x820] sm:$0xff] %vm859_vm0, %v2445_v47  ;;  %v1729_v8 = vpop.f32.mrf.mxu0  ;;  %3884 = vmatmul.msk.f32.gmra.mxu1 %vm3079_vm1, %v3072_v27 }
 0x379   : > { %1817 = vst.msk [vmem:[%s4381_s25 + $0x500] sm:$0xff] %vm859_vm0, %v1729_v8 }
 0x37a   : > { %2996 = vst.msk [vmem:[%s4381_s25 + $0x9d8] sm:$0xff] %vm859_vm0, %v2904_v6 }
 0x37b   : > { %3717 = vmatmul.msk.f32.gmra.mxu0 %vm859_vm0, %v1458_v12 }
 0x37c   : > { %3770 = vmatmul.msk.f32.gmra.mxu2 %vm859_vm0, %v2159_v9  ;;  %3825 = vmatmul.msk.f32.gmra.mxu3 %vm859_vm0, %v2610_v14 }
 0x37d   : > { %v3403_v29 = vpop.f32.mrf.mxu1 }
 0x37e   : > { %3499 = vst.msk [vmem:[%s4381_s25 + $0xbc0] sm:$0xff] %vm859_vm0, %v3403_v29 }
 0x37f   : > { %v2448_v5 = vpop.f32.mrf.mxu2  ;;  %v2907_v16 = vpop.f32.mrf.mxu3 }
 0x380   : > { %2539 = vst.msk [vmem:[%s4381_s25 + $0x828] sm:$0xff] %vm859_vm0, %v2448_v5  ;;  %v1732_v46 = vpop.f32.mrf.mxu0  ;;  %3885 = vmatmul.msk.f32.gmra.mxu1 %vm3079_vm1, %v3073_v7 }
 0x381   : > { %1818 = vst.msk [vmem:[%s4381_s25 + $0x508] sm:$0xff] %vm859_vm0, %v1732_v46 }
 0x382   : > { %2997 = vst.msk [vmem:[%s4381_s25 + $0x9e0] sm:$0xff] %vm859_vm0, %v2907_v16 }
 0x383   : > { %3718 = vmatmul.msk.f32.gmra.mxu0 %vm859_vm0, %v1459_v20 }
 0x384   : > { %3771 = vmatmul.msk.f32.gmra.mxu2 %vm859_vm0, %v2160_v18  ;;  %3826 = vmatmul.msk.f32.gmra.mxu3 %vm859_vm0, %v2611_v22 }
 0x385   : > { %v3406_v19 = vpop.f32.mrf.mxu1 }
 0x386   : > { %3500 = vst.msk [vmem:[%s4381_s25 + $0xbc8] sm:$0xff] %vm859_vm0, %v3406_v19 }
 0x387   : > { %v2451_v17 = vpop.f32.mrf.mxu2  ;;  %v2910_v21 = vpop.f32.mrf.mxu3 }
 0x388   : > { %2540 = vst.msk [vmem:[%s4381_s25 + $0x830] sm:$0xff] %vm859_vm0, %v2451_v17  ;;  %v1735_v23 = vpop.f32.mrf.mxu0  ;;  %3886 = vmatmul.msk.f32.gmra.mxu1 %vm3079_vm1, %v3074_v15 }
 0x389   : > { %1819 = vst.msk [vmem:[%s4381_s25 + $0x510] sm:$0xff] %vm859_vm0, %v1735_v23 }
 0x38a   : > { %2998 = vst.msk [vmem:[%s4381_s25 + $0x9e8] sm:$0xff] %vm859_vm0, %v2910_v21 }
 0x38b   : > { %3719 = vmatmul.msk.f32.gmra.mxu0 %vm859_vm0, %v1460_v24 }
 0x38c   : > { %3772 = vmatmul.msk.f32.gmra.mxu2 %vm859_vm0, %v2161_v28 }
 0x38d   : > { %v3409_v25 = vpop.f32.mrf.mxu1 }
 0x38e   : > { %3501 = vst.msk [vmem:[%s4381_s25 + $0xbd0] sm:$0xff] %vm859_vm0, %v3409_v25 }
 0x38f   : > { %v2454_v32 = vpop.f32.mrf.mxu2  ;;  %v2913_v34 = vpop.f32.mrf.mxu3 }
 0x390   : > { %2541 = vst.msk [vmem:[%s4381_s25 + $0x838] sm:$0xff] %vm859_vm0, %v2454_v32  ;;  %v1738_v56 = vpop.f32.mrf.mxu0 }
 0x391   : > { %1820 = vst.msk [vmem:[%s4381_s25 + $0x518] sm:$0xff] %vm859_vm0, %v1738_v56 }
 0x392   : > { %2999 = vst.msk [vmem:[%s4381_s25 + $0x9f0] sm:$0xff] %vm859_vm0, %v2913_v34 }
 0x395   : > { %v3412_v31 = vpop.f32.mrf.mxu1 }
 0x396   : > { %3502 = vst.msk [vmem:[%s4381_s25 + $0xbd8] sm:$0xff] %vm859_vm0, %v3412_v31 }
 0x397   : > { %v2457_v30 = vpop.f32.mrf.mxu2  ;;  %v2916_v33 = vpop.f32.mrf.mxu3 }
 0x398   : > { %2542 = vst.msk [vmem:[%s4381_s25 + $0x840] sm:$0xff] %vm859_vm0, %v2457_v30  ;;  %v1741_v40 = vpop.f32.mrf.mxu0 }
 0x399   : > { %1821 = vst.msk [vmem:[%s4381_s25 + $0x520] sm:$0xff] %vm859_vm0, %v1741_v40 }
 0x39a   : > { %3000 = vst.msk [vmem:[%s4381_s25 + $0x9f8] sm:$0xff] %vm859_vm0, %v2916_v33 }
 0x39d   : > { %v3415_v35 = vpop.f32.mrf.mxu1 }
 0x39e   : > { %3503 = vst.msk [vmem:[%s4381_s25 + $0xbe0] sm:$0xff] %vm859_vm0, %v3415_v35 }
 0x39f   : > { %v2460_v37 = vpop.f32.mrf.mxu2  ;;  %v2919_v36 = vpop.f32.mrf.mxu3 }
 0x3a0   : > { %2543 = vst.msk [vmem:[%s4381_s25 + $0x848] sm:$0xff] %vm859_vm0, %v2460_v37  ;;  %v1744_v38 = vpop.f32.mrf.mxu0 }
 0x3a1   : > { %1822 = vst.msk [vmem:[%s4381_s25 + $0x528] sm:$0xff] %vm859_vm0, %v1744_v38 }
 0x3a2   : > { %3001 = vst.msk [vmem:[%s4381_s25 + $0xa00] sm:$0xff] %vm859_vm0, %v2919_v36 }
 0x3a5   : > { %v3418_v26 = vpop.f32.mrf.mxu1 }
 0x3a6   : > { %3504 = vst.msk [vmem:[%s4381_s25 + $0xbe8] sm:$0xff] %vm859_vm0, %v3418_v26 }
 0x3a7   : > { %v2463_v43 = vpop.f32.mrf.mxu2  ;;  %v2922_v41 = vpop.f32.mrf.mxu3 }
 0x3a8   : > { %2544 = vst.msk [vmem:[%s4381_s25 + $0x850] sm:$0xff] %vm859_vm0, %v2463_v43  ;;  %v1747_v42 = vpop.f32.mrf.mxu0 }
 0x3a9   : > { %1823 = vst.msk [vmem:[%s4381_s25 + $0x530] sm:$0xff] %vm859_vm0, %v1747_v42 }
 0x3aa   : > { %3002 = vst.msk [vmem:[%s4381_s25 + $0xa08] sm:$0xff] %vm859_vm0, %v2922_v41 }
 0x3ad   : > { %v3421_v48 = vpop.f32.mrf.mxu1 }
 0x3ae   : > { %3505 = vst.msk [vmem:[%s4381_s25 + $0xbf0] sm:$0xff] %vm859_vm0, %v3421_v48 }
 0x3af   : > { %v2466_v49 = vpop.f32.mrf.mxu2  ;;  %v2925_v58 = vpop.f32.mrf.mxu3 }
 0x3b0   : > { %2545 = vst.msk [vmem:[%s4381_s25 + $0x858] sm:$0xff] %vm859_vm0, %v2466_v49  ;;  %v1750_v45 = vpop.f32.mrf.mxu0 }
 0x3b1   : > { %1824 = vst.msk [vmem:[%s4381_s25 + $0x538] sm:$0xff] %vm859_vm0, %v1750_v45 }
 0x3b2   : > { %3003 = vst.msk [vmem:[%s4381_s25 + $0xa10] sm:$0xff] %vm859_vm0, %v2925_v58 }
 0x3b5   : > { %v3424_v1 = vpop.f32.mrf.mxu1 }
 0x3b6   : > { %3506 = vst.msk [vmem:[%s4381_s25 + $0xbf8] sm:$0xff] %vm859_vm0, %v3424_v1 }
 0x3b7   : > { %v2469_v50 = vpop.f32.mrf.mxu2  ;;  %v2928_v57 = vpop.f32.mrf.mxu3 }
 0x3b8   : > { %2546 = vst.msk [vmem:[%s4381_s25 + $0x860] sm:$0xff] %vm859_vm0, %v2469_v50  ;;  %v1753_v39 = vpop.f32.mrf.mxu0 }
 0x3b9   : > { %1825 = vst.msk [vmem:[%s4381_s25 + $0x540] sm:$0xff] %vm859_vm0, %v1753_v39 }
 0x3ba   : > { %3004 = vst.msk [vmem:[%s4381_s25 + $0xa18] sm:$0xff] %vm859_vm0, %v2928_v57 }
 0x3bd   : > { %v3427_v51 = vpop.f32.mrf.mxu1 }
 0x3be   : > { %3507 = vst.msk [vmem:[%s4381_s25 + $0xc00] sm:$0xff] %vm859_vm0, %v3427_v51 }
 0x3bf   : > { %v2472_v44 = vpop.f32.mrf.mxu2  ;;  %v2931_v52 = vpop.f32.mrf.mxu3 }
 0x3c0   : > { %2547 = vst.msk [vmem:[%s4381_s25 + $0x868] sm:$0xff] %vm859_vm0, %v2472_v44  ;;  %v1756_v53 = vpop.f32.mrf.mxu0 }
 0x3c1   : > { %1826 = vst.msk [vmem:[%s4381_s25 + $0x548] sm:$0xff] %vm859_vm0, %v1756_v53 }
 0x3c2   : > { %3005 = vst.msk [vmem:[%s4381_s25 + $0xa20] sm:$0xff] %vm859_vm0, %v2931_v52 }
 0x3c5   : > { %v3430_v55 = vpop.f32.mrf.mxu1 }
 0x3c6   : > { %3508 = vst.msk [vmem:[%s4381_s25 + $0xc08] sm:$0xff] %vm859_vm0, %v3430_v55 }
 0x3c7   : > { %v2475_v54 = vpop.f32.mrf.mxu2  ;;  %v2934_v11 = vpop.f32.mrf.mxu3 }
 0x3c8   : > { %2548 = vst.msk [vmem:[%s4381_s25 + $0x870] sm:$0xff] %vm859_vm0, %v2475_v54  ;;  %v1759_v3 = vpop.f32.mrf.mxu0 }
 0x3c9   : > { %1827 = vst.msk [vmem:[%s4381_s25 + $0x550] sm:$0xff] %vm859_vm0, %v1759_v3 }
 0x3ca   : > { %3006 = vst.msk [vmem:[%s4381_s25 + $0xa28] sm:$0xff] %vm859_vm0, %v2934_v11 }
 0x3cd   : > { %v3433_v61 = vpop.f32.mrf.mxu1 }
 0x3ce   : > { %3509 = vst.msk [vmem:[%s4381_s25 + $0xc10] sm:$0xff] %vm859_vm0, %v3433_v61 }
 0x3cf   : > { %v2478_v62 = vpop.f32.mrf.mxu2  ;;  %v2937_v0 = vpop.f32.mrf.mxu3 }
 0x3d0   : > { %2549 = vst.msk [vmem:[%s4381_s25 + $0x878] sm:$0xff] %vm859_vm0, %v2478_v62  ;;  %v1762_v59 = vpop.f32.mrf.mxu0 }
 0x3d1   : > { %1828 = vst.msk [vmem:[%s4381_s25 + $0x558] sm:$0xff] %vm859_vm0, %v1762_v59 }
 0x3d2   : > { %3007 = vst.msk [vmem:[%s4381_s25 + $0xa30] sm:$0xff] %vm859_vm0, %v2937_v0 }
 0x3d5   : > { %v3436_v60 = vpop.f32.mrf.mxu1 }
 0x3d6   : > { %3510 = vst.msk [vmem:[%s4381_s25 + $0xc18] sm:$0xff] %vm859_vm0, %v3436_v60 }
 0x3d7   : > { %v2481_v10 = vpop.f32.mrf.mxu2  ;;  %v2940_v2 = vpop.f32.mrf.mxu3 }
 0x3d8   : > { %2550 = vst.msk [vmem:[%s4381_s25 + $0x880] sm:$0xff] %vm859_vm0, %v2481_v10  ;;  %v1765_v63 = vpop.f32.mrf.mxu0 }
 0x3d9   : > { %1829 = vst.msk [vmem:[%s4381_s25 + $0x560] sm:$0xff] %vm859_vm0, %v1765_v63 }
 0x3da   : > { %3008 = vst.msk [vmem:[%s4381_s25 + $0xa38] sm:$0xff] %vm859_vm0, %v2940_v2 }
 0x3dd   : > { %v3439_v13 = vpop.f32.mrf.mxu1 }
 0x3de   : > { %3511 = vst.msk [vmem:[%s4381_s25 + $0xc20] sm:$0xff] %vm859_vm0, %v3439_v13 }
 0x3df   : > { %v2484_v4 = vpop.f32.mrf.mxu2  ;;  %v2943_v27 = vpop.f32.mrf.mxu3 }
 0x3e0   : > { %2551 = vst.msk [vmem:[%s4381_s25 + $0x888] sm:$0xff] %vm859_vm0, %v2484_v4  ;;  %v1768_v47 = vpop.f32.mrf.mxu0 }
 0x3e1   : > { %1830 = vst.msk [vmem:[%s4381_s25 + $0x568] sm:$0xff] %vm859_vm0, %v1768_v47 }
 0x3e2   : > { %3009 = vst.msk [vmem:[%s4381_s25 + $0xa40] sm:$0xff] %vm859_vm0, %v2943_v27 }
 0x3e5   : > { %v3442_v6 = vpop.f32.mrf.mxu1 }
 0x3e6   : > { %3512 = vst.msk [vmem:[%s4381_s25 + $0xc28] sm:$0xff] %vm859_vm0, %v3442_v6 }
 0x3e7   : > { %v2487_v8 = vpop.f32.mrf.mxu2  ;;  %v2946_v12 = vpop.f32.mrf.mxu3 }
 0x3e8   : > { %2552 = vst.msk [vmem:[%s4381_s25 + $0x890] sm:$0xff] %vm859_vm0, %v2487_v8  ;;  %v1771_v9 = vpop.f32.mrf.mxu0 }
 0x3e9   : > { %1831 = vst.msk [vmem:[%s4381_s25 + $0x570] sm:$0xff] %vm859_vm0, %v1771_v9 }
 0x3ea   : > { %3010 = vst.msk [vmem:[%s4381_s25 + $0xa48] sm:$0xff] %vm859_vm0, %v2946_v12 }
 0x3ed   : > { %v3445_v14 = vpop.f32.mrf.mxu1 }
 0x3ee   : > { %3513 = vst.msk [vmem:[%s4381_s25 + $0xc30] sm:$0xff] %vm859_vm0, %v3445_v14 }
 0x3ef   : > { %v2490_v29 = vpop.f32.mrf.mxu2  ;;  %v2949_v7 = vpop.f32.mrf.mxu3 }
 0x3f0   : > { %2553 = vst.msk [vmem:[%s4381_s25 + $0x898] sm:$0xff] %vm859_vm0, %v2490_v29  ;;  %v1774_v5 = vpop.f32.mrf.mxu0 }
 0x3f1   : > { %1832 = vst.msk [vmem:[%s4381_s25 + $0x578] sm:$0xff] %vm859_vm0, %v1774_v5 }
 0x3f2   : > { %3011 = vst.msk [vmem:[%s4381_s25 + $0xa50] sm:$0xff] %vm859_vm0, %v2949_v7 }
 0x3f5   : > { %v3448_v16 = vpop.f32.mrf.mxu1 }
 0x3f6   : > { %3514 = vst.msk [vmem:[%s4381_s25 + $0xc38] sm:$0xff] %vm859_vm0, %v3448_v16 }
 0x3f7   : > { %v2493_v46 = vpop.f32.mrf.mxu2  ;;  %v2952_v20 = vpop.f32.mrf.mxu3 }
 0x3f8   : > { %2554 = vst.msk [vmem:[%s4381_s25 + $0x8a0] sm:$0xff] %vm859_vm0, %v2493_v46  ;;  %v1777_v18 = vpop.f32.mrf.mxu0 }
 0x3f9   : > { %1833 = vst.msk [vmem:[%s4381_s25 + $0x580] sm:$0xff] %vm859_vm0, %v1777_v18 }
 0x3fa   : > { %3012 = vst.msk [vmem:[%s4381_s25 + $0xa58] sm:$0xff] %vm859_vm0, %v2952_v20 }
 0x3fd   : > { %v3451_v22 = vpop.f32.mrf.mxu1 }
 0x3fe   : > { %3515 = vst.msk [vmem:[%s4381_s25 + $0xc40] sm:$0xff] %vm859_vm0, %v3451_v22 }
 0x3ff   : > { %v2496_v19 = vpop.f32.mrf.mxu2  ;;  %v2955_v15 = vpop.f32.mrf.mxu3 }
 0x400   : > { %2555 = vst.msk [vmem:[%s4381_s25 + $0x8a8] sm:$0xff] %vm859_vm0, %v2496_v19  ;;  %v1780_v17 = vpop.f32.mrf.mxu0 }
 0x401   : > { %1834 = vst.msk [vmem:[%s4381_s25 + $0x588] sm:$0xff] %vm859_vm0, %v1780_v17 }
 0x402   : > { %3013 = vst.msk [vmem:[%s4381_s25 + $0xa60] sm:$0xff] %vm859_vm0, %v2955_v15 }
 0x405   : > { %v3454_v21 = vpop.f32.mrf.mxu1 }
 0x406   : > { %3516 = vst.msk [vmem:[%s4381_s25 + $0xc48] sm:$0xff] %vm859_vm0, %v3454_v21 }
 0x407   : > { %v2499_v23 = vpop.f32.mrf.mxu2  ;;  %v2958_v24 = vpop.f32.mrf.mxu3 }
 0x408   : > { %2556 = vst.msk [vmem:[%s4381_s25 + $0x8b0] sm:$0xff] %vm859_vm0, %v2499_v23  ;;  %v1783_v28 = vpop.f32.mrf.mxu0 }
 0x409   : > { %1835 = vst.msk [vmem:[%s4381_s25 + $0x590] sm:$0xff] %vm859_vm0, %v1783_v28 }
 0x40a   : > { %3014 = vst.msk [vmem:[%s4381_s25 + $0xa68] sm:$0xff] %vm859_vm0, %v2958_v24 }
 0x40f   : > { %v2502_v25 = vpop.f32.mrf.mxu2 }
 0x410   : > { %2557 = vst.msk [vmem:[%s4381_s25 + $0x8b8] sm:$0xff] %vm859_vm0, %v2502_v25 }
 0x411 PF: > { %s19_s30 = sadd.s32 1, %s3960_s30  }
 0x412   : > { %p16_p4 = scmp.ge.s32.totalorder %s19_s30, 4  }
 0x414   :  { %18 = sbr.rel (!%p16_p4) target bundleno = 1 (0x1), region = 107 }

</bundles_post_ra>
